<compile_context>
chip_gen: v6e
topology: v6e:2x2x1
jax: 0.10.0
libtpu: 0.0.40
codegen_flags: <defaults>
</compile_context>

<pallas_src>
import numpy as np
import jax
import jax.numpy as jnp
from jax import lax
from jax.experimental import pallas as pl
from jax.experimental.pallas import tpu as pltpu


# ----------------------------------------------------------------------------
# Small helpers used inside the kernel (cyclic shifts via concat -> unambiguous)
# ----------------------------------------------------------------------------
def _shift_rows(v, s):
    """out[:, r, :] = v[:, (r + s) % R, :]  (shift along the sublane axis)."""
    return jnp.concatenate([v[:, s:, :], v[:, :s, :]], axis=1)


def _shift_lanes(v, s):
    """out[:, :, l] = v[:, :, (l + s) % L]  (shift along the lane axis)."""
    return jnp.concatenate([v[:, :, s:], v[:, :, :s]], axis=2)


# ----------------------------------------------------------------------------
# Fused SmallNet forward kernel: one batch tile per grid step
# ----------------------------------------------------------------------------
def _smallnet_kernel(x_ref, t1_ref, t2_ref, w1_ref, w2_ref,
                     cb1_ref, cb2_ref, fb1_ref, fb2_ref, o_ref):
    bt = x_ref.shape[0]
    f32, bf16 = jnp.float32, jnp.bfloat16

    # Cast the input tile to bf16 once; all 5 conv1 taps slice this copy.
    x_bf = x_ref[...].astype(bf16)                           # [bt, 28, 28]

    # ---- conv1: 5 accumulating MXU matmuls against banded weights ----------
    # acc1[(b, ho), wo*10 + co] = conv1 (pre-bias), ho, wo in [0, 24)
    acc1 = jnp.zeros((bt * 24, 240), f32)
    for i in range(5):                                       # kernel row tap
        lhs = x_bf[:, i:i + 24, :].reshape(bt * 24, 28)
        acc1 = acc1 + jnp.dot(lhs, t1_ref[i], preferred_element_type=f32)

    # ---- maxpool 2x2 + bias + relu (kept dilated: valid at even positions) -
    v1 = acc1.reshape(bt, 24, 240)
    v1 = jnp.maximum(v1, _shift_rows(v1, 1))      # pool along H (row pairs)
    v1 = jnp.maximum(v1, _shift_lanes(v1, 10))    # pool along W (lane-group stride 10)
    a1 = jnp.maximum(v1 + cb1_ref[...], 0.0)      # [bt, 24, 240] f32
    a1_bf = a1.astype(bf16)                       # single cast for all conv2 taps
    # valid entries: rows 2*hp (hp<12), lanes 20*wp + ci (wp<12, ci<10)

    # ---- conv2: 5 accumulating MXU matmuls against banded weights ----------
    # acc2[(b, h), wo2*20 + co]; valid output rows are even (h = 2*ho2)
    acc2 = jnp.zeros((bt * 16, 160), f32)
    for i in range(5):                                       # kernel row tap
        lhs = a1_bf[:, 2 * i:2 * i + 16, :].reshape(bt * 16, 240)
        acc2 = acc2 + jnp.dot(lhs, t2_ref[i], preferred_element_type=f32)

    v2 = acc2.reshape(bt, 16, 160)
    v2 = jnp.maximum(v2, _shift_rows(v2, 2))      # pool along H (valid-row stride 2)
    v2 = jnp.maximum(v2, _shift_lanes(v2, 20))    # pool along W (lane-group stride 20)
    a2 = jnp.maximum(v2 + cb2_ref[...], 0.0)      # [bt, 16, 160] f32
    a2_bf = a2.astype(bf16)                       # single cast for the fc1 taps
    # valid entries: rows 4*hp (hp<4), lanes 40*wp + co (wp<4, co<20)

    # ---- fc1 (+bias, relu): 4 accumulating matmuls over the pooled rows ----
    h1 = jnp.zeros((bt, 50), f32)
    for hp in range(4):
        lhs = a2_bf[:, 4 * hp, :]                            # [bt, 160]
        h1 = h1 + jnp.dot(lhs, w1_ref[hp], preferred_element_type=f32)
    h1 = jnp.maximum(h1 + fb1_ref[...], 0.0)                 # [bt, 50]

    # ---- fc2 + log_softmax --------------------------------------------------
    z = jnp.dot(h1.astype(bf16), w2_ref[...], preferred_element_type=f32)
    z = z + fb2_ref[...]                                     # [bt, 10]
    z = z - jnp.max(z, axis=-1, keepdims=True)
    z = z - jnp.log(jnp.sum(jnp.exp(z), axis=-1, keepdims=True))
    o_ref[:, 0, :] = z.astype(o_ref.dtype)


# ----------------------------------------------------------------------------
# One-time host-side weight preparation (hoisted out of the traced forward)
# ----------------------------------------------------------------------------
def prepare_params(params):
    w1 = np.asarray(params["conv1_w"], np.float32)   # [10, 1, 5, 5]
    b1 = np.asarray(params["conv1_b"], np.float32)   # [10]
    w2 = np.asarray(params["conv2_w"], np.float32)   # [20, 10, 5, 5]
    b2 = np.asarray(params["conv2_b"], np.float32)   # [20]
    fw1 = np.asarray(params["fc1_w"], np.float32)    # [50, 320]
    fb1 = np.asarray(params["fc1_b"], np.float32)    # [50]
    fw2 = np.asarray(params["fc2_w"], np.float32)    # [10, 50]
    fb2 = np.asarray(params["fc2_b"], np.float32)    # [10]

    # conv1 banded matrix: T1[i, w_in, wo*10 + co] = w1[co, 0, i, w_in - wo]
    t1 = np.zeros((5, 28, 24 * 10), np.float32)
    for i in range(5):
        for wo in range(24):
            for j in range(5):
                t1[i, wo + j, wo * 10:wo * 10 + 10] = w1[:, 0, i, j]

    # conv2 banded matrix: input lanes 20*wp + ci of the (dilated) pooled conv1
    # output, output lanes 20*wo2 + co.  Input lanes with (l % 20) >= 10 are
    # pooling "garbage" and keep zero weights.
    t2 = np.zeros((5, 240, 8 * 20), np.float32)
    for i in range(5):
        for wo2 in range(8):
            for j in range(5):
                wp = wo2 + j
                for ci in range(10):
                    t2[i, 20 * wp + ci, 20 * wo2:20 * wo2 + 20] = w2[:, ci, i, j]

    # fc1: valid a2 lanes are 40*wp + co (garbage lanes -> zero rows); rows 4*hp.
    # PyTorch view(-1, 320) flatten order of [20, 4, 4] is idx = co*16 + hp*4 + wp.
    w1b = np.zeros((4, 160, 50), np.float32)
    for hp in range(4):
        for wp in range(4):
            for co in range(20):
                w1b[hp, 40 * wp + co, :] = fw1[:, co * 16 + hp * 4 + wp]

    return {
        "T1": jnp.asarray(t1, jnp.bfloat16),
        "T2": jnp.asarray(t2, jnp.bfloat16),
        "W1": jnp.asarray(w1b, jnp.bfloat16),
        "W2": jnp.asarray(fw2.T, jnp.bfloat16),                       # [50, 10]
        "cb1": jnp.asarray(np.tile(b1, 24).reshape(1, 240), jnp.float32),
        "cb2": jnp.asarray(np.tile(b2, 8).reshape(1, 160), jnp.float32),
        "fb1": jnp.asarray(fb1.reshape(1, 50), jnp.float32),
        "fb2": jnp.asarray(fb2.reshape(1, 10), jnp.float32),
    }


# ----------------------------------------------------------------------------
# Forward wrapper: single pallas_call, grid over batch tiles
# ----------------------------------------------------------------------------
def _pick_batch_tile(B):
    for bb in (8, 4, 2, 1):
        if B % bb == 0 and B // bb >= 2:
            return bb
    return B


def smallnet_forward(x_nchw, prep, *, batch_tile=None):
    B = x_nchw.shape[0]
    x = x_nchw.reshape(B, 28, 28).astype(jnp.float32)   # NCHW (C=1) -> [B, 28, 28]
    bb = _pick_batch_tile(B) if batch_tile is None else batch_tile
    assert B % bb == 0

    out = pl.pallas_call(
        _smallnet_kernel,
        out_shape=jax.ShapeDtypeStruct((B, 1, 10), jnp.float32),
        grid=(B // bb,),
        in_specs=[
            pl.BlockSpec((bb, 28, 28), lambda i: (i, 0, 0)),      # x batch tile
            pl.BlockSpec((5, 28, 240), lambda i: (0, 0, 0)),      # conv1 banded W
            pl.BlockSpec((5, 240, 160), lambda i: (0, 0, 0)),     # conv2 banded W
            pl.BlockSpec((4, 160, 50), lambda i: (0, 0, 0)),      # fc1 W (reordered)
            pl.BlockSpec((50, 10), lambda i: (0, 0)),             # fc2 W
            pl.BlockSpec((1, 240), lambda i: (0, 0)),             # conv1 bias (lanes)
            pl.BlockSpec((1, 160), lambda i: (0, 0)),             # conv2 bias (lanes)
            pl.BlockSpec((1, 50), lambda i: (0, 0)),              # fc1 bias
            pl.BlockSpec((1, 10), lambda i: (0, 0)),              # fc2 bias
        ],
        out_specs=pl.BlockSpec((bb, 1, 10), lambda i: (i, 0, 0)),
        compiler_params=pltpu.CompilerParams(
            dimension_semantics=("parallel",),
            vmem_limit_bytes=32 * 1024 * 1024,
        ),
    )(x, prep["T1"], prep["T2"], prep["W1"], prep["W2"],
      prep["cb1"], prep["cb2"], prep["fb1"], prep["fb2"])
    return out.reshape(B, 10)


# ----------------------------------------------------------------------------
# Pure-JAX reference (matches the PyTorch module) + deterministic init
# ----------------------------------------------------------------------------
def smallnet_reference(x_nchw, params):
    dn = ("NCHW", "OIHW", "NCHW")
    y = lax.conv_general_dilated(x_nchw, params["conv1_w"], (1, 1), "VALID",
                                 dimension_numbers=dn)
    y = y + params["conv1_b"][None, :, None, None]
    y = lax.reduce_window(y, -jnp.inf, lax.max, (1, 1, 2, 2), (1, 1, 2, 2), "VALID")
    y = jax.nn.relu(y)
    y = lax.conv_general_dilated(y, params["conv2_w"], (1, 1), "VALID",
                                 dimension_numbers=dn)
    y = y + params["conv2_b"][None, :, None, None]
    y = lax.reduce_window(y, -jnp.inf, lax.max, (1, 1, 2, 2), (1, 1, 2, 2), "VALID")
    y = jax.nn.relu(y)
    y = y.reshape(y.shape[0], -1)                        # view(-1, 320), NCHW order
    y = jax.nn.relu(y @ params["fc1_w"].T + params["fc1_b"])
    y = y @ params["fc2_w"].T + params["fc2_b"]
    return jax.nn.log_softmax(y, axis=-1)


def init_params(key):
    ks = jax.random.split(key, 8)

    def uinit(k, shape, fan_in):
        bound = 1.0 / np.sqrt(fan_in)
        return jax.random.uniform(k, shape, jnp.float32, -bound, bound)

    return {
        "conv1_w": uinit(ks[0], (10, 1, 5, 5), 1 * 5 * 5),
        "conv1_b": uinit(ks[1], (10,), 1 * 5 * 5),
        "conv2_w": uinit(ks[2], (20, 10, 5, 5), 10 * 5 * 5),
        "conv2_b": uinit(ks[3], (20,), 10 * 5 * 5),
        "fc1_w": uinit(ks[4], (50, 320), 320),
        "fc1_b": uinit(ks[5], (50,), 320),
        "fc2_w": uinit(ks[6], (10, 50), 50),
        "fc2_b": uinit(ks[7], (10,), 50),
    }


if __name__ == "__main__":
    root = jax.random.PRNGKey(0)
    pkey, xkey = jax.random.split(root)
    params = init_params(pkey)
    prep = prepare_params(params)        # one-time host-side weight prep

    B = 8                                # SmallNet implies 28x28 single-channel input
    x = jax.random.normal(xkey, (B, 1, 28, 28), jnp.float32)

    fwd = jax.jit(smallnet_forward)
    out = jax.block_until_ready(fwd(x, prep))

    assert out.shape == (B, 10), out.shape
    # log_softmax rows must exponentiate-sum to 1
    row_sums = np.exp(np.asarray(out)).sum(axis=1)
    assert np.allclose(row_sums, 1.0, atol=1e-3), row_sums
    # compare against the plain-JAX reference (bf16 MXU operands -> loose tol)
    ref = jax.block_until_ready(jax.jit(smallnet_reference)(x, params))
    err = float(np.max(np.abs(np.asarray(out) - np.asarray(ref))))
    assert err < 7.5e-2, f"max |pallas - reference| = {err}"
    print("KERNEL_OK")
</pallas_src>

<mosaic_0001>
module attributes {stable_mosaic.version = 11 : i64} {
  func.func @_smallnet_kernel(%arg0: i32, %arg1: memref<4x28x28xf32, #tpu.memory_space<vmem>>, %arg2: memref<5x28x240xbf16, #tpu.memory_space<vmem>>, %arg3: memref<5x240x160xbf16, #tpu.memory_space<vmem>>, %arg4: memref<4x160x50xbf16, #tpu.memory_space<vmem>>, %arg5: memref<50x10xbf16, #tpu.memory_space<vmem>>, %arg6: memref<1x240xf32, #tpu.memory_space<vmem>>, %arg7: memref<1x160xf32, #tpu.memory_space<vmem>>, %arg8: memref<1x50xf32, #tpu.memory_space<vmem>>, %arg9: memref<1x10xf32, #tpu.memory_space<vmem>>, %arg10: memref<4x1x10xf32, #tpu.memory_space<vmem>>) attributes {dimension_semantics = [#tpu.dimension_semantics<parallel>], iteration_bounds = array<i64: 2>, scalar_prefetch = 0 : i64, scratch_operands = 0 : i64, tpu.core_type = #tpu.core_type<tc>, window_params = [{transform_indices = @transform_0, window_bounds = array<i64: 4, 28, 28>}, {pipeline_mode = #tpu.pipeline_mode<synchronous>, transform_indices = @transform_1, window_bounds = array<i64: 5, 28, 240>}, {pipeline_mode = #tpu.pipeline_mode<synchronous>, transform_indices = @transform_2, window_bounds = array<i64: 5, 240, 160>}, {pipeline_mode = #tpu.pipeline_mode<synchronous>, transform_indices = @transform_3, window_bounds = array<i64: 4, 160, 50>}, {pipeline_mode = #tpu.pipeline_mode<synchronous>, transform_indices = @transform_4, window_bounds = array<i64: 50, 10>}, {pipeline_mode = #tpu.pipeline_mode<synchronous>, transform_indices = @transform_5, window_bounds = array<i64: 1, 240>}, {pipeline_mode = #tpu.pipeline_mode<synchronous>, transform_indices = @transform_6, window_bounds = array<i64: 1, 160>}, {pipeline_mode = #tpu.pipeline_mode<synchronous>, transform_indices = @transform_7, window_bounds = array<i64: 1, 50>}, {pipeline_mode = #tpu.pipeline_mode<synchronous>, transform_indices = @transform_8, window_bounds = array<i64: 1, 10>}, {transform_indices = @transform_9, window_bounds = array<i64: 4, 1, 10>}]} {
    %c0 = arith.constant 0 : index
    %c0_0 = arith.constant 0 : index
    %c0_1 = arith.constant 0 : index
    %0 = vector.load %arg1[%c0, %c0_0, %c0_1] : memref<4x28x28xf32, #tpu.memory_space<vmem>>, vector<4x28x28xf32>
    %1 = arith.truncf %0 : vector<4x28x28xf32> to vector<4x28x28xbf16>
    %cst = arith.constant 0.000000e+00 : f32
    %2 = vector.broadcast %cst : f32 to vector<96x240xf32>
    %3 = vector.extract_strided_slice %1 {offsets = [0, 0, 0], sizes = [4, 24, 28], strides = [1, 1, 1]} : vector<4x28x28xbf16> to vector<4x24x28xbf16>
    %4 = vector.shape_cast %3 : vector<4x24x28xbf16> to vector<96x28xbf16>
    %c0_2 = arith.constant 0 : index
    %c0_3 = arith.constant 0 : index
    %c0_4 = arith.constant 0 : index
    %5 = vector.load %arg2[%c0_2, %c0_3, %c0_4] : memref<5x28x240xbf16, #tpu.memory_space<vmem>>, vector<1x28x240xbf16>
    %6 = vector.shape_cast %5 : vector<1x28x240xbf16> to vector<28x240xbf16>
    %cst_5 = arith.constant dense<0.000000e+00> : vector<96x240xf32>
    %7 = tpu.matmul %4, %6, %cst_5 {dimension_numbers = #tpu.dot_dimension_numbers<[1], [0], [0], [1], [0, 0, 1, 1], [], []>} : vector<96x28xbf16>, vector<28x240xbf16>, vector<96x240xf32> -> vector<96x240xf32>
    %8 = arith.addf %2, %7 : vector<96x240xf32>
    %9 = vector.extract_strided_slice %1 {offsets = [0, 1, 0], sizes = [4, 24, 28], strides = [1, 1, 1]} : vector<4x28x28xbf16> to vector<4x24x28xbf16>
    %10 = vector.shape_cast %9 : vector<4x24x28xbf16> to vector<96x28xbf16>
    %c1 = arith.constant 1 : index
    %c0_6 = arith.constant 0 : index
    %c0_7 = arith.constant 0 : index
    %11 = vector.load %arg2[%c1, %c0_6, %c0_7] : memref<5x28x240xbf16, #tpu.memory_space<vmem>>, vector<1x28x240xbf16>
    %12 = vector.shape_cast %11 : vector<1x28x240xbf16> to vector<28x240xbf16>
    %cst_8 = arith.constant dense<0.000000e+00> : vector<96x240xf32>
    %13 = tpu.matmul %10, %12, %cst_8 {dimension_numbers = #tpu.dot_dimension_numbers<[1], [0], [0], [1], [0, 0, 1, 1], [], []>} : vector<96x28xbf16>, vector<28x240xbf16>, vector<96x240xf32> -> vector<96x240xf32>
    %14 = arith.addf %8, %13 : vector<96x240xf32>
    %15 = vector.extract_strided_slice %1 {offsets = [0, 2, 0], sizes = [4, 24, 28], strides = [1, 1, 1]} : vector<4x28x28xbf16> to vector<4x24x28xbf16>
    %16 = vector.shape_cast %15 : vector<4x24x28xbf16> to vector<96x28xbf16>
    %c2 = arith.constant 2 : index
    %c0_9 = arith.constant 0 : index
    %c0_10 = arith.constant 0 : index
    %17 = vector.load %arg2[%c2, %c0_9, %c0_10] : memref<5x28x240xbf16, #tpu.memory_space<vmem>>, vector<1x28x240xbf16>
    %18 = vector.shape_cast %17 : vector<1x28x240xbf16> to vector<28x240xbf16>
    %cst_11 = arith.constant dense<0.000000e+00> : vector<96x240xf32>
    %19 = tpu.matmul %16, %18, %cst_11 {dimension_numbers = #tpu.dot_dimension_numbers<[1], [0], [0], [1], [0, 0, 1, 1], [], []>} : vector<96x28xbf16>, vector<28x240xbf16>, vector<96x240xf32> -> vector<96x240xf32>
    %20 = arith.addf %14, %19 : vector<96x240xf32>
    %21 = vector.extract_strided_slice %1 {offsets = [0, 3, 0], sizes = [4, 24, 28], strides = [1, 1, 1]} : vector<4x28x28xbf16> to vector<4x24x28xbf16>
    %22 = vector.shape_cast %21 : vector<4x24x28xbf16> to vector<96x28xbf16>
    %c3 = arith.constant 3 : index
    %c0_12 = arith.constant 0 : index
    %c0_13 = arith.constant 0 : index
    %23 = vector.load %arg2[%c3, %c0_12, %c0_13] : memref<5x28x240xbf16, #tpu.memory_space<vmem>>, vector<1x28x240xbf16>
    %24 = vector.shape_cast %23 : vector<1x28x240xbf16> to vector<28x240xbf16>
    %cst_14 = arith.constant dense<0.000000e+00> : vector<96x240xf32>
    %25 = tpu.matmul %22, %24, %cst_14 {dimension_numbers = #tpu.dot_dimension_numbers<[1], [0], [0], [1], [0, 0, 1, 1], [], []>} : vector<96x28xbf16>, vector<28x240xbf16>, vector<96x240xf32> -> vector<96x240xf32>
    %26 = arith.addf %20, %25 : vector<96x240xf32>
    %27 = vector.extract_strided_slice %1 {offsets = [0, 4, 0], sizes = [4, 24, 28], strides = [1, 1, 1]} : vector<4x28x28xbf16> to vector<4x24x28xbf16>
    %28 = vector.shape_cast %27 : vector<4x24x28xbf16> to vector<96x28xbf16>
    %c4 = arith.constant 4 : index
    %c0_15 = arith.constant 0 : index
    %c0_16 = arith.constant 0 : index
    %29 = vector.load %arg2[%c4, %c0_15, %c0_16] : memref<5x28x240xbf16, #tpu.memory_space<vmem>>, vector<1x28x240xbf16>
    %30 = vector.shape_cast %29 : vector<1x28x240xbf16> to vector<28x240xbf16>
    %cst_17 = arith.constant dense<0.000000e+00> : vector<96x240xf32>
    %31 = tpu.matmul %28, %30, %cst_17 {dimension_numbers = #tpu.dot_dimension_numbers<[1], [0], [0], [1], [0, 0, 1, 1], [], []>} : vector<96x28xbf16>, vector<28x240xbf16>, vector<96x240xf32> -> vector<96x240xf32>
    %32 = arith.addf %26, %31 : vector<96x240xf32>
    %33 = vector.shape_cast %32 : vector<96x240xf32> to vector<4x24x240xf32>
    %34 = vector.extract_strided_slice %33 {offsets = [0, 1, 0], sizes = [4, 23, 240], strides = [1, 1, 1]} : vector<4x24x240xf32> to vector<4x23x240xf32>
    %35 = vector.extract_strided_slice %33 {offsets = [0, 0, 0], sizes = [4, 1, 240], strides = [1, 1, 1]} : vector<4x24x240xf32> to vector<4x1x240xf32>
    %36 = tpu.concatenate %34, %35 in 1 : vector<4x23x240xf32>, vector<4x1x240xf32> -> vector<4x24x240xf32>
    %37 = arith.maximumf %33, %36 : vector<4x24x240xf32>
    %38 = vector.extract_strided_slice %37 {offsets = [0, 0, 10], sizes = [4, 24, 230], strides = [1, 1, 1]} : vector<4x24x240xf32> to vector<4x24x230xf32>
    %39 = vector.extract_strided_slice %37 {offsets = [0, 0, 0], sizes = [4, 24, 10], strides = [1, 1, 1]} : vector<4x24x240xf32> to vector<4x24x10xf32>
    %40 = tpu.concatenate %38, %39 in 2 : vector<4x24x230xf32>, vector<4x24x10xf32> -> vector<4x24x240xf32>
    %41 = arith.maximumf %37, %40 : vector<4x24x240xf32>
    %c0_18 = arith.constant 0 : index
    %c0_19 = arith.constant 0 : index
    %42 = vector.load %arg6[%c0_18, %c0_19] : memref<1x240xf32, #tpu.memory_space<vmem>>, vector<1x240xf32>
    %43 = vector.shape_cast %42 : vector<1x240xf32> to vector<1x1x240xf32>
    %44 = vector.broadcast %43 : vector<1x1x240xf32> to vector<4x24x240xf32>
    %45 = arith.addf %41, %44 : vector<4x24x240xf32>
    %cst_20 = arith.constant 0.000000e+00 : f32
    %46 = vector.broadcast %cst_20 : f32 to vector<4x24x240xf32>
    %47 = arith.maximumf %45, %46 : vector<4x24x240xf32>
    %48 = arith.truncf %47 : vector<4x24x240xf32> to vector<4x24x240xbf16>
    %cst_21 = arith.constant 0.000000e+00 : f32
    %49 = vector.broadcast %cst_21 : f32 to vector<64x160xf32>
    %50 = vector.extract_strided_slice %48 {offsets = [0, 0, 0], sizes = [4, 16, 240], strides = [1, 1, 1]} : vector<4x24x240xbf16> to vector<4x16x240xbf16>
    %51 = vector.shape_cast %50 : vector<4x16x240xbf16> to vector<64x240xbf16>
    %c0_22 = arith.constant 0 : index
    %c0_23 = arith.constant 0 : index
    %c0_24 = arith.constant 0 : index
    %52 = vector.load %arg3[%c0_22, %c0_23, %c0_24] : memref<5x240x160xbf16, #tpu.memory_space<vmem>>, vector<1x240x160xbf16>
    %53 = vector.shape_cast %52 : vector<1x240x160xbf16> to vector<240x160xbf16>
    %cst_25 = arith.constant dense<0.000000e+00> : vector<64x160xf32>
    %54 = tpu.matmul %51, %53, %cst_25 {dimension_numbers = #tpu.dot_dimension_numbers<[1], [0], [0], [1], [0, 0, 1, 1], [], []>} : vector<64x240xbf16>, vector<240x160xbf16>, vector<64x160xf32> -> vector<64x160xf32>
    %55 = arith.addf %49, %54 : vector<64x160xf32>
    %56 = vector.extract_strided_slice %48 {offsets = [0, 2, 0], sizes = [4, 16, 240], strides = [1, 1, 1]} : vector<4x24x240xbf16> to vector<4x16x240xbf16>
    %57 = vector.shape_cast %56 : vector<4x16x240xbf16> to vector<64x240xbf16>
    %c1_26 = arith.constant 1 : index
    %c0_27 = arith.constant 0 : index
    %c0_28 = arith.constant 0 : index
    %58 = vector.load %arg3[%c1_26, %c0_27, %c0_28] : memref<5x240x160xbf16, #tpu.memory_space<vmem>>, vector<1x240x160xbf16>
    %59 = vector.shape_cast %58 : vector<1x240x160xbf16> to vector<240x160xbf16>
    %cst_29 = arith.constant dense<0.000000e+00> : vector<64x160xf32>
    %60 = tpu.matmul %57, %59, %cst_29 {dimension_numbers = #tpu.dot_dimension_numbers<[1], [0], [0], [1], [0, 0, 1, 1], [], []>} : vector<64x240xbf16>, vector<240x160xbf16>, vector<64x160xf32> -> vector<64x160xf32>
    %61 = arith.addf %55, %60 : vector<64x160xf32>
    %62 = vector.extract_strided_slice %48 {offsets = [0, 4, 0], sizes = [4, 16, 240], strides = [1, 1, 1]} : vector<4x24x240xbf16> to vector<4x16x240xbf16>
    %63 = vector.shape_cast %62 : vector<4x16x240xbf16> to vector<64x240xbf16>
    %c2_30 = arith.constant 2 : index
    %c0_31 = arith.constant 0 : index
    %c0_32 = arith.constant 0 : index
    %64 = vector.load %arg3[%c2_30, %c0_31, %c0_32] : memref<5x240x160xbf16, #tpu.memory_space<vmem>>, vector<1x240x160xbf16>
    %65 = vector.shape_cast %64 : vector<1x240x160xbf16> to vector<240x160xbf16>
    %cst_33 = arith.constant dense<0.000000e+00> : vector<64x160xf32>
    %66 = tpu.matmul %63, %65, %cst_33 {dimension_numbers = #tpu.dot_dimension_numbers<[1], [0], [0], [1], [0, 0, 1, 1], [], []>} : vector<64x240xbf16>, vector<240x160xbf16>, vector<64x160xf32> -> vector<64x160xf32>
    %67 = arith.addf %61, %66 : vector<64x160xf32>
    %68 = vector.extract_strided_slice %48 {offsets = [0, 6, 0], sizes = [4, 16, 240], strides = [1, 1, 1]} : vector<4x24x240xbf16> to vector<4x16x240xbf16>
    %69 = vector.shape_cast %68 : vector<4x16x240xbf16> to vector<64x240xbf16>
    %c3_34 = arith.constant 3 : index
    %c0_35 = arith.constant 0 : index
    %c0_36 = arith.constant 0 : index
    %70 = vector.load %arg3[%c3_34, %c0_35, %c0_36] : memref<5x240x160xbf16, #tpu.memory_space<vmem>>, vector<1x240x160xbf16>
    %71 = vector.shape_cast %70 : vector<1x240x160xbf16> to vector<240x160xbf16>
    %cst_37 = arith.constant dense<0.000000e+00> : vector<64x160xf32>
    %72 = tpu.matmul %69, %71, %cst_37 {dimension_numbers = #tpu.dot_dimension_numbers<[1], [0], [0], [1], [0, 0, 1, 1], [], []>} : vector<64x240xbf16>, vector<240x160xbf16>, vector<64x160xf32> -> vector<64x160xf32>
    %73 = arith.addf %67, %72 : vector<64x160xf32>
    %74 = vector.extract_strided_slice %48 {offsets = [0, 8, 0], sizes = [4, 16, 240], strides = [1, 1, 1]} : vector<4x24x240xbf16> to vector<4x16x240xbf16>
    %75 = vector.shape_cast %74 : vector<4x16x240xbf16> to vector<64x240xbf16>
    %c4_38 = arith.constant 4 : index
    %c0_39 = arith.constant 0 : index
    %c0_40 = arith.constant 0 : index
    %76 = vector.load %arg3[%c4_38, %c0_39, %c0_40] : memref<5x240x160xbf16, #tpu.memory_space<vmem>>, vector<1x240x160xbf16>
    %77 = vector.shape_cast %76 : vector<1x240x160xbf16> to vector<240x160xbf16>
    %cst_41 = arith.constant dense<0.000000e+00> : vector<64x160xf32>
    %78 = tpu.matmul %75, %77, %cst_41 {dimension_numbers = #tpu.dot_dimension_numbers<[1], [0], [0], [1], [0, 0, 1, 1], [], []>} : vector<64x240xbf16>, vector<240x160xbf16>, vector<64x160xf32> -> vector<64x160xf32>
    %79 = arith.addf %73, %78 : vector<64x160xf32>
    %80 = vector.shape_cast %79 : vector<64x160xf32> to vector<4x16x160xf32>
    %81 = vector.extract_strided_slice %80 {offsets = [0, 2, 0], sizes = [4, 14, 160], strides = [1, 1, 1]} : vector<4x16x160xf32> to vector<4x14x160xf32>
    %82 = vector.extract_strided_slice %80 {offsets = [0, 0, 0], sizes = [4, 2, 160], strides = [1, 1, 1]} : vector<4x16x160xf32> to vector<4x2x160xf32>
    %83 = tpu.concatenate %81, %82 in 1 : vector<4x14x160xf32>, vector<4x2x160xf32> -> vector<4x16x160xf32>
    %84 = arith.maximumf %80, %83 : vector<4x16x160xf32>
    %85 = vector.extract_strided_slice %84 {offsets = [0, 0, 20], sizes = [4, 16, 140], strides = [1, 1, 1]} : vector<4x16x160xf32> to vector<4x16x140xf32>
    %86 = vector.extract_strided_slice %84 {offsets = [0, 0, 0], sizes = [4, 16, 20], strides = [1, 1, 1]} : vector<4x16x160xf32> to vector<4x16x20xf32>
    %87 = tpu.concatenate %85, %86 in 2 : vector<4x16x140xf32>, vector<4x16x20xf32> -> vector<4x16x160xf32>
    %88 = arith.maximumf %84, %87 : vector<4x16x160xf32>
    %c0_42 = arith.constant 0 : index
    %c0_43 = arith.constant 0 : index
    %89 = vector.load %arg7[%c0_42, %c0_43] : memref<1x160xf32, #tpu.memory_space<vmem>>, vector<1x160xf32>
    %90 = vector.shape_cast %89 : vector<1x160xf32> to vector<1x1x160xf32>
    %91 = vector.broadcast %90 : vector<1x1x160xf32> to vector<4x16x160xf32>
    %92 = arith.addf %88, %91 : vector<4x16x160xf32>
    %cst_44 = arith.constant 0.000000e+00 : f32
    %93 = vector.broadcast %cst_44 : f32 to vector<4x16x160xf32>
    %94 = arith.maximumf %92, %93 : vector<4x16x160xf32>
    %95 = arith.truncf %94 : vector<4x16x160xf32> to vector<4x16x160xbf16>
    %cst_45 = arith.constant 0.000000e+00 : f32
    %96 = vector.broadcast %cst_45 : f32 to vector<4x50xf32>
    %97 = vector.extract_strided_slice %95 {offsets = [0, 0, 0], sizes = [4, 1, 160], strides = [1, 1, 1]} : vector<4x16x160xbf16> to vector<4x1x160xbf16>
    %98 = vector.shape_cast %97 : vector<4x1x160xbf16> to vector<4x160xbf16>
    %c0_46 = arith.constant 0 : index
    %c0_47 = arith.constant 0 : index
    %c0_48 = arith.constant 0 : index
    %99 = vector.load %arg4[%c0_46, %c0_47, %c0_48] : memref<4x160x50xbf16, #tpu.memory_space<vmem>>, vector<1x160x50xbf16>
    %100 = vector.shape_cast %99 : vector<1x160x50xbf16> to vector<160x50xbf16>
    %cst_49 = arith.constant dense<0.000000e+00> : vector<4x50xf32>
    %101 = tpu.matmul %98, %100, %cst_49 {dimension_numbers = #tpu.dot_dimension_numbers<[1], [0], [0], [1], [0, 0, 1, 1], [], []>} : vector<4x160xbf16>, vector<160x50xbf16>, vector<4x50xf32> -> vector<4x50xf32>
    %102 = arith.addf %96, %101 : vector<4x50xf32>
    %103 = vector.extract_strided_slice %95 {offsets = [0, 4, 0], sizes = [4, 1, 160], strides = [1, 1, 1]} : vector<4x16x160xbf16> to vector<4x1x160xbf16>
    %104 = vector.shape_cast %103 : vector<4x1x160xbf16> to vector<4x160xbf16>
    %c1_50 = arith.constant 1 : index
    %c0_51 = arith.constant 0 : index
    %c0_52 = arith.constant 0 : index
    %105 = vector.load %arg4[%c1_50, %c0_51, %c0_52] : memref<4x160x50xbf16, #tpu.memory_space<vmem>>, vector<1x160x50xbf16>
    %106 = vector.shape_cast %105 : vector<1x160x50xbf16> to vector<160x50xbf16>
    %cst_53 = arith.constant dense<0.000000e+00> : vector<4x50xf32>
    %107 = tpu.matmul %104, %106, %cst_53 {dimension_numbers = #tpu.dot_dimension_numbers<[1], [0], [0], [1], [0, 0, 1, 1], [], []>} : vector<4x160xbf16>, vector<160x50xbf16>, vector<4x50xf32> -> vector<4x50xf32>
    %108 = arith.addf %102, %107 : vector<4x50xf32>
    %109 = vector.extract_strided_slice %95 {offsets = [0, 8, 0], sizes = [4, 1, 160], strides = [1, 1, 1]} : vector<4x16x160xbf16> to vector<4x1x160xbf16>
    %110 = vector.shape_cast %109 : vector<4x1x160xbf16> to vector<4x160xbf16>
    %c2_54 = arith.constant 2 : index
    %c0_55 = arith.constant 0 : index
    %c0_56 = arith.constant 0 : index
    %111 = vector.load %arg4[%c2_54, %c0_55, %c0_56] : memref<4x160x50xbf16, #tpu.memory_space<vmem>>, vector<1x160x50xbf16>
    %112 = vector.shape_cast %111 : vector<1x160x50xbf16> to vector<160x50xbf16>
    %cst_57 = arith.constant dense<0.000000e+00> : vector<4x50xf32>
    %113 = tpu.matmul %110, %112, %cst_57 {dimension_numbers = #tpu.dot_dimension_numbers<[1], [0], [0], [1], [0, 0, 1, 1], [], []>} : vector<4x160xbf16>, vector<160x50xbf16>, vector<4x50xf32> -> vector<4x50xf32>
    %114 = arith.addf %108, %113 : vector<4x50xf32>
    %115 = vector.extract_strided_slice %95 {offsets = [0, 12, 0], sizes = [4, 1, 160], strides = [1, 1, 1]} : vector<4x16x160xbf16> to vector<4x1x160xbf16>
    %116 = vector.shape_cast %115 : vector<4x1x160xbf16> to vector<4x160xbf16>
    %c3_58 = arith.constant 3 : index
    %c0_59 = arith.constant 0 : index
    %c0_60 = arith.constant 0 : index
    %117 = vector.load %arg4[%c3_58, %c0_59, %c0_60] : memref<4x160x50xbf16, #tpu.memory_space<vmem>>, vector<1x160x50xbf16>
    %118 = vector.shape_cast %117 : vector<1x160x50xbf16> to vector<160x50xbf16>
    %cst_61 = arith.constant dense<0.000000e+00> : vector<4x50xf32>
    %119 = tpu.matmul %116, %118, %cst_61 {dimension_numbers = #tpu.dot_dimension_numbers<[1], [0], [0], [1], [0, 0, 1, 1], [], []>} : vector<4x160xbf16>, vector<160x50xbf16>, vector<4x50xf32> -> vector<4x50xf32>
    %120 = arith.addf %114, %119 : vector<4x50xf32>
    %c0_62 = arith.constant 0 : index
    %c0_63 = arith.constant 0 : index
    %121 = vector.load %arg8[%c0_62, %c0_63] : memref<1x50xf32, #tpu.memory_space<vmem>>, vector<1x50xf32>
    %122 = vector.broadcast %121 : vector<1x50xf32> to vector<4x50xf32>
    %123 = arith.addf %120, %122 : vector<4x50xf32>
    %cst_64 = arith.constant 0.000000e+00 : f32
    %124 = vector.broadcast %cst_64 : f32 to vector<4x50xf32>
    %125 = arith.maximumf %123, %124 : vector<4x50xf32>
    %126 = arith.truncf %125 : vector<4x50xf32> to vector<4x50xbf16>
    %c0_65 = arith.constant 0 : index
    %c0_66 = arith.constant 0 : index
    %127 = vector.load %arg5[%c0_65, %c0_66] : memref<50x10xbf16, #tpu.memory_space<vmem>>, vector<50x10xbf16>
    %cst_67 = arith.constant dense<0.000000e+00> : vector<4x10xf32>
    %128 = tpu.matmul %126, %127, %cst_67 {dimension_numbers = #tpu.dot_dimension_numbers<[1], [0], [0], [1], [0, 0, 1, 1], [], []>} : vector<4x50xbf16>, vector<50x10xbf16>, vector<4x10xf32> -> vector<4x10xf32>
    %c0_68 = arith.constant 0 : index
    %c0_69 = arith.constant 0 : index
    %129 = vector.load %arg9[%c0_68, %c0_69] : memref<1x10xf32, #tpu.memory_space<vmem>>, vector<1x10xf32>
    %130 = vector.broadcast %129 : vector<1x10xf32> to vector<4x10xf32>
    %131 = arith.addf %128, %130 : vector<4x10xf32>
    %cst_70 = arith.constant dense<0xFF800000> : vector<4xf32>
    %132 = vector.multi_reduction <maximumf>, %131, %cst_70 [1] : vector<4x10xf32> to vector<4xf32>
    %133 = vector.shape_cast %132 : vector<4xf32> to vector<4x1xf32>
    %134 = vector.broadcast %133 : vector<4x1xf32> to vector<4x10xf32>
    %135 = arith.subf %131, %134 : vector<4x10xf32>
    %136 = math.exp %135 : vector<4x10xf32>
    %cst_71 = arith.constant dense<0.000000e+00> : vector<4xf32>
    %137 = vector.multi_reduction <add>, %136, %cst_71 [1] : vector<4x10xf32> to vector<4xf32>
    %138 = vector.shape_cast %137 : vector<4xf32> to vector<4x1xf32>
    %139 = math.log %138 : vector<4x1xf32>
    %140 = vector.broadcast %139 : vector<4x1xf32> to vector<4x10xf32>
    %141 = arith.subf %135, %140 : vector<4x10xf32>
    %c0_72 = arith.constant 0 : index
    %c0_73 = arith.constant 0 : index
    %c0_74 = arith.constant 0 : index
    %142 = vector.load %arg10[%c0_72, %c0_73, %c0_74] : memref<4x1x10xf32, #tpu.memory_space<vmem>>, vector<4x1x10xf32>
    %143 = vector.shape_cast %142 : vector<4x1x10xf32> to vector<4x10xf32>
    %144 = vector.shape_cast %141 : vector<4x10xf32> to vector<4x1x10xf32>
    tpu.vector_store %arg10[%c0_72, %c0_73, %c0_74], %144 {strides = array<i32>} : memref<4x1x10xf32, #tpu.memory_space<vmem>>, vector<4x1x10xf32>,
    return
  }
  func.func @transform_0(%arg0: i32) -> (i32, i32, i32) {
    %c0_i32 = arith.constant 0 : i32
    %c0_i32_0 = arith.constant 0 : i32
    %c0_i32_1 = arith.constant 0 : i32
    return %arg0, %c0_i32, %c0_i32_0 : i32, i32, i32
  }
  func.func @transform_1(%arg0: i32) -> (i32, i32, i32) {
    %c0_i32 = arith.constant 0 : i32
    %c0_i32_0 = arith.constant 0 : i32
    %c0_i32_1 = arith.constant 0 : i32
    %c0_i32_2 = arith.constant 0 : i32
    return %c0_i32, %c0_i32_0, %c0_i32_1 : i32, i32, i32
  }
  func.func @transform_2(%arg0: i32) -> (i32, i32, i32) {
    %c0_i32 = arith.constant 0 : i32
    %c0_i32_0 = arith.constant 0 : i32
    %c0_i32_1 = arith.constant 0 : i32
    %c0_i32_2 = arith.constant 0 : i32
    return %c0_i32, %c0_i32_0, %c0_i32_1 : i32, i32, i32
  }
  func.func @transform_3(%arg0: i32) -> (i32, i32, i32) {
    %c0_i32 = arith.constant 0 : i32
    %c0_i32_0 = arith.constant 0 : i32
    %c0_i32_1 = arith.constant 0 : i32
    %c0_i32_2 = arith.constant 0 : i32
    return %c0_i32, %c0_i32_0, %c0_i32_1 : i32, i32, i32
  }
  func.func @transform_4(%arg0: i32) -> (i32, i32) {
    %c0_i32 = arith.constant 0 : i32
    %c0_i32_0 = arith.constant 0 : i32
    %c0_i32_1 = arith.constant 0 : i32
    return %c0_i32, %c0_i32_0 : i32, i32
  }
  func.func @transform_5(%arg0: i32) -> (i32, i32) {
    %c0_i32 = arith.constant 0 : i32
    %c0_i32_0 = arith.constant 0 : i32
    %c0_i32_1 = arith.constant 0 : i32
    return %c0_i32, %c0_i32_0 : i32, i32
  }
  func.func @transform_6(%arg0: i32) -> (i32, i32) {
    %c0_i32 = arith.constant 0 : i32
    %c0_i32_0 = arith.constant 0 : i32
    %c0_i32_1 = arith.constant 0 : i32
    return %c0_i32, %c0_i32_0 : i32, i32
  }
  func.func @transform_7(%arg0: i32) -> (i32, i32) {
    %c0_i32 = arith.constant 0 : i32
    %c0_i32_0 = arith.constant 0 : i32
    %c0_i32_1 = arith.constant 0 : i32
    return %c0_i32, %c0_i32_0 : i32, i32
  }
  func.func @transform_8(%arg0: i32) -> (i32, i32) {
    %c0_i32 = arith.constant 0 : i32
    %c0_i32_0 = arith.constant 0 : i32
    %c0_i32_1 = arith.constant 0 : i32
    return %c0_i32, %c0_i32_0 : i32, i32
  }
  func.func @transform_9(%arg0: i32) -> (i32, i32, i32) {
    %c0_i32 = arith.constant 0 : i32
    %c0_i32_0 = arith.constant 0 : i32
    %c0_i32_1 = arith.constant 0 : i32
    return %arg0, %c0_i32, %c0_i32_0 : i32, i32, i32
  }
}

</mosaic_0001>

<bundles_post_ra>
// kernel: smallnet_forward.1
= control target key start
LH: loop header
LB: loop body
LE: loop exit
PB: predicated region body
PF: predicated region fallthrough
CT: control target
= control target key end

     0   :  { %14 = vsyncpa [#allocation3], 0  ;;  %s7917_s0 = inlined_call_operand.vmem [shape: f32[8,28,28], index: 0, kind: input, shape index: {}]   ;;  %s7918_s1 = inlined_call_operand.vmem [shape: bf16[5,28,240], index: 1, kind: input, shape index: {}]   ;;  %s7919_s2 = inlined_call_operand.vmem [shape: bf16[5,240,160], index: 2, kind: input, shape index: {}]   ;;  %s7920_s3 = inlined_call_operand.vmem [shape: bf16[4,160,50], index: 3, kind: input, shape index: {}]   ;;  %s7921_s4 = inlined_call_operand.vmem [shape: bf16[50,10], index: 4, kind: input, shape index: {}]   ;;  %s7922_s5 = inlined_call_operand.vmem [shape: f32[1,240], index: 5, kind: input, shape index: {}]   ;;  %s7923_s6 = inlined_call_operand.vmem [shape: f32[1,160], index: 6, kind: input, shape index: {}]   ;;  %s7924_s7 = inlined_call_operand.vmem [shape: f32[1,50], index: 7, kind: input, shape index: {}]   ;;  %s7925_s8 = inlined_call_operand.vmem [shape: f32[1,10], index: 8, kind: input, shape index: {}]   ;;  %s7926_s9 = inlined_call_operand.hbm [shape: f32[8,1,10], index: 9, kind: output, shape index: {}]  }
   0x1   :  { %16 = vsyncpa [#allocation3 + $0x1], 0  ;;  %s5572_s30 = smov 0   ;;  %s5574_s10 = smov 0  }
   0x2   :  { %s5576_s11 = smov 0   ;;  %s5578_s12 = smov 0  }
   0x3 LB: > { %s5593_s13 = sadd.s32 4294967295, %s5509_s12   ;;  %s4525_s14 = sadd.s32 4294967294, %s5509_s12   ;;  %s5509_s12 = sphi %s5578_s12, %s8017_s12   ;;  %s5505_s11 = sphi %s5576_s11, %s8016_s11   ;;  %s5501_s10 = sphi %s5574_s10, %s8015_s10   ;;  %s5497_s30 = sphi %s5572_s30, %s8014_s30  }
   0x4   : > { %s5597_s15 = sadd.s32 1, %s5509_s12   ;;  %s223_s16 = sadd.s32 1, %s5505_s11 }
   0x5   : > { %s220_s17 = ssub.s32 %s5509_s12, %s5597_s15  ;;  %p233_p0 = scmp.ne.s32.totalorder %s5505_s11, %s5501_s10 }
   0x6   : > { %p221_p1 = scmp.eq.s32.totalorder %s220_s17, 0  ;;  %p234_p2 = scmp.eq.s32.totalorder %s5593_s13, 1 }
   0x7   : > { %p239_p3 = scmp.ne.s32.totalorder %s5501_s10, %s5497_s30  ;;  %p240_p4 = scmp.eq.s32.totalorder %s4525_s14, 1 }
   0x8   : > { %s5608_s18 = scalar_select %p221_p1, %s5505_s11, %s223_s16  }
   0x9   : > { %p5610_p5 = por %p234_p2, %p233_p0  ;;  %p5614_p6 = por %p240_p4, %p239_p3 }
   0xa   : > { %p4528_p7 = scmp.ge.s32.totalorder %s5509_s12, 1  ;;  %p292_p8 = scmp.lt.s32.totalorder %s5509_s12, 3 }
   0xc   : > { %p293_p9 = pnand %p4528_p7, %p292_p8 }
   0xe   : > { %296 = sbr.rel (%p293_p9) target bundleno = 1758 (0x6de), region = 56 }
  0x13   : > { %v5146_v0 = vld [vmem:[%s7918_s1 + $0x34] ss:$8 sps:$4 sm:$0x3f]   ;;  %vm605_vm0 = vcmask 1045504   ;;  %v5152_v5 = vld [vmem:[%s7918_s1 + $0x24] ss:$8 sps:$4 sm:$0xff]  }
  0x14   : > { %v5148_v1 = vld [vmem:[%s7918_s1 + $0x30] ss:$8 sps:$4 sm:$0x3f]   ;;  %4563 = vmatprep.subr.msk.bf16.mxu0 %vm605_vm0, %v5146_v0  ;;  %v5149_v2 = vld [vmem:[%s7918_s1 + $0x14] ss:$8 sps:$4 sm:$0x3f]  }
  0x15   : > { %v607_v3 = vsel %vm605_vm0, %v5148_v1, 0  ;;  %v5151_v4 = vld [vmem:[%s7918_s1 + $0x10] ss:$8 sps:$4 sm:$0x3f]   ;;  %4576 = vmatprep.subr.msk.bf16.mxu1 %vm605_vm0, %v5149_v2  ;;  %v5154_v6 = vld [vmem:[%s7918_s1 + $0x20] ss:$8 sps:$4 sm:$0xff]  }
  0x16   : > { %625 = vmatpush1.bf16.msra.mxu0 %v607_v3  ;;  %s4530_s21 = sshll.u32 %s5593_s13, 2  ;;  %v748_v7 = vsel %vm605_vm0, %v5151_v4, 0  ;;  %v5155_v8 = vld [vmem:[%s7918_s1 + $0x4] ss:$8 sps:$4 sm:$0xff]   ;;  %v5157_v9 = vld [vmem:[%s7918_s1] ss:$8 sps:$4 sm:$0xff]  }
  0x17   : > { %626 = vmatprep.subr.bf16.mxu0 %v5152_v5  ;;  %v7931_v10 = vmov 0   ;;  %766 = vmatpush1.bf16.msra.mxu1 %v748_v7  ;;  %v5158_v11 = vld [vmem:[%s7918_s1 + $0x54] ss:$8 sps:$4 sm:$0x3f]   ;;  %p330_p10 = scmp.lt.s32.totalorder %s4530_s21, 7  ;;  %vm586_vm1 = vcmask 228352  }
  0x18   : > { %644 = vmatprep.mubr.bf16.mxu0 %v7931_v10  ;;  %785 = vmatprep.mubr.bf16.mxu1 %v7931_v10  ;;  %v5164_v12 = vld [vmem:[%s7918_s1 + $0x74] ss:$8 sps:$4 sm:$0x3f]   ;;  %vm406_vm2 = vsmask.f32 3328  ;;  %vm846_vm7 = vcmask 1042432  }
  0x19   : > { %767 = vmatprep.subr.bf16.mxu1 %v5155_v8  ;;  %s8019_s21 = smov (!%p330_p10, %s4530_s21), 7  ;;  %vm407_vm3 = vsmask.f32 7440  ;;  %v5160_v43 = vld [vmem:[%s7918_s1 + $0x50] ss:$8 sps:$4 sm:$0x3f]  }
  0x1a   : > { %627 = vmatpush1.bf16.msra.mxu0 %v5154_v6  ;;  %s5060_s28 = sshll.u32 %s8019_s21, 5  ;;  %vm5709_vm4 = vmor %vm406_vm2, %vm407_vm3  ;;  %v949_v59 = vsel %vm605_vm0, %v5160_v43, 0  ;;  %v5163_v62 = vld [vmem:[%s7918_s1 + $0x44] ss:$8 sps:$4 sm:$0xff]   ;;  %v5161_v4 = vld [vmem:[%s7918_s1 + $0x40] ss:$8 sps:$4 sm:$0xff]  }
  0x1b   : > { %4601 = vmatprep.subr.msk.bf16.mxu0 %vm605_vm0, %v5158_v11  ;;  %768 = vmatpush1.bf16.msra.mxu1 %v5157_v9  ;;  %s5658_s16 = scalar_lea.vmem %s7917_s0, %s5060_s28  ;;  %v5170_v11 = vld [vmem:[%s7918_s1 + $0x94] ss:$8 sps:$4 sm:$0x3f]   ;;  %vm1071_vm5 = vsmask.f32 2304  ;;  %vm847_vm8 = vcmask 1046532  }
  0x1c   : > { %v338_v13 = vld [vmem:[%s5658_s16] sm:$0xff]  ;;  %v339_v14 = vld [vmem:[%s5658_s16 + $0x8] sm:$0xff]  ;;  %v340_v15 = vld [vmem:[%s5658_s16 + $0x10] sm:$0xff]  ;;  %4622 = vmatprep.subr.msk.bf16.mxu1 %vm605_vm0, %v5164_v12  ;;  %vm1072_vm6 = vsmask.f32 6416  ;;  %vm1336_vm11 = vcmask 1041408  }
  0x1d   : > { %v5666_v16 = vpack.c.bf16 %v338_v13, %v338_v13  ;;  %v5668_v17 = vpack.c.bf16 %v339_v14, %v339_v14  ;;  %v5670_v18 = vpack.c.bf16 %v340_v15, %v340_v15  ;;  %v354_v19 = vpack.c.bf16 %v339_v14, %v338_v13  ;;  %v341_v20 = vld [vmem:[%s5658_s16 + $0x18] sm:$0xf]  ;;  %v5674_v21 = vld [vmem:[%s5658_s16 + $0x20] sm:$0xff]  ;;  %v343_v28 = vld [vmem:[%s5658_s16 + $0x28] sm:$0xff]  ;;  %s5512_s24 = smov 118   ;;  %s5513_s25 = smov 102  }
  0x1e   : > { %v5677_v22 = vpack.c.bf16 %v341_v20, %v341_v20  ;;  %v5681_v23 = vpack.c.bf16 %v5674_v21, %v5674_v21  ;;  %v5701_v36 = vpack.c.bf16 %v343_v28, %v343_v28  ;;  %v5077_v41 = vpack.c.bf16 %v5674_v21, %v340_v15  ;;  %v344_v52 = vld [vmem:[%s5658_s16 + $0x30] sm:$0xff]  ;;  %v345_v53 = vld [vmem:[%s5658_s16 + $0x38] sm:$0xf]  ;;  %v5734_v57 = vld [vmem:[%s5658_s16 + $0x40] sm:$0xff]  ;;  %s5514_s26 = smov 12   ;;  %s5515_s27 = smov 108  }
  0x1f   : > { %v410_v24 = vshrl.u32 %v5666_v16, 16  ;;  %v413_v25 = vshll.u32 %v5666_v16, 16  ;;  %v419_v26 = vshll.u32 %v5668_v17, 16  ;;  %v423_v27 = vshrl.u32 %v5668_v17, 16  ;;  %4577 = vmatmul.mubr.msk.bf16.vlgmr.msra.gmra.mxu1 %vm586_vm1, %v354_v19  ;;  %v5744_v63 = vld [vmem:[%s5658_s16 + $0x48] sm:$0xff]  ;;  %v5755_v5 = vld [vmem:[%s5658_s16 + $0x50] sm:$0xff]  ;;  %vm5916_vm9 = vmor %vm1071_vm5, %vm1072_vm6 }
  0x20   : > { %v429_v29 = vshll.u32 %v5670_v18, 16  ;;  %795 = vmatprep.mubr.bf16.mxu1 %v7931_v10  ;;  %v433_v30 = vshrl.u32 %v5670_v18, 16  ;;  %v444_v31 = vshrl.u32 %v5681_v23, 16  ;;  %v439_v37 = vshll.u32 %v5677_v22, 16  ;;  %v5791_v43 = vld [vmem:[%s5658_s16 + $0x60] sm:$0xff]  ;;  %vm5941_vm10 = vmor %vm846_vm7, %vm847_vm8  ;;  %s326_s29 = sand.u32 1, %s5501_s10  }
  0x21   : > { %v412_v32 = vrot.slane %v410_v24, 4  ;;  %v415_v33 = vrot.slane %v413_v25, 5  ;;  %v421_v34 = vrot.slane %v419_v26, 5  ;;  %v425_v35 = vrot.slane %v423_v27, 4  ;;  %s4529_s14 = sshll.u32 %s326_s29, 2  ;;  %s5079_s17 = sshll.u32 %s5593_s13, 6 }
  0x22   : > { %v431_v40 = vrot.slane %v429_v29, 5  ;;  %v435_v44 = vrot.slane %v433_v30, 4  ;;  %v446_v45 = vrot.slane %v444_v31, 4  ;;  %v447_v48 = vshll.u32 %v5681_v23, 16  ;;  %s7873_s23 = scalar_lea.hbm %s7926_s9, %s5079_s17  ;;  %s7877_s13 = scalar_lea.sflag [#allocation3], %s326_s29 }
  0x23   : > { %v416_v38 = vor.u32 %v415_v33, %v412_v32  ;;  %v426_v39 = vor.u32 %v425_v35, %v421_v34  ;;  %v441_v50 = vrot.slane %v439_v37, 5  ;;  %v453_v51 = vshll.u32 %v5701_v36, 16  ;;  %s5519_s28 = smov [#allocation2]  }
  0x24   : > { %v436_v49 = vor.u32 %v435_v44, %v431_v40  ;;  %v449_v56 = vrot.slane %v447_v48, 5  ;;  %v5746_v1 = vpack.c.bf16 %v344_v52, %v344_v52  ;;  %v5748_v2 = vpack.c.bf16 %v345_v53, %v345_v53 }
  0x25   : > { %v417_v46 = vrot.slane %v416_v38, 4  ;;  %v427_v47 = vrot.slane %v426_v39, 4  ;;  %v455_v61 = vrot.slane %v453_v51, 5  ;;  %v457_v3 = vshrl.u32 %v5701_v36, 16 }
  0x26   : > { %v437_v60 = vrot.slane %v436_v49, 4  ;;  %v450_v0 = vor.u32 %v449_v56, %v446_v45  ;;  %v356_v7 = vpack.c.bf16 %v343_v28, %v5674_v21  ;;  %v357_v8 = vpack.c.bf16 %v345_v53, %v344_v52  ;;  %v349_v53 = vld [vmem:[%s5658_s16 + $0x58] sm:$0xf] }
  0x27   : > { %v422_v54 = vsel %vm5709_vm4, %v417_v46, %v421_v34  ;;  %v432_v55 = vsel %vm5709_vm4, %v427_v47, %v431_v40  ;;  %4578 = vmatmul.mubr.msk.bf16.gmra.mxu1 %vm586_vm1, %v5077_v41  ;;  %v5763_v9 = vpack.c.bf16 %v5734_v57, %v5734_v57  ;;  %v459_v13 = vrot.slane %v457_v3, 4 }
  0x28   : > { %v4553_v58 = vcombine.low %v422_v54, %v432_v55  ;;  %805 = vmatprep.mubr.bf16.mxu1 %v7931_v10  ;;  %v442_v6 = vsel %vm5709_vm4, %v437_v60, %v441_v50  ;;  %v451_v12 = vrot.slane %v450_v0, 4  ;;  %v463_v14 = vshll.u32 %v5746_v1, 16  ;;  %v5804_v54 = vld [vmem:[%s5658_s16 + $0x68] sm:$0xff] }
  0x29   : > { %v467_v15 = vshrl.u32 %v5746_v1, 16  ;;  %v473_v19 = vshll.u32 %v5748_v2, 16  ;;  %v374_v20 = vunpack.c.h.b16 %v356_v7  ;;  %v375_v21 = vunpack.c.l.b16 %v357_v8 }
  0x2a   : > { %4564 = vmatmul.mubr.msk.bf16.vlgmr.msra.gmra.mxu0 %vm586_vm1, %v4553_v58  ;;  %v5776_v28 = vpack.c.bf16 %v5744_v63, %v5744_v63  ;;  %v456_v32 = vsel %vm5709_vm4, %v451_v12, %v455_v61  ;;  %v460_v33 = vor.u32 %v459_v13, %v455_v61  ;;  %v465_v34 = vrot.slane %v463_v14, 5 }
  0x2b   : > { %967 = vmatpush1.bf16.msra.mxu0 %v949_v59  ;;  %654 = vmatprep.mubr.bf16.mxu0 %v7931_v10  ;;  %v469_v35 = vrot.slane %v467_v15, 4  ;;  %v4554_v38 = vcombine.low %v442_v6, %v456_v32  ;;  %v475_v39 = vrot.slane %v473_v19, 5  ;;  %v707_v40 = vpack.c.b16 %v375_v21, %v374_v20  ;;  %v352_v6 = vld [vmem:[%s5658_s16 + $0x70] sm:$0xff] }
  0x2c   : > { %968 = vmatprep.subr.bf16.mxu0 %v5163_v62  ;;  %v5788_v41 = vpack.c.bf16 %v5755_v5, %v5755_v5  ;;  %v461_v44 = vrot.slane %v460_v33, 4  ;;  %v478_v46 = vshrl.u32 %v5763_v9, 16  ;;  %v481_v47 = vshll.u32 %v5763_v9, 16  ;;  %v353_v33 = vld [vmem:[%s5658_s16 + $0x78] sm:$0xf]  ;;  %s328_s16 = scalar_lea.vmem [#allocation2], %s4529_s14 }
  0x2d   : > { %v470_v45 = vor.u32 %v469_v35, %v465_v34  ;;  %v5797_v49 = vrot.slane %v410_v24, 5  ;;  %v487_v50 = vshll.u32 %v5776_v28, 16  ;;  %v491_v52 = vshrl.u32 %v5776_v28, 16  ;;  %s4463_s22 = sshll.u32 %s328_s16, 4  ;;  %s7875_s22 = int_to_ptr.vmem [resolvable:$true] %s4463_s22 }
  0x2e   : > { %v480_v56 = vrot.slane %v478_v46, 4  ;;  %v483_v24 = vrot.slane %v481_v47, 5  ;;  %v497_v60 = vshll.u32 %v5788_v41, 16  ;;  %v466_v61 = vsel %vm5709_vm4, %v461_v44, %v465_v34 }
  0x2f   : > { %969 = vmatpush1.bf16.msra.mxu0 %v5161_v4  ;;  %4579 = vmatmul.mubr.msk.bf16.gmra.mxu1 %vm586_vm1, %v707_v40  ;;  %v471_v55 = vrot.slane %v470_v45, 4  ;;  %v489_v58 = vrot.slane %v487_v50, 5  ;;  %v493_v59 = vrot.slane %v491_v52, 4  ;;  %v5825_v4 = vpack.c.bf16 %v5791_v43, %v5791_v43  ;;  %v5166_v40 = vld [vmem:[%s7918_s1 + $0x70] ss:$8 sps:$4 sm:$0x3f]  }
  0x30   : > { %4647 = vmatprep.subr.msk.bf16.mxu0 %vm605_vm0, %v5170_v11  ;;  %815 = vmatprep.mubr.bf16.mxu1 %v7931_v10  ;;  %v484_v0 = vor.u32 %v483_v24, %v480_v56  ;;  %v5830_v7 = vrot.slane %v413_v25, 6  ;;  %v358_v11 = vpack.c.bf16 %v5744_v63, %v5734_v57  ;;  %v501_v12 = vshrl.u32 %v5788_v41, 16 }
  0x31   : > { %v476_v62 = vsel %vm5709_vm4, %v471_v55, %v475_v39  ;;  %v494_v8 = vor.u32 %v493_v59, %v489_v58  ;;  %v5835_v13 = vpack.c.bf16 %v349_v53, %v349_v53  ;;  %v5839_v20 = vpack.c.bf16 %v5804_v54, %v5804_v54 }
  0x32   : > { %4565 = vmatmul.mubr.msk.bf16.gmra.mxu0 %vm586_vm1, %v4554_v38  ;;  %v512_v21 = vshrl.u32 %v5825_v4, 16  ;;  %v7930_v32 = vshll.u32 %v5825_v4, 16  ;;  %v4555_v34 = vcombine.low %v466_v61, %v476_v62  ;;  %v485_v25 = vrot.slane %v484_v0, 4  ;;  %v5169_v0 = vld [vmem:[%s7918_s1 + $0x64] ss:$8 sps:$4 sm:$0xff]  }
  0x33   : > { %664 = vmatprep.mubr.bf16.mxu0 %v7931_v10  ;;  %v499_v35 = vrot.slane %v497_v60, 5  ;;  %v503_v57 = vrot.slane %v501_v12, 4  ;;  %v495_v63 = vrot.slane %v494_v8, 4  ;;  %v1076_v44 = vor.u32 %v5830_v7, %v5797_v49 }
  0x34   : > { %v514_v38 = vrot.slane %v512_v21, 4  ;;  %v517_v39 = vrot.slane %v7930_v32, 5  ;;  %v1078_v45 = vrot.slane %v423_v27, 5  ;;  %v1079_v53 = vrot.slane %v419_v26, 6 }
  0x35   : > { %v5862_v55 = vpack.c.bf16 %v352_v6, %v352_v6  ;;  %v504_v56 = vor.u32 %v503_v57, %v499_v35  ;;  %v507_v24 = vshll.u32 %v5835_v13, 16  ;;  %v521_v59 = vshll.u32 %v5839_v20, 16 }
  0x36   : > { %v7928_v61 = vshrl.u32 %v5839_v20, 16  ;;  %v518_v49 = vor.u32 %v517_v39, %v514_v38  ;;  %v5869_v27 = vpack.c.bf16 %v353_v33, %v353_v33  ;;  %v490_v7 = vsel %vm5709_vm4, %v485_v25, %v489_v58  ;;  %v5167_v25 = vld [vmem:[%s7918_s1 + $0x60] ss:$8 sps:$4 sm:$0xff]  }
  0x37   : > { %4580 = vmatmul.mubr.msk.bf16.gmra.mxu1 %vm586_vm1, %v358_v11  ;;  %v7927_v26 = vshll.u32 %v5862_v55, 16  ;;  %v7929_v62 = vshrl.u32 %v5862_v55, 16  ;;  %v500_v8 = vsel %vm5709_vm4, %v495_v63, %v499_v35  ;;  %v5078_v11 = vpack.c.bf16 %v5791_v43, %v5755_v5 }
  0x38   : > { %825 = vmatprep.mubr.bf16.mxu1 %v7931_v10  ;;  %v360_v39 = vpack.c.bf16 %v5804_v54, %v5791_v43  ;;  %v361_v58 = vpack.c.bf16 %v353_v33, %v352_v6  ;;  %v5896_v35 = vor.u32 %v1079_v53, %v1078_v45  ;;  %v509_v5 = vrot.slane %v507_v24, 5  ;;  %v5172_v54 = vld [vmem:[%s7918_s1 + $0x90] ss:$8 sps:$4 sm:$0x3f]  }
  0x39   : > { %v5887_v57 = vrot.slane %v7927_v26, 5  ;;  %v537_v38 = vrot.slane %v7929_v62, 4  ;;  %v523_v63 = vrot.slane %v521_v59, 5  ;;  %v1214_v26 = vsel %vm605_vm0, %v5166_v40, 0 }
  0x3a   : > { %4566 = vmatmul.mubr.msk.bf16.gmra.mxu0 %vm586_vm1, %v4555_v34  ;;  %v527_v34 = vrot.slane %v7928_v61, 4  ;;  %v4556_v61 = vcombine.low %v490_v7, %v500_v8  ;;  %v505_v62 = vrot.slane %v504_v56, 4  ;;  %v519_v32 = vrot.slane %v518_v49, 4  ;;  %1232 = vmatpush1.bf16.msra.mxu1 %v1214_v26 }
  0x3b   : > { %674 = vmatprep.mubr.bf16.mxu0 %v7931_v10  ;;  %v541_v43 = vshll.u32 %v5869_v27, 16  ;;  %v1084_v6 = vrot.slane %v429_v29, 6  ;;  %v1083_v33 = vrot.slane %v433_v30, 5  ;;  %1233 = vmatprep.subr.bf16.mxu1 %v5169_v0  ;;  %v538_v40 = vor.u32 %v537_v38, %v5887_v57 }
  0x3c   : > { %v528_v45 = vor.u32 %v527_v34, %v523_v63  ;;  %v380_v53 = vunpack.c.h.b16 %v360_v39  ;;  %v381_v56 = vunpack.c.l.b16 %v361_v58  ;;  %v1077_v49 = vrot.slane %v1076_v44, 4 }
  0x3d   : > { %v851_v26 = vrot.slane %v5668_v17, 5  ;;  %v1082_v30 = vrot.slane %v5896_v35, 4  ;;  %v510_v0 = vsel %vm5709_vm4, %v505_v62, %v509_v5  ;;  %v524_v44 = vsel %vm5709_vm4, %v519_v32, %v523_v63 }
  0x3e   : > { %v543_v7 = vrot.slane %v541_v43, 5  ;;  %1234 = vmatpush1.bf16.msra.mxu1 %v5167_v25  ;;  %v1085_v8 = vor.u32 %v1084_v6, %v1083_v33  ;;  %v4583_v34 = vrot.slane %v5666_v16, 9  ;;  %v854_v38 = vrot.slane %v5670_v18, 5 }
  0x3f   : > { %4581 = vmatmul.mubr.msk.bf16.gmra.mxu1 %vm586_vm1, %v5078_v11  ;;  %v529_v11 = vrot.slane %v528_v45, 4  ;;  %v539_v39 = vrot.slane %v538_v40, 4  ;;  %v5932_v58 = vsel %vm605_vm0, %v5172_v54, 0  ;;  %v1088_v62 = vshrl.u32 %v5677_v22, 16 }
  0x40   : > { %835 = vmatprep.mubr.bf16.mxu1 %v7931_v10  ;;  %v4557_v32 = vcombine.low %v510_v0, %v524_v44  ;;  %v853_v5 = vrot.slane %v851_v26, 4  ;;  %v1094_v25 = vrot.slane %v444_v31, 5  ;;  %v1095_v63 = vrot.slane %v447_v48, 6 }
  0x41   : > { %v1081_v54 = vsel %vm5916_vm9, %v1077_v49, %v5896_v35  ;;  %v856_v33 = vrot.slane %v854_v38, 4  ;;  %v857_v45 = vrot.slane %v5677_v22, 5  ;;  %v4584_v40 = vrot.slane %v5681_v23, 9 }
  0x42   : > { %4567 = vmatmul.mubr.msk.bf16.gmra.mxu0 %vm586_vm1, %v4556_v61  ;;  %v710_v61 = vpack.c.b16 %v381_v56, %v380_v53  ;;  %v1086_v31 = vsel %vm5916_vm9, %v1082_v30, %v1085_v8  ;;  %v861_v48 = vrot.slane %v5701_v36, 5  ;;  %v1090_v53 = vrot.slane %v1088_v62, 5 }
  0x43   : > { %684 = vmatprep.mubr.bf16.mxu0 %v7931_v10  ;;  %v1091_v56 = vrot.slane %v439_v37, 6  ;;  %v1096_v0 = vor.u32 %v1095_v63, %v1094_v25  ;;  %v1098_v35 = vrot.slane %v457_v3, 5  ;;  %v1099_v49 = vrot.slane %v453_v51, 6 }
  0x44   : > { %v864_v44 = vrot.slane %v5746_v1, 5  ;;  %v5963_v30 = vsel %vm5941_vm10, %v4583_v34, %v851_v26  ;;  %v1103_v37 = vrot.slane %v467_v15, 5  ;;  %v1108_v62 = vshrl.u32 %v5748_v2, 16 }
  0x45   : > { %v534_v51 = vsel %vm5709_vm4, %v529_v11, %v5887_v57  ;;  %v544_v3 = vsel %vm5709_vm4, %v539_v39, %v543_v7  ;;  %v5979_v26 = vsel %vm5941_vm10, %v853_v5, %v854_v38  ;;  %v5983_v15 = vsel %vm5941_vm10, %v856_v33, %v857_v45 }
  0x46   : > { %v5988_v34 = vsel %vm5941_vm10, %v4584_v40, %v861_v48  ;;  %v863_v57 = vrot.slane %v861_v48, 4  ;;  %v1092_v11 = vor.u32 %v1091_v56, %v1090_v53  ;;  %v1097_v42 = vrot.slane %v1096_v0, 4 }
  0x47   : > { %4582 = vmatmul.mubr.msk.bf16.gmra.mxu1 %vm586_vm1, %v710_v61  ;;  %v1104_v61 = vrot.slane %v463_v14, 6  ;;  %v4612_v14 = vcombine.low %v1081_v54, %v1086_v31  ;;  %v1100_v7 = vor.u32 %v1099_v49, %v1098_v35  ;;  %v867_v39 = vrot.slane %v5748_v2, 5 }
  0x48   : > { %1251 = vmatprep.mubr.bf16.mxu1 %v7931_v10  ;;  %v866_v38 = vrot.slane %v864_v44, 4  ;;  %v1110_v25 = vrot.slane %v1108_v62, 5  ;;  %v1111_v63 = vrot.slane %v473_v19, 6  ;;  %v4558_v33 = vcombine.low %v534_v51, %v544_v3 }
  0x49   : > { %v1105_v5 = vor.u32 %v1104_v61, %v1103_v37  ;;  %v4591_v54 = vcombine.low %v5963_v30, %v5979_v26  ;;  %v1114_v45 = vrot.slane %v478_v46, 5  ;;  %v4592_v40 = vcombine.low %v5983_v15, %v5988_v34 }
  0x4a   : > { %4568 = vmatmul.mubr.msk.bf16.gmra.mxu0 %vm586_vm1, %v4557_v32  ;;  %v1087_v32 = vrot.slane %v1085_v8, 4  ;;  %v1115_v8 = vrot.slane %v481_v47, 6  ;;  %v6003_v31 = vsel %vm5941_vm10, %v863_v57, %v864_v44  ;;  %v1102_v48 = vrot.slane %v1100_v7, 4 }
  0x4b   : > { %694 = vmatprep.mubr.bf16.mxu0 %v7931_v10  ;;  %v871_v19 = vrot.slane %v5776_v28, 5  ;;  %v1101_v46 = vsel %vm5916_vm9, %v1097_v42, %v1100_v7  ;;  %v1118_v47 = vrot.slane %v491_v52, 5  ;;  %v1119_v56 = vrot.slane %v487_v50, 6 }
  0x4c   : > { %v1093_v53 = vsel %vm5916_vm9, %v1087_v32, %v1092_v11  ;;  %v6018_v0 = vsel %vm5941_vm10, %v866_v38, %v867_v39  ;;  %v1107_v35 = vrot.slane %v1105_v5, 4  ;;  %v1112_v49 = vor.u32 %v1111_v63, %v1110_v25 }
  0x4d   : > { %v1116_v44 = vor.u32 %v1115_v8, %v1114_v45  ;;  %v4585_v30 = vrot.slane %v5763_v9, 9  ;;  %v874_v37 = vrot.slane %v5788_v41, 5  ;;  %v1123_v52 = vrot.slane %v501_v12, 5 }
  0x4e   : > { %v1124_v50 = vrot.slane %v497_v60, 6  ;;  %v4613_v61 = vcombine.low %v1093_v53, %v1101_v46  ;;  %v1106_v62 = vsel %vm5916_vm9, %v1102_v48, %v1105_v5  ;;  %v6032_v51 = vrot.slane %v871_v19, 4 }
  0x4f   : > { %4623 = vmatmul.mubr.msk.bf16.vlgmr.msra.gmra.mxu1 %vm586_vm1, %v4612_v14  ;;  %v1134_v3 = vrot.slane %v512_v21, 5  ;;  %v1120_v26 = vor.u32 %v1119_v56, %v1118_v47  ;;  %v6038_v12 = vrot.slane %v874_v37, 4  ;;  %v877_v60 = vrot.slane %v5835_v13, 5  ;;  %v5175_v21 = vld [vmem:[%s7918_s1 + $0x84] ss:$8 sps:$4 sm:$0xff]  }
  0x50   : > { %1261 = vmatprep.mubr.bf16.mxu1 %v7931_v10  ;;  %v4586_v14 = vrot.slane %v5825_v4, 9  ;;  %v1113_v32 = vsel %vm5916_vm9, %v1107_v35, %v1112_v49  ;;  %v1117_v57 = vrot.slane %v1116_v44, 4  ;;  %v1128_v11 = vshrl.u32 %v5835_v13, 16 }
  0x51   : > { %v7946_v42 = vshll.u32 %v5825_v4, 16  ;;  %v6050_v39 = vor.u32 %v1124_v50, %v1123_v52  ;;  %v881_v38 = vrot.slane %v5839_v20, 5  ;;  %v7947_v5 = vshrl.u32 %v5839_v20, 16 }
  0x52   : > { %4569 = vmatmul.mubr.msk.bf16.gmra.mxu0 %vm586_vm1, %v4558_v33  ;;  %v1139_v63 = vrot.slane %v521_v59, 6  ;;  %v884_v45 = vrot.slane %v5862_v55, 5  ;;  %v7948_v8 = vshrl.u32 %v5862_v55, 16  ;;  %v7949_v53 = vshll.u32 %v5862_v55, 16  ;;  %v5173_v59 = vld [vmem:[%s7918_s1 + $0x80] ss:$8 sps:$4 sm:$0xff]  }
  0x53   : > { %986 = vmatprep.mubr.bf16.mxu0 %v7931_v10  ;;  %v1135_v7 = vrot.slane %v7946_v42, 6  ;;  %v1138_v25 = vrot.slane %v7947_v5, 5  ;;  %v4614_v47 = vcombine.low %v1106_v62, %v1113_v32  ;;  %v1122_v56 = vrot.slane %v1120_v26, 4 }
  0x54   : > { %v1143_v48 = vrot.slane %v7948_v8, 5  ;;  %v1144_v46 = vrot.slane %v7949_v53, 6  ;;  %v1127_v35 = vrot.slane %v6050_v39, 4  ;;  %v6066_v49 = vrot.slane %v507_v24, 6 }
  0x55   : > { %v1136_v33 = vor.u32 %v1135_v7, %v1134_v3  ;;  %v1121_v44 = vsel %vm5916_vm9, %v1117_v57, %v1120_v26  ;;  %v6074_v52 = vrot.slane %v1128_v11, 5  ;;  %v6078_v50 = vrot.slane %v881_v38, 4 }
  0x56   : > { %v6083_v24 = vor.u32 %v1139_v63, %v1138_v25  ;;  %v887_v62 = vrot.slane %v5869_v27, 5  ;;  %vm1337_vm12 = vcmask 1045508   ;;  %v4629_v3 = vrot.slane %v5666_v16, 10 }
  0x57   : > { %4624 = vmatmul.mubr.msk.bf16.gmra.mxu1 %vm586_vm1, %v4613_v61  ;;  %v6080_v61 = vor.u32 %v1144_v46, %v1143_v48  ;;  %v6089_v26 = vrot.slane %v1136_v33, 4  ;;  %v6093_v32 = vrot.slane %v884_v45, 4  ;;  %v1148_v57 = vshrl.u32 %v5869_v27, 16  ;;  %vm6101_vm13 = vmor %vm1336_vm11, %vm1337_vm12 }
  0x58   : > { %1271 = vmatprep.mubr.bf16.mxu1 %v7931_v10  ;;  %v1126_v16 = vsel %vm5916_vm9, %v1122_v56, %v6050_v39  ;;  %v1341_v42 = vrot.slane %v5668_v17, 6  ;;  %v1344_v7 = vrot.slane %v5670_v18, 6  ;;  %v4630_v25 = vrot.slane %v5681_v23, 10 }
  0x59   : > { %v1147_v5 = vrot.slane %v6080_v61, 4  ;;  %v1351_v63 = vrot.slane %v5701_v36, 6  ;;  %v1354_v48 = vrot.slane %v5746_v1, 6  ;;  %v4615_v17 = vcombine.low %v1121_v44, %v1126_v16 }
  0x5a   : > { %4602 = vmatmul.mubr.msk.bf16.vlgmr.msra.gmra.mxu0 %vm586_vm1, %v4591_v54  ;;  %v6098_v54 = vrot.slane %v541_v43, 6  ;;  %v1347_v43 = vrot.slane %v5677_v22, 6  ;;  %v1343_v33 = vrot.slane %v1341_v42, 4  ;;  %v1346_v8 = vrot.slane %v1344_v7, 4 }
  0x5b   : > { %1457 = vmatpush1.bf16.msra.mxu0 %v5932_v58  ;;  %996 = vmatprep.mubr.bf16.mxu0 %v7931_v10  ;;  %v1142_v58 = vrot.slane %v6083_v24, 4  ;;  %v6122_v18 = vsel %vm6101_vm13, %v4630_v25, %v1351_v63  ;;  %v1353_v53 = vrot.slane %v1351_v63, 4  ;;  %v1357_v22 = vrot.slane %v5748_v2, 6 }
  0x5c   : > { %1458 = vmatprep.subr.bf16.mxu0 %v5175_v21  ;;  %v6117_v21 = vsel %vm6101_vm13, %v4629_v3, %v1341_v42  ;;  %v1150_v23 = vrot.slane %v1148_v57, 5  ;;  %v6128_v36 = vsel %vm6101_vm13, %v1343_v33, %v1344_v7  ;;  %v6132_v46 = vsel %vm6101_vm13, %v1346_v8, %v1347_v43 }
  0x5d   : > { %v1356_v1 = vrot.slane %v1354_v48, 4  ;;  %v4637_v56 = vcombine.low %v6117_v21, %v6128_v36  ;;  %v4638_v2 = vcombine.low %v6132_v46, %v6122_v18  ;;  %v1361_v3 = vrot.slane %v5776_v28, 6 }
  0x5e   : > { %v1364_v57 = vrot.slane %v5788_v41, 6  ;;  %v1367_v16 = vrot.slane %v5835_v13, 6  ;;  %v4632_v7 = vrot.slane %v5825_v4, 10  ;;  %v1371_v43 = vrot.slane %v5839_v20, 6 }
  0x5f   : > { %1459 = vmatpush1.bf16.msra.mxu0 %v5173_v59  ;;  %4625 = vmatmul.mubr.msk.bf16.gmra.mxu1 %vm586_vm1, %v4614_v47  ;;  %v1355_v47 = vsel %vm6101_vm13, %v1353_v53, %v1354_v48  ;;  %v4631_v59 = vrot.slane %v5763_v9, 10  ;;  %v1358_v44 = vsel %vm6101_vm13, %v1356_v1, %v1357_v22  ;;  %v1374_v15 = vrot.slane %v5862_v55, 6 }
  0x60   : > { %1281 = vmatprep.mubr.bf16.mxu1 %v7931_v10  ;;  %v4639_v42 = vcombine.low %v1355_v47, %v1358_v44  ;;  %v1366_v25 = vrot.slane %v1364_v57, 4  ;;  %v1377_v63 = vrot.slane %v5869_v27, 6  ;;  %v1132_v21 = vor.u32 %v6066_v49, %v6074_v52 }
  0x61   : > { %v1362_v34 = vsel %vm6101_vm13, %v4631_v59, %v1361_v3  ;;  %v1372_v33 = vsel %vm6101_vm13, %v4632_v7, %v1371_v43  ;;  %v1373_v8 = vrot.slane %v1371_v43, 4  ;;  %v1376_v48 = vrot.slane %v1374_v15, 4 }
  0x62   : > { %4603 = vmatmul.mubr.msk.bf16.gmra.mxu0 %vm586_vm1, %v4592_v40  ;;  %v1363_v40 = vrot.slane %v1361_v3, 4  ;;  %v4593_v18 = vcombine.low %v6003_v31, %v6018_v0  ;;  %v1368_v22 = vsel %vm6101_vm13, %v1366_v25, %v1367_v16  ;;  %v1133_v31 = vsel %vm5916_vm9, %v1127_v35, %v1132_v21 }
  0x63   : > { %1006 = vmatprep.mubr.bf16.mxu0 %v7931_v10  ;;  %v4641_v46 = vcombine.low %v1368_v22, %v1372_v33  ;;  %v1375_v1 = vsel %vm6101_vm13, %v1373_v8, %v1374_v15  ;;  %v1378_v49 = vsel %vm6101_vm13, %v1376_v48, %v1377_v63  ;;  %v1141_v0 = vsel %vm5916_vm9, %v6089_v26, %v6083_v24 }
  0x64   : > { %v1365_v53 = vsel %vm6101_vm13, %v1363_v40, %v1364_v57  ;;  %v4642_v52 = vcombine.low %v1375_v1, %v1378_v49  ;;  %v872_v11 = vsel %vm5941_vm10, %v4585_v30, %v871_v19  ;;  %v875_v39 = vsel %vm5941_vm10, %v6032_v51, %v874_v37 }
  0x65   : > { %v4640_v36 = vcombine.low %v1362_v34, %v1365_v53  ;;  %v4616_v35 = vcombine.low %v1133_v31, %v1141_v0  ;;  %v1152_v26 = vor.u32 %v6098_v54, %v1150_v23  ;;  %v1146_v9 = vsel %vm5916_vm9, %v1142_v58, %v6080_v61 }
  0x66   : > { %v878_v41 = vsel %vm5941_vm10, %v6038_v12, %v877_v60  ;;  %v882_v19 = vsel %vm5941_vm10, %v4586_v14, %v881_v38  ;;  %v885_v13 = vsel %vm5941_vm10, %v6078_v50, %v884_v45  ;;  %v888_v4 = vsel %vm5941_vm10, %v6093_v32, %v887_v62 }
  0x67   : > { %4626 = vmatmul.mubr.msk.bf16.gmra.mxu1 %vm586_vm1, %v4615_v17  ;;  %v4594_v17 = vcombine.low %v872_v11, %v875_v39  ;;  %v1153_v28 = vsel %vm5916_vm9, %v1147_v5, %v1152_v26  ;;  %v4595_v29 = vcombine.low %v878_v41, %v882_v19  ;;  %v4596_v20 = vcombine.low %v885_v13, %v888_v4  ;;  %v5181_v19 = vld [vmem:[%s7919_s2 + $0x64] ss:$8 sps:$4 sm:$0xff]   ;;  %v5179_v4 = vld [vmem:[%s7919_s2 + $0x60] ss:$8 sps:$4 sm:$0xff]  }
  0x68   : > { %1291 = vmatprep.mubr.bf16.mxu1 %v7931_v10  ;;  %v4617_v30 = vcombine.low %v1146_v9, %v1153_v28  ;;  %v5176_v9 = vld [vmem:[%s7919_s2 + $0x70] ss:$8 sps:$4 sm:$0xff]   ;;  %v5178_v28 = vld [vmem:[%s7919_s2 + $0x74] ss:$8 sps:$4 sm:$0xff]   ;;  %vm1585_vm14 = vcmask 1046528   ;;  %vm1762_vm15 = vcmask 965632  }
  0x69   : > { %2452 = vmatprep.subr.bf16.mxu0 %v5178_v28  ;;  %v5194_v28 = vld [vmem:[%s7919_s2 + $0x140] ss:$8 sps:$4 sm:$0xff]   ;;  %vm2204_vm2 = vcmask 916480   ;;  %vm3147_vm3 = vcmask 1043456   ;;  %vm2836_vm4 = vcmask 1044480   ;;  %vm3643_vm5 = vcmask 97280  }
  0x6a   : > { %4604 = vmatmul.mubr.msk.bf16.gmra.mxu0 %vm586_vm1, %v4593_v18  ;;  %vm3779_vm6 = vcmask 1041409   ;;  %vm3782_vm7 = vcmask 1042434   ;;  %vm3785_vm8 = vcmask 1043459   ;;  %vm3857_vm9 = vcmask 261120  }
  0x6b   : > { %1016 = vmatprep.mubr.bf16.mxu0 %v7931_v10  ;;  %vm4358_vm10 = vcmask 1040384   ;;  %vm5517_vm11 = vmmov 0   ;;  %vm4354_vm12 = vcmask 408576   ;;  %vm4402_vm13 = vcmask 76800  }
  0x6f   : > { %4627 = vmatmul.mubr.msk.bf16.gmra.mxu1 %vm586_vm1, %v4616_v35 }
  0x70   : > { %1301 = vmatprep.mubr.bf16.mxu1 %v7931_v10 }
  0x72   : > { %4605 = vmatmul.mubr.msk.bf16.gmra.mxu0 %vm586_vm1, %v4594_v17 }
  0x73   : > { %1026 = vmatprep.mubr.bf16.mxu0 %v7931_v10 }
  0x77   : > { %4628 = vmatmul.mubr.msk.bf16.gmra.mxu1 %vm586_vm1, %v4617_v30  ;;  %v5182_v30 = vld [vmem:[%s7919_s2 + $0x160] ss:$8 sps:$4 sm:$0xff]  }
  0x7a   : > { %4606 = vmatmul.mubr.msk.bf16.gmra.mxu0 %vm586_vm1, %v4595_v29  ;;  %v5184_v29 = vld [vmem:[%s7919_s2 + $0x164] ss:$8 sps:$4 sm:$0xff]  }
  0x7b   : > { %1036 = vmatprep.mubr.bf16.mxu0 %v7931_v10  ;;  %2217 = vmatprep.subr.bf16.mxu1 %v5184_v29 }
  0x7c   : > { %2218 = vmatpush1.bf16.msra.mxu1 %v5182_v30  ;;  %v5202_v30 = vld [vmem:[%s7919_s2 + $0x134] ss:$8 sps:$4 sm:$0xff]  }
  0x82   : > { %4607 = vmatmul.mubr.msk.bf16.gmra.mxu0 %vm586_vm1, %v4596_v20  ;;  %v5190_v20 = vld [vmem:[%s7919_s2 + $0x154] ss:$8 sps:$4 sm:$0xff]  }
  0x83   : > { %1476 = vmatprep.mubr.bf16.mxu0 %v7931_v10  ;;  %2219 = vmatprep.subr.bf16.mxu1 %v5190_v20 }
  0x8a   : > { %4648 = vmatmul.mubr.msk.bf16.vlgmr.msra.gmra.mxu0 %vm586_vm1, %v4637_v56 }
  0x8b   : > { %1486 = vmatprep.mubr.bf16.mxu0 %v7931_v10  ;;  %2453 = vmatpush1.bf16.msra.mxu0 %v5176_v9  ;;  %v5193_v9 = vld [vmem:[%s7919_s2 + $0x44] ss:$8 sps:$4 sm:$0xff]  }
  0x8c   : > { %2454 = vmatprep.subr.bf16.mxu0 %v5181_v19 }
  0x8f   : > { %2455 = vmatpush1.bf16.msra.mxu0 %v5179_v4  ;;  %v5191_v4 = vld [vmem:[%s7919_s2 + $0x40] ss:$8 sps:$4 sm:$0xff]  }
  0x92   : > { %4649 = vmatmul.mubr.msk.bf16.gmra.mxu0 %vm586_vm1, %v4638_v2 }
  0x93   : > { %1496 = vmatprep.mubr.bf16.mxu0 %v7931_v10 }
  0x9a   : > { %4650 = vmatmul.mubr.msk.bf16.gmra.mxu0 %vm586_vm1, %v4639_v42 }
  0x9b   : > { %1506 = vmatprep.mubr.bf16.mxu0 %v7931_v10 }
  0xa2   : > { %4651 = vmatmul.mubr.msk.bf16.gmra.mxu0 %vm586_vm1, %v4640_v36 }
  0xa3   : > { %1516 = vmatprep.mubr.bf16.mxu0 %v7931_v10 }
  0xaa   : > { %4652 = vmatmul.mubr.msk.bf16.gmra.mxu0 %vm586_vm1, %v4641_v46 }
  0xab   : > { %1526 = vmatprep.mubr.bf16.mxu0 %v7931_v10 }
  0xb2   : > { %4653 = vmatmul.mubr.msk.bf16.gmra.mxu0 %vm586_vm1, %v4642_v52  ;;  %vm1835_vm1 = vcmask 834560  }
  0xdf   : > { %v6246_v55 = vpop.f32.mrf.mxu1 }
  0xe1   : > { %v6248_v27 = vpop.f32.mrf.mxu1 }
  0xe3   : > { %v6250_v6 = vpop.f32.mrf.mxu1 }
  0xe5   : > { %v6252_v37 = vpop.f32.mrf.mxu1 }
  0xe7   : > { %v6254_v51 = vpop.f32.mrf.mxu1 }
  0xe9   : > { %v6256_v12 = vpop.f32.mrf.mxu1 }
  0xea   : > { %v6258_v60 = vpop.f32.mrf.mxu0 }
  0xeb   : > { %v6260_v14 = vpop.f32.mrf.mxu1 }
  0xec   : > { %v6262_v38 = vpop.f32.mrf.mxu0 }
  0xed   : > { %v6264_v45 = vpop.f32.mrf.mxu1 }
  0xee   : > { %v6266_v50 = vpop.f32.mrf.mxu0 }
  0xef   : > { %v6270_v24 = vpop.f32.mrf.mxu1 }
  0xf0   : > { %v6268_v61 = vpop.f32.mrf.mxu0 }
  0xf1   : > { %v6274_v32 = vpop.f32.mrf.mxu1 }
  0xf2   : > { %v6272_v62 = vpop.f32.mrf.mxu0 }
  0xf3   : > { %v6278_v58 = vpop.f32.mrf.mxu1 }
  0xf4   : > { %v6276_v54 = vpop.f32.mrf.mxu0 }
  0xf5   : > { %v6282_v23 = vpop.f32.mrf.mxu1 }
  0xf6   : > { %v6280_v5 = vpop.f32.mrf.mxu0 }
  0xf7   : > { %v6286_v2 = vpop.f32.mrf.mxu1 }
  0xf8   : > { %v6284_v56 = vpop.f32.mrf.mxu0 }
  0xf9   : > { %v6290_v59 = vpop.f32.mrf.mxu1 }
  0xfa   : > { %v6288_v47 = vpop.f32.mrf.mxu0  ;;  %7952 = vst [vmem:[#allocation5_spill] sm:$0xff] %v6290_v59 }
  0xfb   : > { %v6294_v3 = vpop.f32.mrf.mxu1 }
  0xfc   : > { %v6292_v44 = vpop.f32.mrf.mxu0  ;;  %7953 = vst [vmem:[#allocation6_spill] sm:$0xff] %v6294_v3 }
  0xfd   : > { %v6298_v16 = vpop.f32.mrf.mxu1 }
  0xfe   : > { %v6296_v57 = vpop.f32.mrf.mxu0  ;;  %7954 = vst [vmem:[#allocation7_spill] sm:$0xff] %v6298_v16 }
  0xff   : > { %v6302_v7 = vpop.f32.mrf.mxu1 }
 0x100   : > { %v6300_v42 = vpop.f32.mrf.mxu0  ;;  %7955 = vst [vmem:[#allocation8_spill] sm:$0xff] %v6302_v7  ;;  %v5217_v7 = vld [vmem:[%s7919_s2 + $0x4] ss:$8 sps:$4 sm:$0xff]  }
 0x101   : > { %v6306_v15 = vpop.f32.mrf.mxu1 }
 0x102   : > { %v6304_v43 = vpop.f32.mrf.mxu0  ;;  %7956 = vst [vmem:[#allocation9_spill] sm:$0xff] %v6306_v15 }
 0x103   : > { %v831_v40 = vpop.f32.mrf.mxu1 }
 0x104   : > { %v6308_v34 = vpop.f32.mrf.mxu0 }
 0x105   : > { %v833_v63 = vpop.f32.mrf.mxu1 }
 0x106   : > { %v6310_v25 = vpop.f32.mrf.mxu0 }
 0x107   : > { %7957 = vst [vmem:[#allocation10_spill] sm:$0xff] %v6310_v25  ;;  %v6314_v33 = vpop.f32.mrf.mxu1 }
 0x108   : > { %v6312_v21 = vpop.f32.mrf.mxu0  ;;  %7959 = vst [vmem:[#allocation12_spill] sm:$0xff] %v6314_v33 }
 0x109   : > { %7958 = vst [vmem:[#allocation11_spill] sm:$0xff] %v6312_v21  ;;  %v6320_v18 = vpop.f32.mrf.mxu1 }
 0x10a   : > { %v6316_v8 = vpop.f32.mrf.mxu0  ;;  %7962 = vst [vmem:[#allocation15_spill] sm:$0xff] %v6320_v18  ;;  %v5205_v18 = vld [vmem:[%s7919_s2 + $0x24] ss:$8 sps:$4 sm:$0xff]  }
 0x10b   : > { %7960 = vst [vmem:[#allocation13_spill] sm:$0xff] %v6316_v8  ;;  %v841_v1 = vpop.f32.mrf.mxu1 }
 0x10c   : > { %v6318_v48 = vpop.f32.mrf.mxu0 }
 0x10d   : > { %7961 = vst [vmem:[#allocation14_spill] sm:$0xff] %v6318_v48  ;;  %v843_v31 = vpop.f32.mrf.mxu1 }
 0x10e   : > { %v690_v53 = vpop.f32.mrf.mxu0 }
 0x10f   : > { %v6322_v22 = vadd.f32 %v831_v40, %v690_v53  ;;  %v6332_v39 = vpop.f32.mrf.mxu1  ;;  %v5188_v53 = vld [vmem:[%s7919_s2 + $0x150] ss:$8 sps:$4 sm:$0xff]  }
 0x110   : > { %v692_v36 = vpop.f32.mrf.mxu0  ;;  %2220 = vmatpush1.bf16.msra.mxu1 %v5188_v53  ;;  %v5200_v53 = vld [vmem:[%s7919_s2 + $0x130] ss:$8 sps:$4 sm:$0xff]  }
 0x111   : > { %v6324_v46 = vadd.f32 %v833_v63, %v692_v36  ;;  %v6344_v41 = vpop.f32.mrf.mxu1  ;;  %v5187_v63 = vld [vmem:[%s7919_s2 + $0x54] ss:$8 sps:$4 sm:$0xff]  }
 0x112   : > { %v6326_v49 = vpop.f32.mrf.mxu0  ;;  %2456 = vmatprep.subr.bf16.mxu0 %v5187_v63  ;;  %v5199_v63 = vld [vmem:[%s7919_s2 + $0x34] ss:$8 sps:$4 sm:$0xff]  }
 0x113   : > { %7963 = vst [vmem:[#allocation16_spill] sm:$0xff] %v6326_v49  ;;  %v6371_v36 = vpop.f32.mrf.mxu1  ;;  %v5211_v49 = vld [vmem:[%s7919_s2 + $0x14] ss:$8 sps:$4 sm:$0xff]  }
 0x114   : > { %v6328_v52 = vpop.f32.mrf.mxu0 }
 0x115   : > { %7964 = vst [vmem:[#allocation17_spill] sm:$0xff] %v6328_v52  ;;  %v6389_v19 = vpop.f32.mrf.mxu1 }
 0x116   : > { %v700_v0 = vpop.f32.mrf.mxu0 }
 0x117   : > { %v6330_v11 = vadd.f32 %v841_v1, %v700_v0  ;;  %v5196_v1 = vld [vmem:[%s7919_s2 + $0x144] ss:$8 sps:$4 sm:$0xff]   ;;  %v5185_v0 = vld [vmem:[%s7919_s2 + $0x50] ss:$8 sps:$4 sm:$0xff]  }
 0x118   : > { %v702_v35 = vpop.f32.mrf.mxu0  ;;  %2221 = vmatprep.subr.bf16.mxu1 %v5196_v1  ;;  %2457 = vmatpush1.bf16.msra.mxu0 %v5185_v0  ;;  %v6407_v1 = vpop.f32.mrf.mxu1  ;;  %v5208_v0 = vld [vmem:[%s7919_s2 + $0x124] ss:$8 sps:$4 sm:$0xff]  }
 0x119   : > { %v6334_v26 = vadd.f32 %v843_v31, %v702_v35  ;;  %2458 = vmatprep.subr.bf16.mxu0 %v5193_v9  ;;  %2222 = vmatpush1.bf16.msra.mxu1 %v5194_v28  ;;  %v5197_v9 = vld [vmem:[%s7919_s2 + $0x30] ss:$8 sps:$4 sm:$0xff]  }
 0x11a   : > { %v6336_v17 = vpop.f32.mrf.mxu0  ;;  %2223 = vmatprep.subr.bf16.mxu1 %v5202_v30  ;;  %v5206_v30 = vld [vmem:[%s7919_s2 + $0x120] ss:$8 sps:$4 sm:$0xff]   ;;  %v6425_v52 = vpop.f32.mrf.mxu1 }
 0x11c   : > { %v6355_v13 = vpop.f32.mrf.mxu0  ;;  %2459 = vmatpush1.bf16.msra.mxu0 %v5191_v4  ;;  %v5214_v4 = vld [vmem:[%s7919_s2 + $0x114] ss:$8 sps:$4 sm:$0xff]   ;;  %v6443_v15 = vpop.f32.mrf.mxu1 }
 0x11d   : > { %2460 = vmatprep.subr.bf16.mxu0 %v5199_v63  ;;  %2224 = vmatpush1.bf16.msra.mxu1 %v5200_v53  ;;  %v5203_v63 = vld [vmem:[%s7919_s2 + $0x20] ss:$8 sps:$4 sm:$0xff]  }
 0x11e   : > { %v6363_v40 = vpop.f32.mrf.mxu0  ;;  %2225 = vmatprep.subr.bf16.mxu1 %v5208_v0  ;;  %v5212_v0 = vld [vmem:[%s7919_s2 + $0x110] ss:$8 sps:$4 sm:$0xff]   ;;  %v6461_v8 = vpop.f32.mrf.mxu1 }
 0x120   : > { %v6376_v31 = vpop.f32.mrf.mxu0  ;;  %2461 = vmatpush1.bf16.msra.mxu0 %v5197_v9  ;;  %v5220_v9 = vld [vmem:[%s7919_s2 + $0x104] ss:$8 sps:$4 sm:$0xff]   ;;  %v6479_v21 = vpop.f32.mrf.mxu1 }
 0x121   : > { %2462 = vmatprep.subr.bf16.mxu0 %v5205_v18  ;;  %2226 = vmatpush1.bf16.msra.mxu1 %v5206_v30  ;;  %v5209_v18 = vld [vmem:[%s7919_s2 + $0x10] ss:$8 sps:$4 sm:$0xff]  }
 0x122   : > { %v6381_v35 = vpop.f32.mrf.mxu0  ;;  %2227 = vmatprep.subr.bf16.mxu1 %v5214_v4  ;;  %v5218_v4 = vld [vmem:[%s7919_s2 + $0x100] ss:$8 sps:$4 sm:$0xff]   ;;  %v6497_v3 = vpop.f32.mrf.mxu1 }
 0x124   : > { %v6394_v29 = vpop.f32.mrf.mxu0  ;;  %2463 = vmatpush1.bf16.msra.mxu0 %v5203_v63  ;;  %v5226_v63 = vld [vmem:[%s7919_s2 + $0xf4] ss:$8 sps:$4 sm:$0xff]  }
 0x125   : > { %2464 = vmatprep.subr.bf16.mxu0 %v5211_v49  ;;  %2228 = vmatpush1.bf16.msra.mxu1 %v5212_v0  ;;  %v5215_v49 = vld [vmem:[%s7919_s2] ss:$8 sps:$4 sm:$0xff]  }
 0x126   : > { %v6399_v20 = vpop.f32.mrf.mxu0  ;;  %2229 = vmatprep.subr.bf16.mxu1 %v5220_v9  ;;  %v5224_v9 = vld [vmem:[%s7919_s2 + $0xf0] ss:$8 sps:$4 sm:$0xff]  }
 0x128   : > { %v6412_v10 = vpop.f32.mrf.mxu0  ;;  %2465 = vmatpush1.bf16.msra.mxu0 %v5209_v18  ;;  %v5232_v18 = vld [vmem:[%s7919_s2 + $0x1d4] ss:$8 sps:$4 sm:$0xff]  }
 0x129   : > { %2466 = vmatprep.subr.bf16.mxu0 %v5217_v7  ;;  %2230 = vmatpush1.bf16.msra.mxu1 %v5218_v4  ;;  %v5221_v7 = vld [vmem:[%s7919_s2 + $0xe0] ss:$8 sps:$4 sm:$0xff]  }
 0x12a   : > { %v6417_v28 = vpop.f32.mrf.mxu0  ;;  %2231 = vmatprep.subr.bf16.mxu1 %v5226_v63  ;;  %v5230_v63 = vld [vmem:[%s7919_s2 + $0x1d0] ss:$8 sps:$4 sm:$0xff]  }
 0x12c   : > { %v6430_v33 = vpop.f32.mrf.mxu0  ;;  %2467 = vmatpush1.bf16.msra.mxu0 %v5215_v49 }
 0x12d   : > { %2232 = vmatpush1.bf16.msra.mxu1 %v5224_v9  ;;  %v6504_v9 = vpop.f32.mrf.mxu1 }
 0x12e   : > { %v6435_v53 = vpop.f32.mrf.mxu0  ;;  %2235 = vmatprep.subr.bf16.mxu1 %v5232_v18  ;;  %7971 = vst [vmem:[#allocation24_spill] sm:$0xff] %v6504_v9  ;;  %v790_v9 = vadd.f32 %v6248_v27, %v6262_v38  ;;  %v5236_v27 = vld [vmem:[%s7919_s2 + $0x1c0] ss:$8 sps:$4 sm:$0xff]  }
 0x130   : > { %v6448_v48 = vpop.f32.mrf.mxu0 }
 0x131   : > { %2236 = vmatpush2.bf16.msra.mxu1 %v5230_v63 }
 0x132   : > { %v6453_v30 = vpop.f32.mrf.mxu0 }
 0x133   : > { %7965 = vst [vmem:[#allocation18_spill] sm:$0xff] %v6453_v30  ;;  %v5223_v30 = vld [vmem:[%s7919_s2 + $0xe4] ss:$8 sps:$4 sm:$0xff]  }
 0x134   : > { %v6466_v16 = vpop.f32.mrf.mxu0  ;;  %2470 = vmatprep.subr.bf16.mxu0 %v5223_v30 }
 0x135   : > { %7966 = vst [vmem:[#allocation19_spill] sm:$0xff] %v6466_v16  ;;  %2471 = vmatpush2.bf16.msra.mxu0 %v5221_v7  ;;  %v6514_v7 = vpop.f32.mrf.mxu1 }
 0x136   : > { %v6471_v0 = vpop.f32.mrf.mxu0 }
 0x137   : > { %7967 = vst [vmem:[#allocation20_spill] sm:$0xff] %v6471_v0  ;;  %v5229_v0 = vld [vmem:[%s7919_s2 + $0xd4] ss:$8 sps:$4 sm:$0xff]  }
 0x138   : > { %v6484_v16 = vpop.f32.mrf.mxu0  ;;  %2472 = vmatprep.subr.bf16.mxu0 %v5229_v0  ;;  %v788_v0 = vadd.f32 %v6246_v55, %v6258_v60  ;;  %v5235_v55 = vld [vmem:[%s7919_s2 + $0xc4] ss:$8 sps:$4 sm:$0xff]   ;;  %v1048_v60 = vadd.f32 %v6355_v13, %v790_v9 }
 0x139   : > { %7968 = vst [vmem:[#allocation21_spill] sm:$0xff] %v6484_v16 }
 0x13a   : > { %v6489_v4 = vpop.f32.mrf.mxu0 }
 0x13b   : > { %7969 = vst [vmem:[#allocation22_spill] sm:$0xff] %v6489_v4  ;;  %v5227_v4 = vld [vmem:[%s7919_s2 + $0xd0] ss:$8 sps:$4 sm:$0xff]  }
 0x13c   : > { %v6499_v49 = vpop.f32.mrf.mxu0  ;;  %2473 = vmatpush2.bf16.msra.mxu0 %v5227_v4 }
 0x13d   : > { %7970 = vst [vmem:[#allocation23_spill] sm:$0xff] %v6499_v49  ;;  %2474 = vmatprep.subr.bf16.mxu0 %v5235_v55 }
 0x13e   : > { %v1032_v30 = vpop.f32.mrf.mxu0 }
 0x13f   : > { %v6507_v16 = vadd.f32 %v1032_v30, %v6322_v22  ;;  %v792_v22 = vadd.f32 %v6250_v6, %v6266_v50  ;;  %v794_v6 = vadd.f32 %v6252_v37, %v6268_v61 }
 0x140   : > { %v1034_v25 = vpop.f32.mrf.mxu0 }
 0x141   : > { %v6510_v59 = vadd.f32 %v1034_v25, %v6324_v46  ;;  %v1047_v25 = vadd.f32 %v6336_v17, %v788_v0  ;;  %v6525_v46 = vpop.f32.mrf.mxu1  ;;  %v1049_v38 = vadd.f32 %v6363_v40, %v792_v22  ;;  %v798_v0 = vadd.f32 %v6254_v51, %v6272_v62  ;;  %v5241_v62 = vld [vmem:[%s7919_s2 + $0xb4] ss:$8 sps:$4 sm:$0xff]  }
 0x142   : > { %v6512_v18 = vpop.f32.mrf.mxu0  ;;  %v1050_v37 = vadd.f32 %v6376_v31, %v794_v6  ;;  %v1313_v40 = vadd.f32 %v6344_v41, %v1048_v60 }
 0x143   : > { %7972 = vst [vmem:[#allocation25_spill] sm:$0xff] %v6510_v59  ;;  %v5233_v59 = vld [vmem:[%s7919_s2 + $0xc0] ss:$8 sps:$4 sm:$0xff]   ;;  %v6553_v61 = vpop.f32.mrf.mxu1  ;;  %v1314_v9 = vadd.f32 %v6371_v36, %v1049_v38  ;;  %v1051_v22 = vadd.f32 %v6381_v35, %v798_v0  ;;  %v5247_v38 = vld [vmem:[%s7919_s2 + $0xa4] ss:$8 sps:$4 sm:$0xff]   ;;  %v812_v0 = vadd.f32 %v6278_v58, %v6296_v57 }
 0x144   : > { %v6516_v49 = vpop.f32.mrf.mxu0  ;;  %2475 = vmatpush2.bf16.msra.mxu0 %v5233_v59  ;;  %v1315_v41 = vadd.f32 %v6389_v19, %v1050_v37  ;;  %v5253_v58 = vld [vmem:[%s7919_s2 + $0x94] ss:$8 sps:$4 sm:$0xff]  }
 0x145   : > { %v6573_v36 = vpop.f32.mrf.mxu1  ;;  %2476 = vmatprep.subr.bf16.mxu0 %v5241_v62  ;;  %v1316_v19 = vadd.f32 %v6407_v1, %v1051_v22 }
 0x146   : > { %v1042_v63 = vpop.f32.mrf.mxu0 }
 0x147   : > { %v6528_v4 = vadd.f32 %v1042_v63, %v6330_v11  ;;  %v5238_v11 = vld [vmem:[%s7919_s2 + $0x1c4] ss:$8 sps:$4 sm:$0xff]   ;;  %v1312_v63 = vadd.f32 %v6332_v39, %v1047_v25  ;;  %v802_v25 = vadd.f32 %v6260_v14, %v6280_v5  ;;  %v808_v14 = vadd.f32 %v6270_v24, %v6288_v47  ;;  %v6606_v47 = vpop.f32.mrf.mxu1 }
 0x148   : > { %v1044_v30 = vpop.f32.mrf.mxu0  ;;  %2237 = vmatprep.subr.bf16.mxu1 %v5238_v11  ;;  %v5245_v11 = vld [vmem:[%s7919_s2 + $0xa0] ss:$8 sps:$4 sm:$0xff]   ;;  %v5250_v24 = vld [vmem:[%s7919_s2 + $0x1a4] ss:$8 sps:$4 sm:$0xff]  }
 0x149   : > { %v6544_v50 = vadd.f32 %v1044_v30, %v6334_v26  ;;  %v800_v26 = vadd.f32 %v6256_v12, %v6276_v54  ;;  %2238 = vmatpush2.bf16.msra.mxu1 %v5236_v27  ;;  %v5239_v12 = vld [vmem:[%s7919_s2 + $0xb0] ss:$8 sps:$4 sm:$0xff]   ;;  %v5244_v54 = vld [vmem:[%s7919_s2 + $0x1b4] ss:$8 sps:$4 sm:$0xff]   ;;  %v804_v30 = vadd.f32 %v6264_v45, %v6284_v56  ;;  %v810_v45 = vadd.f32 %v6274_v32, %v6292_v44 }
 0x14a   : > { %v1478_v17 = vpop.f32.mrf.mxu0  ;;  %2239 = vmatprep.subr.bf16.mxu1 %v5244_v54  ;;  %2477 = vmatpush2.bf16.msra.mxu0 %v5239_v12  ;;  %v1053_v5 = vadd.f32 %v6399_v20, %v802_v25  ;;  %v5254_v12 = vld [vmem:[%s7919_s2 + $0x190] ss:$8 sps:$4 sm:$0xff]  }
 0x14b   : > { %v6560_v51 = vadd.f32 %v1478_v17, %v1312_v63  ;;  %v1052_v39 = vadd.f32 %v6394_v29, %v800_v26  ;;  %v5242_v29 = vld [vmem:[%s7919_s2 + $0x1b0] ss:$8 sps:$4 sm:$0xff]   ;;  %v5248_v17 = vld [vmem:[%s7919_s2 + $0x1a0] ss:$8 sps:$4 sm:$0xff]   ;;  %2478 = vmatprep.subr.bf16.mxu0 %v5247_v38  ;;  %v1054_v63 = vadd.f32 %v6412_v10, %v804_v30  ;;  %v814_v10 = vadd.f32 %v6282_v23, %v6300_v42  ;;  %v5256_v23 = vld [vmem:[%s7919_s2 + $0x194] ss:$8 sps:$4 sm:$0xff]  }
 0x14c   : > { %v1480_v13 = vpop.f32.mrf.mxu0  ;;  %v1318_v57 = vadd.f32 %v6443_v15, %v1053_v5  ;;  %v1057_v42 = vadd.f32 %v6435_v53, %v812_v0  ;;  %v6639_v15 = vpop.f32.mrf.mxu1 }
 0x14d   : > { %v6575_v31 = vadd.f32 %v1480_v13, %v1313_v40  ;;  %v1586_v27 = vrot.slane %v6560_v51, 1  ;;  %2240 = vmatpush2.bf16.msra.mxu1 %v5242_v29  ;;  %v1317_v56 = vadd.f32 %v6425_v52, %v1052_v39  ;;  %v1055_v13 = vadd.f32 %v6417_v28, %v808_v14  ;;  %v5251_v28 = vld [vmem:[%s7919_s2 + $0x90] ss:$8 sps:$4 sm:$0xff]  }
 0x14e   : > { %v1482_v59 = vpop.f32.mrf.mxu0  ;;  %2241 = vmatprep.subr.bf16.mxu1 %v5250_v24  ;;  %2479 = vmatpush2.bf16.msra.mxu0 %v5245_v11  ;;  %v1319_v53 = vadd.f32 %v6461_v8, %v1054_v63  ;;  %v5262_v8 = vld [vmem:[%s7919_s2 + $0x184] ss:$8 sps:$4 sm:$0xff]   ;;  %v6677_v14 = vpop.f32.mrf.mxu1  ;;  %v7975_v24 = vld [vmem:[#allocation6_spill] sm:$0xff] }
 0x14f   : > { %v1539_v35 = vadd.f32 %v1482_v59, %v1314_v9  ;;  %v1589_v32 = vrot.slane %v6575_v31, 1  ;;  %2480 = vmatprep.subr.bf16.mxu0 %v5253_v58  ;;  %v1320_v30 = vadd.f32 %v6479_v21, %v1055_v13  ;;  %v5257_v21 = vld [vmem:[%s7919_s2 + $0x80] ss:$8 sps:$4 sm:$0xff]   ;;  %v7978_v13 = vld [vmem:[#allocation7_spill] sm:$0xff] }
 0x150   : > { %v1484_v55 = vpop.f32.mrf.mxu0 }
 0x151   : > { %v1587_v6 = vrot.slane %v1539_v35, 1  ;;  %v6586_v60 = vadd.f32 %v1484_v55, %v1315_v41  ;;  %2242 = vmatpush2.bf16.msra.mxu1 %v5248_v17  ;;  %v7974_v17 = vld [vmem:[#allocation10_spill] sm:$0xff] }
 0x152   : > { %v1488_v1 = vpop.f32.mrf.mxu0  ;;  %2243 = vmatprep.subr.bf16.mxu1 %v5256_v23  ;;  %2481 = vmatpush2.bf16.msra.mxu0 %v5251_v28  ;;  %v7980_v23 = vld [vmem:[#allocation19_spill] sm:$0xff] }
 0x153   : > { %v1590_v44 = vrot.slane %v6586_v60, 1  ;;  %v1541_v52 = vadd.f32 %v1488_v1, %v1316_v19  ;;  %v1588_v20 = vsel %vm1585_vm14, %v1586_v27, %v1587_v6  ;;  %v7973_v1 = vld [vmem:[#allocation5_spill] sm:$0xff] }
 0x154   : > { %v1490_v37 = vpop.f32.mrf.mxu0  ;;  %v6615_v26 = vmax.f32 %v6560_v51, %v1588_v20  ;;  %v1056_v51 = vadd.f32 %v6430_v33, %v810_v45  ;;  %v820_v11 = vadd.f32 %v7973_v1, %v6308_v34  ;;  %v7986_v1 = vld [vmem:[#allocation21_spill] sm:$0xff] }
 0x155   : > { %v1592_v40 = vrot.slane %v1541_v52, 1  ;;  %v1542_v9 = vadd.f32 %v1490_v37, %v1317_v56  ;;  %v1591_v22 = vsel %vm1585_vm14, %v1589_v32, %v1590_v44  ;;  %2244 = vmatpush2.bf16.msra.mxu1 %v5254_v12  ;;  %v5260_v56 = vld [vmem:[%s7919_s2 + $0x180] ss:$8 sps:$4 sm:$0xff]   ;;  %v7977_v37 = vld [vmem:[#allocation11_spill] sm:$0xff] }
 0x156   : > { %v1492_v62 = vpop.f32.mrf.mxu0  ;;  %1714 = vrot.lane.b32.xlu0 %v6615_v26, %s5512_s24  ;;  %1799 = vrot.lane.b32.xlu1 %v6615_v26, %s5513_s25  ;;  %v6649_v29 = vmax.f32 %v6575_v31, %v1591_v22  ;;  %v1058_v31 = vadd.f32 %v6448_v48, %v814_v10  ;;  %v818_v48 = vadd.f32 %v6286_v2, %v6304_v43  ;;  %v5265_v10 = vld [vmem:[%s7919_s2 + $0x174] ss:$8 sps:$4 sm:$0xff]  }
 0x157   : > { %v1658_v33 = vsel %vm1585_vm14, %v1592_v40, %v1586_v27  ;;  %v1594_v39 = vrot.slane %v1542_v9, 1  ;;  %v1593_v59 = vsel %vm1585_vm14, %v1587_v6, %v1592_v40  ;;  %v6656_v19 = vadd.f32 %v1492_v62, %v1318_v57  ;;  %v5259_v27 = vld [vmem:[%s7919_s2 + $0x84] ss:$8 sps:$4 sm:$0xff]   ;;  %2245 = vmatprep.subr.bf16.mxu1 %v5262_v8  ;;  %v7979_v40 = vld [vmem:[#allocation18_spill] sm:$0xff] }
 0x158   : > { %v6646_v54 = vmax.f32 %v1541_v52, %v1658_v33  ;;  %v1494_v41 = vpop.f32.mrf.mxu0  ;;  %v6651_v25 = vmax.f32 %v1539_v35, %v1593_v59  ;;  %v1321_v38 = vadd.f32 %v6497_v3, %v1056_v51  ;;  %2482 = vmatprep.subr.bf16.mxu0 %v5259_v27  ;;  %v7976_v52 = vld [vmem:[#allocation24_spill] sm:$0xff]  ;;  %v824_v34 = vadd.f32 %v7978_v13, %v7977_v37  ;;  %v7984_v8 = vld [vmem:[#allocation14_spill] sm:$0xff] }
 0x159   : > { %v1659_v55 = vsel %vm1585_vm14, %v1594_v39, %v1589_v32  ;;  %v1544_v45 = vadd.f32 %v1494_v41, %v1319_v53  ;;  %v822_v32 = vadd.f32 %v7975_v24, %v7974_v17  ;;  %v1322_v20 = vadd.f32 %v7976_v52, %v1057_v42  ;;  %2483 = vmatpush2.bf16.msra.mxu0 %v5257_v21  ;;  %v7981_v33 = vld [vmem:[#allocation20_spill] sm:$0xff]  ;;  %v7982_v53 = vld [vmem:[#allocation13_spill] sm:$0xff]  ;;  %v7987_v13 = vld [vmem:[#allocation22_spill] sm:$0xff] }
 0x15a   : > { %v6662_v6 = vmax.f32 %v1542_v9, %v1659_v55  ;;  %v1498_v35 = vpop.f32.mrf.mxu0  ;;  %1716 = vrot.lane.b32.xlu0 %v6649_v29, %s5512_s24  ;;  %1803 = vrot.lane.b32.xlu1 %v6646_v54, %s5513_s25  ;;  %v1596_v3 = vrot.slane %v6656_v19, 1  ;;  %v1595_v63 = vsel %vm1585_vm14, %v1590_v44, %v1594_v39  ;;  %v1059_v9 = vadd.f32 %v7979_v40, %v818_v48  ;;  %v6702_v44 = vpop.f32.mrf.mxu1  ;;  %v5268_v21 = vld [vmem:[%s7919_s2 + $0x344] ss:$8 sps:$4 sm:$0xff]  }
 0x15b   : > { %v1545_v5 = vadd.f32 %v1498_v35, %v1320_v30  ;;  %2246 = vmatpush2.bf16.msra.mxu1 %v5260_v56  ;;  %v1323_v22 = vadd.f32 %v6514_v7, %v1058_v31  ;;  %v1599_v57 = vrot.slane %v1544_v45, 1  ;;  %v5263_v7 = vld [vmem:[%s7919_s2 + $0x170] ss:$8 sps:$4 sm:$0xff]   ;;  %v1060_v42 = vadd.f32 %v7980_v23, %v820_v11  ;;  %v7983_v30 = vld [vmem:[#allocation8_spill] sm:$0xff]  ;;  %v7985_v48 = vld [vmem:[#allocation9_spill] sm:$0xff]  ;;  %3058 = vmatprep.subr.bf16.mxu0 %v5268_v21 }
 0x15c   : > { %v1500_v2 = vpop.f32.mrf.mxu0  ;;  %v1061_v39 = vadd.f32 %v7981_v33, %v822_v32  ;;  %v6711_v12 = vmax.f32 %v6586_v60, %v1595_v63  ;;  %2247 = vmatprep.subr.bf16.mxu1 %v5265_v10  ;;  %v828_v55 = vadd.f32 %v7983_v30, %v7982_v53  ;;  %v830_v60 = vadd.f32 %v7985_v48, %v7984_v8  ;;  %v1299_v17 = vpop.f32.mrf.mxu1  ;;  %v7989_v33 = vld [vmem:[#allocation16_spill] sm:$0xff] }
 0x15d   : > { %v1597_v43 = vrot.slane %v1545_v5, 1  ;;  %v1546_v0 = vadd.f32 %v1500_v2, %v1321_v38  ;;  %v1324_v38 = vadd.f32 %v6525_v46, %v1059_v9  ;;  %v1062_v11 = vadd.f32 %v7986_v1, %v824_v34  ;;  %v5271_v46 = vld [vmem:[%s7919_s2 + $0x254] ss:$8 sps:$4 sm:$0xff]  }
 0x15e   : > { %v1502_v58 = vpop.f32.mrf.mxu0  ;;  %1801 = vrot.lane.b32.xlu0 %v6651_v25, %s5513_s25  ;;  %1718 = vrot.lane.b32.xlu1 %v6651_v25, %s5512_s24  ;;  %v1326_v2 = vadd.f32 %v6573_v36, %v1061_v39  ;;  %v1063_v34 = vadd.f32 %v7987_v13, %v828_v55  ;;  %v7988_v9 = vld [vmem:[#allocation23_spill] sm:$0xff]  ;;  %v1303_v10 = vpop.f32.mrf.mxu1  ;;  %v7990_v39 = vld [vmem:[#allocation12_spill] sm:$0xff]  ;;  %v1330_v1 = vadd.f32 %v6702_v44, %v6507_v16 }
 0x15f   : > { %v1600_v51 = vrot.slane %v1546_v0, 1  ;;  %v1547_v62 = vadd.f32 %v1502_v58, %v1322_v20  ;;  %v1598_v28 = vsel %vm1585_vm14, %v1596_v3, %v1597_v43  ;;  %2248 = vmatpush2.bf16.msra.mxu1 %v5263_v7  ;;  %v1325_v20 = vadd.f32 %v6553_v61, %v1060_v42 }
 0x160   : > { %v1504_v59 = vpop.f32.mrf.mxu0  ;;  %v6714_v41 = vmax.f32 %v6656_v19, %v1598_v28  ;;  %2747 = vmatprep.subr.bf16.mxu1 %v5271_v46  ;;  %v1328_v28 = vadd.f32 %v6639_v15, %v1063_v34 }
 0x161   : > { %v1602_v27 = vrot.slane %v1547_v62, 1  ;;  %v1548_v31 = vadd.f32 %v1504_v59, %v1323_v22  ;;  %v1601_v35 = vsel %vm1585_vm14, %v1599_v57, %v1600_v51  ;;  %v1064_v22 = vadd.f32 %v7988_v9, %v830_v60 }
 0x162   : > { %v1508_v19 = vpop.f32.mrf.mxu0  ;;  %1720 = vrot.lane.b32.xlu0 %v6711_v12, %s5512_s24  ;;  %1724 = vrot.lane.b32.xlu1 %v6662_v6, %s5512_s24  ;;  %v6729_v56 = vmax.f32 %v1544_v45, %v1601_v35  ;;  %v838_v59 = vadd.f32 %v7990_v39, %v7989_v33  ;;  %v7992_v35 = vld [vmem:[#allocation15_spill] sm:$0xff] }
 0x163   : > { %v1660_v24 = vsel %vm1585_vm14, %v1602_v27, %v1596_v3  ;;  %v1604_v32 = vrot.slane %v1548_v31, 1  ;;  %v1603_v52 = vsel %vm1585_vm14, %v1597_v43, %v1602_v27  ;;  %v1549_v40 = vadd.f32 %v1508_v19, %v1324_v38 }
 0x164   : > { %v6739_v63 = vmax.f32 %v1547_v62, %v1660_v24  ;;  %v1510_v45 = vpop.f32.mrf.mxu0  ;;  %v6741_v37 = vmax.f32 %v1545_v5, %v1603_v52  ;;  %v1327_v5 = vadd.f32 %v6606_v47, %v1062_v11  ;;  %v1329_v53 = vadd.f32 %v6677_v14, %v1064_v22  ;;  %v1305_v47 = vpop.f32.mrf.mxu1 }
 0x165   : > { %v1661_v3 = vsel %vm1585_vm14, %v1604_v32, %v1599_v57  ;;  %v1605_v43 = vsel %vm1585_vm14, %v1600_v51, %v1604_v32  ;;  %v1550_v57 = vadd.f32 %v1510_v45, %v1325_v20  ;;  %v1606_v7 = vrot.slane %v1549_v40, 1 }
 0x166   : > { %v6747_v58 = vmax.f32 %v1548_v31, %v1661_v3  ;;  %v1512_v61 = vpop.f32.mrf.mxu0  ;;  %1722 = vrot.lane.b32.xlu0 %v6646_v54, %s5512_s24  ;;  %1726 = vrot.lane.b32.xlu1 %v6714_v41, %s5512_s24  ;;  %v6753_v36 = vmax.f32 %v1546_v0, %v1605_v43  ;;  %v7991_v31 = vld [vmem:[#allocation17_spill] sm:$0xff]  ;;  %v1067_v14 = vadd.f32 %v6512_v18, %v838_v59  ;;  %v1307_v52 = vpop.f32.mrf.mxu1 }
 0x167   : > { %v1551_v62 = vadd.f32 %v1512_v61, %v1326_v2  ;;  %v1609_v0 = vrot.slane %v1550_v57, 1  ;;  %v840_v21 = vadd.f32 %v7992_v35, %v7991_v31  ;;  %v7993_v2 = vld [vmem:[#allocation25_spill] sm:$0xff] }
 0x168   : > { %v1514_v51 = vpop.f32.mrf.mxu0  ;;  %v1331_v45 = vadd.f32 %v1299_v17, %v7993_v2  ;;  %v1332_v34 = vadd.f32 %v1303_v10, %v1067_v14  ;;  %v1309_v61 = vpop.f32.mrf.mxu1 }
 0x169   : > { %v1607_v23 = vrot.slane %v1551_v62, 1  ;;  %v1552_v42 = vadd.f32 %v1514_v51, %v1327_v5  ;;  %v1068_v32 = vadd.f32 %v6516_v49, %v840_v21 }
 0x16a   : > { %v1518_v30 = vpop.f32.mrf.mxu0  ;;  %1805 = vrot.lane.b32.xlu0 %v6714_v41, %s5513_s25  ;;  %1728 = vrot.lane.b32.xlu1 %v6729_v56, %s5512_s24 }
 0x16b   : > { %v1610_v55 = vrot.slane %v1552_v42, 1  ;;  %v1553_v27 = vadd.f32 %v1518_v30, %v1328_v28  ;;  %v1608_v15 = vsel %vm1585_vm14, %v1606_v7, %v1607_v23  ;;  %v1333_v22 = vadd.f32 %v1305_v47, %v1068_v32 }
 0x16c   : > { %v1520_v8 = vpop.f32.mrf.mxu0  ;;  %v6767_v48 = vmax.f32 %v1549_v40, %v1608_v15 }
 0x16d   : > { %v1612_v60 = vrot.slane %v1553_v27, 1  ;;  %v1554_v38 = vadd.f32 %v1520_v8, %v1329_v53  ;;  %v1611_v19 = vsel %vm1585_vm14, %v1609_v0, %v1610_v55 }
 0x16e   : > { %v1522_v11 = vpop.f32.mrf.mxu0  ;;  %1809 = vrot.lane.b32.xlu0 %v6739_v63, %s5513_s25  ;;  %1807 = vrot.lane.b32.xlu1 %v6741_v37, %s5513_s25  ;;  %v6777_v24 = vmax.f32 %v1550_v57, %v1611_v19  ;;  %v1874_v19 = vlaneseq }
 0x16f   : > { %v1662_v18 = vsel %vm1585_vm14, %v1612_v60, %v1606_v7  ;;  %v1614_v46 = vrot.slane %v1554_v38, 1  ;;  %v1613_v20 = vsel %vm1585_vm14, %v1607_v23, %v1612_v60  ;;  %v1555_v40 = vadd.f32 %v1522_v11, %v1330_v1 }
 0x170   : > { %v6783_v16 = vmax.f32 %v1553_v27, %v1662_v18  ;;  %v1524_v44 = vpop.f32.mrf.mxu0  ;;  %v6785_v13 = vmax.f32 %v1551_v62, %v1613_v20  ;;  %v1334_v62 = vadd.f32 %v1307_v52, %v6528_v4  ;;  %v1335_v23 = vadd.f32 %v1309_v61, %v6544_v50  ;;  %v1872_v20 = vld [vmem:[%s7922_s5] sm:$0x3] }
 0x171   : > { %v1663_v3 = vsel %vm1585_vm14, %v1614_v46, %v1609_v0  ;;  %v1615_v43 = vsel %vm1585_vm14, %v1610_v55, %v1614_v46  ;;  %v1556_v5 = vadd.f32 %v1524_v44, %v1331_v45  ;;  %v1616_v51 = vrot.slane %v1555_v40, 1 }
 0x172   : > { %v6789_v49 = vmax.f32 %v1554_v38, %v1663_v3  ;;  %v1528_v9 = vpop.f32.mrf.mxu0  ;;  %1730 = vrot.lane.b32.xlu0 %v6741_v37, %s5512_s24  ;;  %1734 = vrot.lane.b32.xlu1 %v6739_v63, %s5512_s24  ;;  %v6795_v17 = vmax.f32 %v1552_v42, %v1615_v43  ;;  %v6857_v32 = vshrl.u32 %v1874_v19, 7  ;;  %v5266_v19 = vld [vmem:[%s7919_s2 + $0x340] ss:$8 sps:$4 sm:$0xff]  }
 0x173   : > { %v1557_v10 = vadd.f32 %v1528_v9, %v1332_v34  ;;  %v1619_v42 = vrot.slane %v1556_v5, 1 }
 0x174   : > { %v1530_v57 = vpop.f32.mrf.mxu0  ;;  %7994 = vst [vmem:[#allocation5_spill] sm:$0xff] %v6857_v32  ;;  %v7934_v52 = vsub.s32 0, %v6857_v32  ;;  %v7933_v2 = vsub.s32 1, %v6857_v32 }
 0x175   : > { %v1617_v28 = vrot.slane %v1557_v10, 1  ;;  %v1558_v7 = vadd.f32 %v1530_v57, %v1333_v22 }
 0x176   : > { %v1532_v33 = vpop.f32.mrf.mxu0  ;;  %1732 = vrot.lane.b32.xlu0 %v6753_v36, %s5512_s24  ;;  %1736 = vrot.lane.b32.xlu1 %v6747_v58, %s5512_s24  ;;  %v6868_v34 = vrot.slane %v1872_v20, %v7934_v52  ;;  %v6873_v9 = vrot.slane %v1872_v20, %v7933_v2 }
 0x177   : > { %v1620_v39 = vrot.slane %v1558_v7, 1  ;;  %v1559_v59 = vadd.f32 %v1532_v33, %v1334_v62  ;;  %v1618_v53 = vsel %vm1585_vm14, %v1616_v51, %v1617_v28 }
 0x178   : > { %v1534_v30 = vpop.f32.mrf.mxu0  ;;  %v6804_v47 = vmax.f32 %v1555_v40, %v1618_v53 }
 0x179   : > { %v1622_v4 = vrot.slane %v1559_v59, 1  ;;  %v1560_v0 = vadd.f32 %v1534_v30, %v1335_v23  ;;  %v1621_v55 = vsel %vm1585_vm14, %v1619_v42, %v1620_v39 }
 0x17a   : > { %1738 = vrot.lane.b32.xlu0 %v6767_v48, %s5512_s24  ;;  %1811 = vrot.lane.b32.xlu1 %v6767_v48, %s5513_s25  ;;  %v6811_v50 = vmax.f32 %v1556_v5, %v1621_v55 }
 0x17b   : > { %v1664_v27 = vsel %vm1585_vm14, %v1622_v4, %v1616_v51  ;;  %v1624_v15 = vrot.slane %v1560_v0, 1  ;;  %v1623_v31 = vsel %vm1585_vm14, %v1617_v28, %v1622_v4 }
 0x17c   : > { %v6815_v35 = vmax.f32 %v1559_v59, %v1664_v27  ;;  %v6817_v21 = vmax.f32 %v1557_v10, %v1623_v31 }
 0x17d   : > { %v1665_v8 = vsel %vm1585_vm14, %v1624_v15, %v1619_v42  ;;  %v1625_v14 = vsel %vm1585_vm14, %v1620_v39, %v1624_v15 }
 0x17e   : > { %v6821_v60 = vmax.f32 %v1560_v0, %v1665_v8  ;;  %1740 = vrot.lane.b32.xlu0 %v6777_v24, %s5512_s24  ;;  %1815 = vrot.lane.b32.xlu1 %v6783_v16, %s5513_s25  ;;  %v6827_v38 = vmax.f32 %v1558_v7, %v1625_v14 }
 0x182   : > { %1813 = vrot.lane.b32.xlu0 %v6785_v13, %s5513_s25  ;;  %1742 = vrot.lane.b32.xlu1 %v6785_v13, %s5512_s24 }
 0x186   : > { %1746 = vrot.lane.b32.xlu0 %v6783_v16, %s5512_s24  ;;  %1744 = vrot.lane.b32.xlu1 %v6795_v17, %s5512_s24 }
 0x18a   : > { %1748 = vrot.lane.b32.xlu0 %v6789_v49, %s5512_s24  ;;  %1750 = vrot.lane.b32.xlu1 %v6804_v47, %s5512_s24 }
 0x18e   : > { %1817 = vrot.lane.b32.xlu0 %v6804_v47, %s5513_s25  ;;  %1752 = vrot.lane.b32.xlu1 %v6811_v50, %s5512_s24 }
 0x192   : > { %1821 = vrot.lane.b32.xlu0 %v6815_v35, %s5513_s25  ;;  %1819 = vrot.lane.b32.xlu1 %v6817_v21, %s5513_s25  ;;  %s5449_s25 = scalar_lea.vmem %s7875_s22, 64 }
 0x193   : > { %p5450_p11 = scmp.ne.s32.totalorder %s7875_s22, %s5449_s25 }
 0x195   : > { %p5451_p12 = pnand %p5450_p11, %p5610_p5 }
 0x196   : > { %1756 = vrot.lane.b32.xlu0 %v6827_v38, %s5512_s24  ;;  %1760 = vrot.lane.b32.xlu1 %v6821_v60, %s5512_s24 }
 0x197   : > { %p5452_p13 = pneg %p5451_p12 }
 0x19a   : > { %1754 = vrot.lane.b32.xlu0 %v6817_v21, %s5512_s24  ;;  %1758 = vrot.lane.b32.xlu1 %v6815_v35, %s5512_s24 }
 0x1c8   : > { %v1715_v1 = vpop.permute.xlu0 %1714  ;;  %v1800_v11 = vpop.permute.xlu1 %1799 }
 0x1cc   : > { %v1717_v18 = vpop.permute.xlu0 %1716  ;;  %v1804_v46 = vpop.permute.xlu1 %1803 }
 0x1cd   : > { %v1763_v45 = vsel %vm1762_vm15, %v1715_v1, %v1717_v18  ;;  %v1836_v44 = vsel %vm1835_vm1, %v1717_v18, %v1800_v11  ;;  %v5274_v1 = vld [vmem:[%s7919_s2 + $0x334] ss:$8 sps:$4 sm:$0xff]  }
 0x1ce   : > { %v1848_v3 = vmax.f32 %v6615_v26, %v1763_v45  ;;  %v1849_v22 = vmax.f32 %v6649_v29, %v1836_v44  ;;  %v5272_v44 = vld [vmem:[%s7919_s2 + $0x330] ss:$8 sps:$4 sm:$0xff]  }
 0x1d0   : > { %v1802_v40 = vpop.permute.xlu0 %1801  ;;  %v1719_v43 = vpop.permute.xlu1 %1718  ;;  %v1884_v61 = vadd.f32 %v6868_v34, %v1848_v3  ;;  %v1885_v57 = vadd.f32 %v6873_v9, %v1849_v22  ;;  %v5280_v22 = vld [vmem:[%s7919_s2 + $0x324] ss:$8 sps:$4 sm:$0xff]  }
 0x1d2   : > { %v1908_v53 = vmax.f32 %v1884_v61, 0.0  ;;  %v1909_v30 = vmax.f32 %v1885_v57, 0.0  ;;  %v5269_v61 = vld [vmem:[%s7919_s2 + $0x250] ss:$8 sps:$4 sm:$0xff]   ;;  %v5277_v57 = vld [vmem:[%s7919_s2 + $0x244] ss:$8 sps:$4 sm:$0xff]  }
 0x1d4   : > { %v1721_v5 = vpop.permute.xlu0 %1720  ;;  %v1725_v10 = vpop.permute.xlu1 %1724 }
 0x1d5   : > { %v1764_v62 = vsel %vm1762_vm15, %v1719_v43, %v1721_v5  ;;  %v1837_v51 = vsel %vm1835_vm1, %v1721_v5, %v1802_v40  ;;  %v1838_v26 = vsel %vm1835_vm1, %v1725_v10, %v1804_v46 }
 0x1d6   : > { %v1850_v28 = vmax.f32 %v6651_v25, %v1764_v62  ;;  %v1851_v7 = vmax.f32 %v6711_v12, %v1837_v51  ;;  %v1853_v23 = vmax.f32 %v6662_v6, %v1838_v26 }
 0x1d8   : > { %v1886_v29 = vadd.f32 %v6868_v34, %v1850_v28  ;;  %v1887_v33 = vadd.f32 %v6873_v9, %v1851_v7  ;;  %v1889_v42 = vadd.f32 %v6873_v9, %v1853_v23  ;;  %v1723_v39 = vpop.permute.xlu0 %1722  ;;  %v1727_v59 = vpop.permute.xlu1 %1726 }
 0x1d9   : > { %v1765_v4 = vsel %vm1762_vm15, %v1723_v39, %v1725_v10  ;;  %v5275_v39 = vld [vmem:[%s7919_s2 + $0x240] ss:$8 sps:$4 sm:$0xff]  }
 0x1da   : > { %v1910_v0 = vmax.f32 %v1886_v29, 0.0  ;;  %v1911_v55 = vmax.f32 %v1887_v33, 0.0  ;;  %v1913_v27 = vmax.f32 %v1889_v42, 0.0  ;;  %v1852_v25 = vmax.f32 %v6646_v54, %v1765_v4  ;;  %v5278_v29 = vld [vmem:[%s7919_s2 + $0x320] ss:$8 sps:$4 sm:$0xff]  }
 0x1db   : > { %v5286_v42 = vld [vmem:[%s7919_s2 + $0x314] ss:$8 sps:$4 sm:$0xff]  }
 0x1dc   : > { %v6889_v12 = vpack.c.bf16 %v1910_v0, %v1908_v53  ;;  %v6891_v6 = vpack.c.bf16 %v1911_v55, %v1909_v30  ;;  %v6893_v15 = vpack.c.bf16 %v1913_v27, %v1913_v27  ;;  %v1888_v31 = vadd.f32 %v6868_v34, %v1852_v25  ;;  %v1806_v8 = vpop.permute.xlu0 %1805  ;;  %v1729_v14 = vpop.permute.xlu1 %1728  ;;  %v5283_v53 = vld [vmem:[%s7919_s2 + $0x234] ss:$8 sps:$4 sm:$0xff]   ;;  %v5284_v25 = vld [vmem:[%s7919_s2 + $0x310] ss:$8 sps:$4 sm:$0xff]  }
 0x1dd   : > { %v1766_v3 = vsel %vm1762_vm15, %v1727_v59, %v1729_v14  ;;  %v1839_v40 = vsel %vm1835_vm1, %v1729_v14, %v1806_v8 }
 0x1de   : > { %v1912_v54 = vmax.f32 %v1888_v31, 0.0  ;;  %4748 = vmatprep.mubr.msk.bf16.mxu0 %vm2204_vm2, %v6891_v6  ;;  %v1998_v11 = vrot.slane %v6891_v6, 1  ;;  %v1999_v18 = vrot.slane %v6893_v15, 1  ;;  %v1995_v5 = vrot.slane %v6889_v12, 1 }
 0x1df   : > { %2485 = vmatmul.mubr.bf16.vlgmr.msra.gmra.mxu0 %v6889_v12  ;;  %v3151_v62 = vrot.slane %v6891_v6, 4  ;;  %v1854_v51 = vmax.f32 %v6714_v41, %v1766_v3  ;;  %v1855_v26 = vmax.f32 %v6729_v56, %v1839_v40  ;;  %v3152_v33 = vrot.slane %v6893_v15, 4 }
 0x1e0   : > { %v6907_v46 = vpack.c.bf16 %v1912_v54, %v1912_v54  ;;  %v1810_v20 = vpop.permute.xlu0 %1809  ;;  %v1808_v45 = vpop.permute.xlu1 %1807  ;;  %3059 = vmatpush1.bf16.msra.mxu0 %v5266_v19  ;;  %v2000_v43 = vsel %vm1585_vm14, %v1998_v11, %v1999_v18  ;;  %v3148_v41 = vrot.slane %v6889_v12, 4 }
 0x1e1   : > { %3060 = vmatprep.subr.bf16.mxu0 %v5274_v1  ;;  %4714 = vmatprep.mubr.msk.bf16.mxu1 %vm2204_vm2, %v2000_v43  ;;  %v6944_v59 = vsel %vm3147_vm3, %v3151_v62, %v3152_v33  ;;  %v1890_v4 = vadd.f32 %v6868_v34, %v1854_v51  ;;  %v1891_v0 = vadd.f32 %v6873_v9, %v1855_v26  ;;  %v5292_v1 = vld [vmem:[%s7919_s2 + $0x304] ss:$8 sps:$4 sm:$0xff]   ;;  %v5290_v43 = vld [vmem:[%s7919_s2 + $0x300] ss:$8 sps:$4 sm:$0xff]  }
 0x1e2   : > { %v1996_v10 = vrot.slane %v6907_v46, 1  ;;  %v3149_v56 = vrot.slane %v6907_v46, 4  ;;  %v5287_v26 = vld [vmem:[%s7919_s2 + $0x220] ss:$8 sps:$4 sm:$0xff]  }
 0x1e4   : > { %v1731_v28 = vpop.permute.xlu0 %1730  ;;  %v1735_v7 = vpop.permute.xlu1 %1734  ;;  %v1997_v23 = vsel %vm1585_vm14, %v1995_v5, %v1996_v10  ;;  %3061 = vmatpush1.bf16.msra.mxu0 %v5272_v44  ;;  %v6950_v30 = vsel %vm3147_vm3, %v3148_v41, %v3149_v56  ;;  %v5298_v5 = vld [vmem:[%s7919_s2 + $0x2f4] ss:$8 sps:$4 sm:$0xff]   ;;  %v5296_v56 = vld [vmem:[%s7919_s2 + $0x2f0] ss:$8 sps:$4 sm:$0xff]  }
 0x1e5   : > { %2250 = vmatmul.mubr.bf16.vlgmr.msra.gmra.mxu1 %v1997_v23  ;;  %3062 = vmatprep.subr.bf16.mxu0 %v5280_v22  ;;  %v1914_v22 = vmax.f32 %v1890_v4, 0.0 }
 0x1e6   : > { %2748 = vmatpush1.bf16.msra.mxu1 %v5269_v61  ;;  %v1915_v61 = vmax.f32 %v1891_v0, 0.0  ;;  %v5293_v0 = vld [vmem:[%s7919_s2 + $0x210] ss:$8 sps:$4 sm:$0xff]  }
 0x1e7   : > { %2749 = vmatprep.subr.bf16.mxu1 %v5277_v57 }
 0x1e8   : > { %v1733_v55 = vpop.permute.xlu0 %1732  ;;  %v1737_v27 = vpop.permute.xlu1 %1736  ;;  %3063 = vmatpush1.bf16.msra.mxu0 %v5278_v29 }
 0x1e9   : > { %v1767_v31 = vsel %vm1762_vm15, %v1731_v28, %v1733_v55  ;;  %v1840_v8 = vsel %vm1835_vm1, %v1733_v55, %v1808_v45  ;;  %v1768_v14 = vsel %vm1762_vm15, %v1735_v7, %v1737_v27  ;;  %v1841_v19 = vsel %vm1835_vm1, %v1737_v27, %v1810_v20  ;;  %3064 = vmatprep.subr.bf16.mxu0 %v5286_v42  ;;  %v5281_v45 = vld [vmem:[%s7919_s2 + $0x230] ss:$8 sps:$4 sm:$0xff]   ;;  %v5289_v20 = vld [vmem:[%s7919_s2 + $0x224] ss:$8 sps:$4 sm:$0xff]   ;;  %v5295_v28 = vld [vmem:[%s7919_s2 + $0x214] ss:$8 sps:$4 sm:$0xff]  }
 0x1ea   : > { %v1856_v54 = vmax.f32 %v6741_v37, %v1767_v31  ;;  %v1857_v11 = vmax.f32 %v6753_v36, %v1840_v8  ;;  %v1858_v18 = vmax.f32 %v6739_v63, %v1768_v14  ;;  %v1859_v44 = vmax.f32 %v6747_v58, %v1841_v19  ;;  %2750 = vmatpush1.bf16.msra.mxu1 %v5275_v39  ;;  %v5301_v8 = vld [vmem:[%s7919_s2 + $0x204] ss:$8 sps:$4 sm:$0xff]  }
 0x1eb   : > { %2751 = vmatprep.subr.bf16.mxu1 %v5283_v53  ;;  %v5304_v53 = vld [vmem:[%s7919_s2 + $0x2e4] ss:$8 sps:$4 sm:$0xff]  }
 0x1ec   : > { %v1892_v3 = vadd.f32 %v6868_v34, %v1856_v54  ;;  %v1893_v37 = vadd.f32 %v6873_v9, %v1857_v11  ;;  %v1894_v36 = vadd.f32 %v6868_v34, %v1858_v18  ;;  %v1895_v63 = vadd.f32 %v6873_v9, %v1859_v44  ;;  %v1739_v40 = vpop.permute.xlu0 %1738  ;;  %v1812_v58 = vpop.permute.xlu1 %1811  ;;  %3065 = vmatpush1.bf16.msra.mxu0 %v5284_v25  ;;  %v5302_v11 = vld [vmem:[%s7919_s2 + $0x2e0] ss:$8 sps:$4 sm:$0xff]  }
 0x1ed   : > { %3066 = vmatprep.subr.bf16.mxu0 %v5292_v1 }
 0x1ee   : > { %v1916_v10 = vmax.f32 %v1892_v3, 0.0  ;;  %v1917_v57 = vmax.f32 %v1893_v37, 0.0  ;;  %v1918_v62 = vmax.f32 %v1894_v36, 0.0  ;;  %v1919_v51 = vmax.f32 %v1895_v63, 0.0  ;;  %2752 = vmatpush1.bf16.msra.mxu1 %v5281_v45  ;;  %v5299_v45 = vld [vmem:[%s7919_s2 + $0x200] ss:$8 sps:$4 sm:$0xff]  }
 0x1ef   : > { %2753 = vmatprep.subr.bf16.mxu1 %v5289_v20 }
 0x1f0   : > { %v6990_v7 = vpack.c.bf16 %v1916_v10, %v1914_v22  ;;  %v6992_v23 = vpack.c.bf16 %v1917_v57, %v1915_v61  ;;  %v6994_v29 = vpack.c.bf16 %v1918_v62, %v1918_v62  ;;  %v6996_v33 = vpack.c.bf16 %v1919_v51, %v1919_v51  ;;  %v1741_v42 = vpop.permute.xlu0 %1740  ;;  %v6998_v41 = vpop.permute.xlu1 %1815  ;;  %3067 = vmatpush1.bf16.msra.mxu0 %v5290_v43  ;;  %v5316_v10 = vld [vmem:[%s7919_s2 + $0x3b4] ss:$8 sps:$4 sm:$0xff]  }
 0x1f1   : > { %v1769_v39 = vsel %vm1762_vm15, %v1739_v40, %v1741_v42  ;;  %3068 = vmatprep.subr.bf16.mxu0 %v5298_v5  ;;  %v1842_v4 = vsel %vm1835_vm1, %v1741_v42, %v1812_v58  ;;  %v5308_v40 = vld [vmem:[%s7919_s2 + $0x2d0] ss:$8 sps:$4 sm:$0xff]   ;;  %v5313_v42 = vld [vmem:[%s7919_s2 + $0x1e4] ss:$8 sps:$4 sm:$0xff]  }
 0x1f2   : > { %2754 = vmatpush1.bf16.msra.mxu1 %v5287_v26  ;;  %4749 = vmatprep.mubr.msk.bf16.mxu0 %vm2204_vm2, %v6992_v23  ;;  %v2004_v55 = vrot.slane %v6992_v23, 1  ;;  %v2005_v27 = vrot.slane %v6996_v33, 1  ;;  %v2001_v25 = vrot.slane %v6990_v7, 1  ;;  %v2002_v31 = vrot.slane %v6994_v29, 1  ;;  %v5305_v26 = vld [vmem:[%s7919_s2 + $0x1f0] ss:$8 sps:$4 sm:$0xff]  }
 0x1f3   : > { %2495 = vmatmul.mubr.bf16.gmra.mxu0 %v6990_v7  ;;  %2755 = vmatprep.subr.bf16.mxu1 %v5295_v28  ;;  %v1860_v14 = vmax.f32 %v6767_v48, %v1769_v39  ;;  %v1861_v18 = vmax.f32 %v6777_v24, %v1842_v4  ;;  %v5310_v48 = vld [vmem:[%s7919_s2 + $0x2d4] ss:$8 sps:$4 sm:$0xff]   ;;  %v3157_v20 = vrot.slane %v6992_v23, 4  ;;  %v3158_v3 = vrot.slane %v6996_v33, 4 }
 0x1f4   : > { %v1814_v19 = vpop.permute.xlu0 %1813  ;;  %v1743_v1 = vpop.permute.xlu1 %1742  ;;  %v2006_v54 = vsel %vm1585_vm14, %v2004_v55, %v2005_v27  ;;  %3069 = vmatpush1.bf16.msra.mxu0 %v5296_v56  ;;  %v2003_v44 = vsel %vm1585_vm14, %v2001_v25, %v2002_v31  ;;  %v5307_v24 = vld [vmem:[%s7919_s2 + $0x1f4] ss:$8 sps:$4 sm:$0xff]   ;;  %v3154_v58 = vrot.slane %v6990_v7, 4  ;;  %v3155_v43 = vrot.slane %v6994_v29, 4  ;;  %v5322_v25 = vld [vmem:[%s7919_s2 + $0x3a4] ss:$8 sps:$4 sm:$0xff]  }
 0x1f5   : > { %4715 = vmatprep.mubr.msk.bf16.mxu1 %vm2204_vm2, %v2006_v54  ;;  %3070 = vmatprep.subr.bf16.mxu0 %v5304_v53  ;;  %v1896_v37 = vadd.f32 %v6868_v34, %v1860_v14  ;;  %v1897_v22 = vadd.f32 %v6873_v9, %v1861_v18  ;;  %v7053_v57 = vsel %vm3147_vm3, %v3157_v20, %v3158_v3 }
 0x1f6   : > { %2756 = vmatpush1.bf16.msra.mxu1 %v5293_v0  ;;  %v7061_v28 = vsel %vm3147_vm3, %v3154_v58, %v3155_v43 }
 0x1f7   : > { %2260 = vmatmul.mubr.bf16.gmra.mxu1 %v2003_v44  ;;  %2757 = vmatprep.subr.bf16.mxu1 %v5301_v8  ;;  %v1920_v4 = vmax.f32 %v1896_v37, 0.0  ;;  %v1921_v0 = vmax.f32 %v1897_v22, 0.0  ;;  %v5317_v37 = vld [vmem:[%s7919_s2 + $0x2c0] ss:$8 sps:$4 sm:$0xff]  }
 0x1f8   : > { %v1747_v36 = vpop.permute.xlu0 %1746  ;;  %v1745_v63 = vpop.permute.xlu1 %1744  ;;  %3071 = vmatpush1.bf16.msra.mxu0 %v5302_v11 }
 0x1f9   : > { %v1770_v61 = vsel %vm1762_vm15, %v1743_v1, %v1745_v63  ;;  %v1843_v5 = vsel %vm1835_vm1, %v1745_v63, %v1814_v19  ;;  %3072 = vmatprep.subr.bf16.mxu0 %v5310_v48  ;;  %v5311_v1 = vld [vmem:[%s7919_s2 + $0x1e0] ss:$8 sps:$4 sm:$0xff]   ;;  %v5325_v63 = vld [vmem:[%s7919_s2 + $0x2b4] ss:$8 sps:$4 sm:$0xff]  }
 0x1fa   : > { %v1862_v62 = vmax.f32 %v6785_v13, %v1770_v61  ;;  %v1863_v51 = vmax.f32 %v6795_v17, %v1843_v5  ;;  %2758 = vmatpush1.bf16.msra.mxu1 %v5299_v45  ;;  %v5314_v17 = vld [vmem:[%s7919_s2 + $0x3b0] ss:$8 sps:$4 sm:$0xff]   ;;  %v5320_v48 = vld [vmem:[%s7919_s2 + $0x3a0] ss:$8 sps:$4 sm:$0xff]   ;;  %v5334_v5 = vld [vmem:[%s7919_s2 + $0x384] ss:$8 sps:$4 sm:$0xff]  }
 0x1fb   : > { %2759 = vmatprep.subr.bf16.mxu1 %v5307_v24  ;;  %v5328_v24 = vld [vmem:[%s7919_s2 + $0x394] ss:$8 sps:$4 sm:$0xff]  }
 0x1fc   : > { %v1898_v56 = vadd.f32 %v6868_v34, %v1862_v62  ;;  %v1899_v39 = vadd.f32 %v6873_v9, %v1863_v51  ;;  %v1749_v13 = vpop.permute.xlu0 %1748  ;;  %v1751_v53 = vpop.permute.xlu1 %1750  ;;  %3073 = vmatpush1.bf16.msra.mxu0 %v5308_v40 }
 0x1fd   : > { %v1771_v55 = vsel %vm1762_vm15, %v1747_v36, %v1749_v13  ;;  %v1844_v27 = vsel %vm1835_vm1, %v1749_v13, %v6998_v41  ;;  %3076 = vmatprep.subr.bf16.mxu0 %v5316_v10  ;;  %v5319_v41 = vld [vmem:[%s7919_s2 + $0x2c4] ss:$8 sps:$4 sm:$0xff]   ;;  %v5323_v10 = vld [vmem:[%s7919_s2 + $0x2b0] ss:$8 sps:$4 sm:$0xff]  }
 0x1fe   : > { %v1922_v31 = vmax.f32 %v1898_v56, 0.0  ;;  %v1923_v8 = vmax.f32 %v1899_v39, 0.0  ;;  %v1864_v14 = vmax.f32 %v6783_v16, %v1771_v55  ;;  %v1865_v19 = vmax.f32 %v6789_v49, %v1844_v27  ;;  %2760 = vmatpush1.bf16.msra.mxu1 %v5305_v26  ;;  %v5331_v13 = vld [vmem:[%s7919_s2 + $0x2a4] ss:$8 sps:$4 sm:$0xff]   ;;  %v5332_v55 = vld [vmem:[%s7919_s2 + $0x380] ss:$8 sps:$4 sm:$0xff]  }
 0x1ff   : > { %2761 = vmatprep.subr.bf16.mxu1 %v5313_v42 }
 0x200   : > { %v7085_v54 = vpack.c.bf16 %v1922_v31, %v1920_v4  ;;  %v7087_v11 = vpack.c.bf16 %v1923_v8, %v1921_v0  ;;  %v1900_v18 = vadd.f32 %v6868_v34, %v1864_v14  ;;  %v1901_v16 = vadd.f32 %v6873_v9, %v1865_v19  ;;  %v1818_v44 = vpop.permute.xlu0 %1817  ;;  %v1753_v49 = vpop.permute.xlu1 %1752  ;;  %3077 = vmatpush2.bf16.msra.mxu0 %v5314_v17  ;;  %v5340_v8 = vld [vmem:[%s7919_s2 + $0x374] ss:$8 sps:$4 sm:$0xff]  }
 0x201   : > { %v1845_v45 = vsel %vm1835_vm1, %v1753_v49, %v1818_v44  ;;  %3078 = vmatprep.subr.bf16.mxu0 %v5322_v25  ;;  %v1772_v43 = vsel %vm1762_vm15, %v1751_v53, %v1753_v49 }
 0x202   : > { %v1924_v20 = vmax.f32 %v1900_v18, 0.0  ;;  %v1925_v3 = vmax.f32 %v1901_v16, 0.0  ;;  %2762 = vmatpush1.bf16.msra.mxu1 %v5311_v1  ;;  %4750 = vmatprep.mubr.msk.bf16.mxu0 %vm2204_vm2, %v7087_v11  ;;  %v1867_v36 = vmax.f32 %v6811_v50, %v1845_v45  ;;  %v5326_v50 = vld [vmem:[%s7919_s2 + $0x390] ss:$8 sps:$4 sm:$0xff]   ;;  %v2010_v62 = vrot.slane %v7087_v11, 1 }
 0x203   : > { %2505 = vmatmul.mubr.bf16.gmra.mxu0 %v7085_v54  ;;  %2765 = vmatprep.subr.bf16.mxu1 %v5319_v41  ;;  %v2007_v26 = vrot.slane %v7085_v54, 1  ;;  %v1866_v56 = vmax.f32 %v6804_v47, %v1772_v43  ;;  %v3163_v14 = vrot.slane %v7087_v11, 4  ;;  %v3160_v19 = vrot.slane %v7085_v54, 4  ;;  %v5329_v18 = vld [vmem:[%s7919_s2 + $0x2a0] ss:$8 sps:$4 sm:$0xff]  }
 0x204   : > { %v7108_v40 = vpack.c.bf16 %v1924_v20, %v1924_v20  ;;  %v7110_v58 = vpack.c.bf16 %v1925_v3, %v1925_v3  ;;  %v1822_v22 = vpop.permute.xlu0 %1821  ;;  %v1820_v61 = vpop.permute.xlu1 %1819  ;;  %3079 = vmatpush2.bf16.msra.mxu0 %v5320_v48  ;;  %v1903_v39 = vadd.f32 %v6873_v9, %v1867_v36  ;;  %v5337_v16 = vld [vmem:[%s7919_s2 + $0x294] ss:$8 sps:$4 sm:$0xff]  }
 0x205   : > { %3080 = vmatprep.subr.bf16.mxu0 %v5328_v24  ;;  %v5338_v24 = vld [vmem:[%s7919_s2 + $0x370] ss:$8 sps:$4 sm:$0xff]   ;;  %v1902_v20 = vadd.f32 %v6868_v34, %v1866_v56  ;;  %v2841_v56 = vrot.slane %v6893_v15, 3 }
 0x206   : > { %2766 = vmatpush2.bf16.msra.mxu1 %v5317_v37  ;;  %v2011_v51 = vrot.slane %v7110_v58, 1  ;;  %v2008_v42 = vrot.slane %v7108_v40, 1  ;;  %v3164_v47 = vrot.slane %v7110_v58, 4  ;;  %v3161_v27 = vrot.slane %v7108_v40, 4 }
 0x207   : > { %2767 = vmatprep.subr.bf16.mxu1 %v5325_v63  ;;  %v1927_v3 = vmax.f32 %v1903_v39, 0.0  ;;  %v5346_v63 = vld [vmem:[%s7919_s2 + $0x364] ss:$8 sps:$4 sm:$0xff]   ;;  %v5352_v39 = vld [vmem:[%s7919_s2 + $0x354] ss:$8 sps:$4 sm:$0xff]  }
 0x208   : > { %v1757_v53 = vpop.permute.xlu0 %1756  ;;  %v1761_v17 = vpop.permute.xlu1 %1760  ;;  %v2012_v4 = vsel %vm1585_vm14, %v2010_v62, %v2011_v51  ;;  %v2009_v0 = vsel %vm1585_vm14, %v2007_v26, %v2008_v42  ;;  %3081 = vmatpush2.bf16.msra.mxu0 %v5326_v50  ;;  %v7155_v44 = vsel %vm3147_vm3, %v3163_v14, %v3164_v47  ;;  %v7158_v49 = vsel %vm3147_vm3, %v3160_v19, %v3161_v27  ;;  %v5335_v50 = vld [vmem:[%s7919_s2 + $0x290] ss:$8 sps:$4 sm:$0xff]  }
 0x209   : > { %v1846_v25 = vsel %vm1835_vm1, %v1757_v53, %v1820_v61  ;;  %v1847_v31 = vsel %vm1835_vm1, %v1761_v17, %v1822_v22  ;;  %4716 = vmatprep.mubr.msk.bf16.mxu1 %vm2204_vm2, %v2012_v4  ;;  %3082 = vmatprep.subr.bf16.mxu0 %v5334_v5  ;;  %v5343_v5 = vld [vmem:[%s7919_s2 + $0x284] ss:$8 sps:$4 sm:$0xff]   ;;  %v1926_v26 = vmax.f32 %v1902_v20, 0.0  ;;  %v2840_v42 = vrot.slane %v6891_v6, 3 }
 0x20a   : > { %v1869_v1 = vmax.f32 %v6827_v38, %v1846_v25  ;;  %v1871_v41 = vmax.f32 %v6821_v60, %v1847_v31  ;;  %2768 = vmatpush2.bf16.msra.mxu1 %v5323_v10  ;;  %v5350_v25 = vld [vmem:[%s7919_s2 + $0x350] ss:$8 sps:$4 sm:$0xff]   ;;  %v2530_v14 = vrot.slane %v6893_v15, 2  ;;  %v7995_v20 = vmov 0  }
 0x20b   : > { %2270 = vmatmul.mubr.bf16.gmra.mxu1 %v2009_v0  ;;  %2769 = vmatprep.subr.bf16.mxu1 %v5331_v13  ;;  %v5349_v0 = vld [vmem:[%s7919_s2 + $0x274] ss:$8 sps:$4 sm:$0xff]  }
 0x20c   : > { %v1905_v38 = vadd.f32 %v6873_v9, %v1869_v1  ;;  %v1907_v60 = vadd.f32 %v6873_v9, %v1871_v41  ;;  %v1755_v48 = vpop.permute.xlu0 %1754  ;;  %v1759_v45 = vpop.permute.xlu1 %1758  ;;  %3083 = vmatpush2.bf16.msra.mxu0 %v5332_v55  ;;  %v2842_v1 = vsel %vm2836_vm4, %v2840_v42, %v2841_v56  ;;  %v5347_v41 = vld [vmem:[%s7919_s2 + $0x270] ss:$8 sps:$4 sm:$0xff]   ;;  %v2844_v42 = vrot.slane %v6994_v29, 3 }
 0x20d   : > { %v1773_v37 = vsel %vm1762_vm15, %v1755_v48, %v1757_v53  ;;  %v1774_v36 = vsel %vm1762_vm15, %v1759_v45, %v1761_v17  ;;  %3084 = vmatprep.subr.bf16.mxu0 %v5340_v8  ;;  %v2529_v8 = vrot.slane %v6891_v6, 2  ;;  %v5355_v6 = vld [vmem:[%s7919_s2 + $0x264] ss:$8 sps:$4 sm:$0xff]   ;;  %v2853_v56 = vrot.slane %v7110_v58, 3 }
 0x20e   : > { %v1929_v9 = vmax.f32 %v1905_v38, 0.0  ;;  %v1931_v43 = vmax.f32 %v1907_v60, 0.0  ;;  %v1868_v22 = vmax.f32 %v6817_v21, %v1773_v37  ;;  %v1870_v61 = vmax.f32 %v6815_v35, %v1774_v36  ;;  %2770 = vmatpush2.bf16.msra.mxu1 %v5329_v18  ;;  %v5344_v35 = vld [vmem:[%s7919_s2 + $0x360] ss:$8 sps:$4 sm:$0xff]  }
 0x20f   : > { %2771 = vmatprep.subr.bf16.mxu1 %v5337_v16  ;;  %v2531_v45 = vsel %vm605_vm0, %v2529_v8, %v2530_v14  ;;  %v2846_v37 = vrot.slane %v6992_v23, 3  ;;  %v2847_v36 = vrot.slane %v6996_v33, 3  ;;  %v5365_v8 = vld [vmem:[%s7919_s2 + $0x400] ss:$8 sps:$4 sm:$0xff]  }
 0x210   : > { %v7179_v10 = vpack.c.bf16 %v1929_v9, %v1927_v3  ;;  %v7181_v62 = vpack.c.bf16 %v1931_v43, %v1931_v43  ;;  %v1904_v51 = vadd.f32 %v6868_v34, %v1868_v22  ;;  %v1906_v21 = vadd.f32 %v6868_v34, %v1870_v61  ;;  %3085 = vmatpush2.bf16.msra.mxu0 %v5338_v24  ;;  %v5341_v34 = vld [vmem:[%s7919_s2 + $0x280] ss:$8 sps:$4 sm:$0xff]   ;;  %v5358_v43 = vld [vmem:[%s7919_s2 + $0x434] ss:$8 sps:$4 sm:$0xff]  }
 0x211   : > { %3086 = vmatprep.subr.bf16.mxu0 %v5346_v63  ;;  %v2838_v24 = vrot.slane %v6907_v46, 3  ;;  %v5353_v3 = vld [vmem:[%s7919_s2 + $0x260] ss:$8 sps:$4 sm:$0xff]   ;;  %v2837_v9 = vrot.slane %v6889_v12, 3  ;;  %v2527_v22 = vrot.slane %v6907_v46, 2 }
 0x212   : > { %v1928_v13 = vmax.f32 %v1904_v51, 0.0  ;;  %v1930_v53 = vmax.f32 %v1906_v21, 0.0  ;;  %2772 = vmatpush2.bf16.msra.mxu1 %v5335_v50  ;;  %4751 = vmatprep.mubr.msk.bf16.mxu0 %vm2204_vm2, %v7179_v10  ;;  %v2016_v17 = vrot.slane %v7179_v10, 1  ;;  %v2017_v4 = vrot.slane %v7181_v62, 1  ;;  %v5356_v21 = vld [vmem:[%s7919_s2 + $0x430] ss:$8 sps:$4 sm:$0xff]  }
 0x213   : > { %2773 = vmatprep.subr.bf16.mxu1 %v5343_v5  ;;  %v3169_v31 = vrot.slane %v7179_v10, 4  ;;  %v3170_v19 = vrot.slane %v7181_v62, 4  ;;  %v2839_v61 = vsel %vm2836_vm4, %v2837_v9, %v2838_v24  ;;  %v2535_v50 = vrot.slane %v6992_v23, 2  ;;  %v5361_v46 = vld [vmem:[%s7919_s2 + $0x424] ss:$8 sps:$4 sm:$0xff]  }
 0x214   : > { %v7203_v55 = vpack.c.bf16 %v1928_v13, %v1926_v26  ;;  %v7205_v47 = vpack.c.bf16 %v1930_v53, %v1930_v53  ;;  %v2018_v27 = vsel %vm1585_vm14, %v2016_v17, %v2017_v4  ;;  %3087 = vmatpush2.bf16.msra.mxu0 %v5344_v35  ;;  %v2536_v5 = vrot.slane %v6996_v33, 2 }
 0x215   : > { %4717 = vmatprep.mubr.msk.bf16.mxu1 %vm2204_vm2, %v2018_v27  ;;  %3088 = vmatprep.subr.bf16.mxu0 %v5352_v39  ;;  %v7228_v15 = vsel %vm3147_vm3, %v3169_v31, %v3170_v19  ;;  %v2848_v51 = vsel %vm2836_vm4, %v2846_v37, %v2847_v36  ;;  %v2526_v35 = vrot.slane %v6889_v12, 2  ;;  %v2843_v26 = vrot.slane %v6990_v7, 3  ;;  %v5359_v12 = vld [vmem:[%s7919_s2 + $0x420] ss:$8 sps:$4 sm:$0xff]   ;;  %v5364_v39 = vld [vmem:[%s7919_s2 + $0x414] ss:$8 sps:$4 sm:$0xff]  }
 0x216   : > { %2774 = vmatpush2.bf16.msra.mxu1 %v5341_v34  ;;  %2515 = vmatmul.mubr.bf16.gmra.mxu0 %v7203_v55  ;;  %v2013_v18 = vrot.slane %v7203_v55, 1  ;;  %v2014_v16 = vrot.slane %v7205_v47, 1  ;;  %v3166_v38 = vrot.slane %v7203_v55, 4  ;;  %v3167_v48 = vrot.slane %v7205_v47, 4  ;;  %v5362_v27 = vld [vmem:[%s7919_s2 + $0x410] ss:$8 sps:$4 sm:$0xff]  }
 0x217   : > { %4876 = vmatprep.mubr.msk.bf16.mxu0 %vm2204_vm2, %v2842_v1  ;;  %2775 = vmatprep.subr.bf16.mxu1 %v5349_v0  ;;  %v2528_v23 = vsel %vm605_vm0, %v2526_v35, %v2527_v22  ;;  %v2537_v33 = vsel %vm605_vm0, %v2535_v50, %v2536_v5  ;;  %v2852_v13 = vrot.slane %v7087_v11, 3  ;;  %v2532_v53 = vrot.slane %v6990_v7, 2  ;;  %v5367_v7 = vld [vmem:[%s7919_s2 + $0x404] ss:$8 sps:$4 sm:$0xff]   ;;  %v5370_v1 = vld [vmem:[%s7919_s2 + $0x3f4] ss:$8 sps:$4 sm:$0xff]  }
 0x218   : > { %v2015_v60 = vsel %vm1585_vm14, %v2013_v18, %v2014_v16  ;;  %3089 = vmatpush2.bf16.msra.mxu0 %v5350_v25  ;;  %v7243_v63 = vsel %vm3147_vm3, %v3166_v38, %v3167_v48  ;;  %v2533_v34 = vrot.slane %v6994_v29, 2  ;;  %v2845_v17 = vsel %vm2836_vm4, %v2843_v26, %v2844_v42  ;;  %v5379_v22 = vld [vmem:[%s7919_s2 + $0x3c4] ss:$8 sps:$4 sm:$0xff]   ;;  %v5380_v50 = vld [vmem:[%s7919_s2 + $0x4a0] ss:$8 sps:$4 sm:$0xff]  }
 0x219   : > { %2280 = vmatmul.mubr.bf16.gmra.mxu1 %v2015_v60  ;;  %3861 = vmatprep.subr.bf16.mxu0 %v7995_v20  ;;  %v2542_v4 = vrot.slane %v7110_v58, 2  ;;  %v2854_v0 = vsel %vm2836_vm4, %v2852_v13, %v2853_v56  ;;  %v2541_v25 = vrot.slane %v7087_v11, 2  ;;  %v2850_v31 = vrot.slane %v7108_v40, 3  ;;  %v5368_v60 = vld [vmem:[%s7919_s2 + $0x3f0] ss:$8 sps:$4 sm:$0xff]  }
 0x21a   : > { %2776 = vmatpush2.bf16.msra.mxu1 %v5347_v41  ;;  %4812 = vmatprep.mubr.msk.bf16.mxu1 %vm2204_vm2, %v2531_v45  ;;  %v2534_v29 = vsel %vm605_vm0, %v2532_v53, %v2533_v34  ;;  %v2858_v11 = vrot.slane %v7179_v10, 3  ;;  %v2859_v14 = vrot.slane %v7181_v62, 3  ;;  %v2849_v19 = vrot.slane %v7085_v54, 3  ;;  %v5385_v5 = vld [vmem:[%s7919_s2 + $0x494] ss:$8 sps:$4 sm:$0xff]  }
 0x21b   : > { %2777 = vmatprep.subr.bf16.mxu1 %v5355_v6  ;;  %v2543_v58 = vsel %vm605_vm0, %v2541_v25, %v2542_v4  ;;  %v2539_v41 = vrot.slane %v7108_v40, 2  ;;  %v2547_v16 = vrot.slane %v7179_v10, 2  ;;  %v2548_v6 = vrot.slane %v7181_v62, 2  ;;  %v5373_v40 = vld [vmem:[%s7919_s2 + $0x3e4] ss:$8 sps:$4 sm:$0xff]  }
 0x21c   : > { %v2851_v18 = vsel %vm2836_vm4, %v2849_v19, %v2850_v31  ;;  %v2860_v38 = vsel %vm2836_vm4, %v2858_v11, %v2859_v14  ;;  %v2538_v48 = vrot.slane %v7085_v54, 2  ;;  %v2855_v45 = vrot.slane %v7203_v55, 3  ;;  %v5371_v54 = vld [vmem:[%s7919_s2 + $0x3e0] ss:$8 sps:$4 sm:$0xff]   ;;  %v5391_v35 = vld [vmem:[%s7919_s2 + $0x474] ss:$8 sps:$4 sm:$0xff]  }
 0x21d   : > { %v2549_v62 = vsel %vm605_vm0, %v2547_v16, %v2548_v6  ;;  %v2856_v24 = vrot.slane %v7205_v47, 3  ;;  %v2544_v37 = vrot.slane %v7203_v55, 2  ;;  %v2545_v36 = vrot.slane %v7205_v47, 2  ;;  %v5377_v55 = vld [vmem:[%s7919_s2 + $0x3c0] ss:$8 sps:$4 sm:$0xff]  }
 0x21e   : > { %2778 = vmatpush2.bf16.msra.mxu1 %v5353_v3  ;;  %3091 = vmatmul.mubr.bf16.vlgmr.msra.gmra.mxu0 %v2839_v61  ;;  %v2540_v10 = vsel %vm605_vm0, %v2538_v48, %v2539_v41  ;;  %v5376_v3 = vld [vmem:[%s7919_s2 + $0x3d4] ss:$8 sps:$4 sm:$0xff]   ;;  %v5382_v47 = vld [vmem:[%s7919_s2 + $0x4a4] ss:$8 sps:$4 sm:$0xff]   ;;  %v5395_v42 = vld [vmem:[%s7919_s2 + $0x450] ss:$8 sps:$4 sm:$0xff]  }
 0x21f   : > { %4877 = vmatprep.mubr.msk.bf16.mxu0 %vm2204_vm2, %v2848_v51  ;;  %3369 = vmatprep.subr.bf16.mxu1 %v5358_v43  ;;  %v2857_v9 = vsel %vm2836_vm4, %v2855_v45, %v2856_v24  ;;  %v5374_v43 = vld [vmem:[%s7919_s2 + $0x3d0] ss:$8 sps:$4 sm:$0xff]   ;;  %v2546_v61 = vsel %vm605_vm0, %v2544_v37, %v2545_v36  ;;  %v5388_v51 = vld [vmem:[%s7919_s2 + $0x484] ss:$8 sps:$4 sm:$0xff]   ;;  %v5397_v26 = vld [vmem:[%s7919_s2 + $0x454] ss:$8 sps:$4 sm:$0xff]  }
 0x220   : > { %v5398_v56 = vld [vmem:[%s7919_s2 + $0x440] ss:$8 sps:$4 sm:$0xff]   ;;  %vm4444_vm14 = vcmask 73728  }
 0x221   : > { %2780 = vmatmul.mubr.bf16.vlgmr.msra.gmra.mxu1 %v2528_v23  ;;  %v5394_v23 = vld [vmem:[%s7919_s2 + $0x464] ss:$8 sps:$4 sm:$0xff]  }
 0x222   : > { %3370 = vmatpush1.bf16.msra.mxu1 %v5356_v21  ;;  %4813 = vmatprep.mubr.msk.bf16.mxu1 %vm2204_vm2, %v2537_v33  ;;  %v5386_v21 = vld [vmem:[%s7919_s2 + $0x480] ss:$8 sps:$4 sm:$0xff]  }
 0x223   : > { %3371 = vmatprep.subr.bf16.mxu1 %v5361_v46  ;;  %v5389_v46 = vld [vmem:[%s7919_s2 + $0x470] ss:$8 sps:$4 sm:$0xff]   ;;  %v5392_v33 = vld [vmem:[%s7919_s2 + $0x460] ss:$8 sps:$4 sm:$0xff]  }
 0x226   : > { %3372 = vmatpush1.bf16.msra.mxu1 %v5359_v12  ;;  %3101 = vmatmul.mubr.bf16.gmra.mxu0 %v2845_v17  ;;  %v5400_v12 = vld [vmem:[%s7919_s2 + $0x444] ss:$8 sps:$4 sm:$0xff]  }
 0x227   : > { %4878 = vmatprep.mubr.msk.bf16.mxu0 %vm2204_vm2, %v2854_v0  ;;  %3373 = vmatprep.subr.bf16.mxu1 %v5364_v39 }
 0x229   : > { %2790 = vmatmul.mubr.bf16.gmra.mxu1 %v2534_v29 }
 0x22a   : > { %3374 = vmatpush1.bf16.msra.mxu1 %v5362_v27  ;;  %4814 = vmatprep.mubr.msk.bf16.mxu1 %vm2204_vm2, %v2543_v58 }
 0x22b   : > { %3375 = vmatprep.subr.bf16.mxu1 %v5367_v7 }
 0x22e   : > { %3376 = vmatpush1.bf16.msra.mxu1 %v5365_v8  ;;  %3111 = vmatmul.mubr.bf16.gmra.mxu0 %v2851_v18 }
 0x22f   : > { %4879 = vmatprep.mubr.msk.bf16.mxu0 %vm2204_vm2, %v2860_v38  ;;  %3377 = vmatprep.subr.bf16.mxu1 %v5370_v1 }
 0x231   : > { %2800 = vmatmul.mubr.bf16.gmra.mxu1 %v2540_v10 }
 0x232   : > { %3378 = vmatpush1.bf16.msra.mxu1 %v5368_v60  ;;  %4815 = vmatprep.mubr.msk.bf16.mxu1 %vm2204_vm2, %v2549_v62 }
 0x233   : > { %3379 = vmatprep.subr.bf16.mxu1 %v5373_v40 }
 0x236   : > { %3380 = vmatpush1.bf16.msra.mxu1 %v5371_v54  ;;  %3121 = vmatmul.mubr.bf16.gmra.mxu0 %v2857_v9 }
 0x237   : > { %3381 = vmatprep.subr.bf16.mxu1 %v5376_v3 }
 0x239   : > { %2810 = vmatmul.mubr.bf16.gmra.mxu1 %v2546_v61 }
 0x23a   : > { %3382 = vmatpush1.bf16.msra.mxu1 %v5374_v43  ;;  %4940 = vmatprep.mubr.msk.bf16.mxu1 %vm2204_vm2, %v6944_v59  ;;  %v5383_v59 = vld [vmem:[%s7919_s2 + $0x490] ss:$8 sps:$4 sm:$0xff]  }
 0x23b   : > { %3383 = vmatprep.subr.bf16.mxu1 %v5379_v22 }
 0x23e   : > { %3384 = vmatpush1.bf16.msra.mxu1 %v5377_v55 }
 0x23f   : > { %3387 = vmatprep.subr.bf16.mxu1 %v5382_v47 }
 0x242   : > { %3388 = vmatpush2.bf16.msra.mxu1 %v5380_v50 }
 0x243   : > { %3389 = vmatprep.subr.bf16.mxu1 %v5385_v5 }
 0x246   : > { %3390 = vmatpush2.bf16.msra.mxu1 %v5383_v59 }
 0x247   : > { %3391 = vmatprep.subr.bf16.mxu1 %v5388_v51 }
 0x24a   : > { %3392 = vmatpush2.bf16.msra.mxu1 %v5386_v21 }
 0x24b   : > { %3393 = vmatprep.subr.bf16.mxu1 %v5391_v35 }
 0x24e   : > { %3394 = vmatpush2.bf16.msra.mxu1 %v5389_v46 }
 0x24f   : > { %3395 = vmatprep.subr.bf16.mxu1 %v5394_v23 }
 0x252   : > { %3396 = vmatpush2.bf16.msra.mxu1 %v5392_v33 }
 0x253   : > { %3397 = vmatprep.subr.bf16.mxu1 %v5397_v26 }
 0x256   : > { %3398 = vmatpush2.bf16.msra.mxu1 %v5395_v42 }
 0x257   : > { %3399 = vmatprep.subr.bf16.mxu1 %v5400_v12 }
 0x25a   : > { %3400 = vmatpush2.bf16.msra.mxu1 %v5398_v56 }
 0x25b   : > { %3979 = vmatprep.subr.bf16.mxu1 %v7995_v20 }
 0x25d   : > { %3402 = vmatmul.mubr.bf16.vlgmr.msra.gmra.mxu1 %v6950_v30 }
 0x25e   : > { %4941 = vmatprep.mubr.msk.bf16.mxu1 %vm2204_vm2, %v7053_v57 }
 0x265   : > { %3412 = vmatmul.mubr.bf16.gmra.mxu1 %v7061_v28 }
 0x266   : > { %4942 = vmatprep.mubr.msk.bf16.mxu1 %vm2204_vm2, %v7155_v44 }
 0x26d   : > { %3422 = vmatmul.mubr.bf16.gmra.mxu1 %v7158_v49 }
 0x26e   : > { %4943 = vmatprep.mubr.msk.bf16.mxu1 %vm2204_vm2, %v7228_v15 }
 0x275   : > { %3432 = vmatmul.mubr.bf16.gmra.mxu1 %v7243_v63 }
 0x29f   : > { %v2486_v57 = vpop.f32.mrf.mxu0 }
 0x2a1   : > { %v2488_v4 = vpop.f32.mrf.mxu0 }
 0x2a3   : > { %v2490_v49 = vpop.f32.mrf.mxu0 }
 0x2a5   : > { %v2251_v39 = vpop.f32.mrf.mxu1  ;;  %v2492_v15 = vpop.f32.mrf.mxu0 }
 0x2a6   : > { %v2487_v23 = vadd.f32 %v2486_v57, %v2251_v39 }
 0x2a7   : > { %v2253_v13 = vpop.f32.mrf.mxu1 }
 0x2a8   : > { %v2489_v26 = vadd.f32 %v2488_v4, %v2253_v13 }
 0x2a9   : > { %v2255_v53 = vpop.f32.mrf.mxu1 }
 0x2aa   : > { %v2491_v42 = vadd.f32 %v2490_v49, %v2255_v53 }
 0x2ab   : > { %v2257_v34 = vpop.f32.mrf.mxu1 }
 0x2ac   : > { %v2493_v2 = vadd.f32 %v2492_v15, %v2257_v34 }
 0x2b3   : > { %v2496_v63 = vpop.f32.mrf.mxu0 }
 0x2b5   : > { %v2498_v7 = vpop.f32.mrf.mxu0 }
 0x2b7   : > { %v7393_v30 = vpop.f32.mrf.mxu1  ;;  %v2500_v58 = vpop.f32.mrf.mxu0 }
 0x2b8   : > { %v2497_v39 = vadd.f32 %v2496_v63, %v7393_v30 }
 0x2b9   : > { %v7395_v17 = vpop.f32.mrf.mxu1  ;;  %v2502_v11 = vpop.f32.mrf.mxu0 }
 0x2ba   : > { %v2499_v13 = vadd.f32 %v2498_v7, %v7395_v17 }
 0x2bb   : > { %v7397_v28 = vpop.f32.mrf.mxu1 }
 0x2bc   : > { %v2501_v34 = vadd.f32 %v2500_v58, %v7397_v28 }
 0x2bd   : > { %v7399_v44 = vpop.f32.mrf.mxu1 }
 0x2c3   : > { %v7415_v19 = vpop.f32.mrf.mxu0 }
 0x2c5   : > { %v2508_v18 = vpop.f32.mrf.mxu0 }
 0x2c7   : > { %v7419_v6 = vpop.f32.mrf.mxu0 }
 0x2c9   : > { %v7421_v60 = vpop.f32.mrf.mxu0 }
 0x2cb   : > { %v7401_v0 = vpop.f32.mrf.mxu1 }
 0x2cc   : > { %v2507_v30 = vadd.f32 %v7415_v19, %v7401_v0 }
 0x2cd   : > { %v7403_v27 = vpop.f32.mrf.mxu1 }
 0x2ce   : > { %v2509_v17 = vadd.f32 %v2508_v18, %v7403_v27 }
 0x2cf   : > { %v7405_v25 = vpop.f32.mrf.mxu1 }
 0x2d1   : > { %v7407_v29 = vpop.f32.mrf.mxu1 }
 0x2d6   : > { %v7423_v40 = vpop.f32.mrf.mxu0 }
 0x2d8   : > { %v7425_v62 = vpop.f32.mrf.mxu0 }
 0x2d9   : > { %v7409_v31 = vpop.f32.mrf.mxu1  ;;  %7998 = vst [vmem:[#allocation24_spill] sm:$0xff] %v7425_v62 }
 0x2da   : > { %v7427_v24 = vpop.f32.mrf.mxu0 }
 0x2db   : > { %v7411_v8 = vpop.f32.mrf.mxu1  ;;  %7999 = vst [vmem:[#allocation11_spill] sm:$0xff] %v7427_v24 }
 0x2dc   : > { %v7429_v3 = vpop.f32.mrf.mxu0 }
 0x2dd   : > { %v7413_v14 = vpop.f32.mrf.mxu1  ;;  %8000 = vst [vmem:[#allocation7_spill] sm:$0xff] %v7429_v3 }
 0x2de   : > { %7996 = vst [vmem:[#allocation10_spill] sm:$0xff] %v7413_v14  ;;  %v3092_v36 = vpop.f32.mrf.mxu0 }
 0x2df   : > { %v7417_v1 = vpop.f32.mrf.mxu1 }
 0x2e0   : > { %7997 = vst [vmem:[#allocation6_spill] sm:$0xff] %v7417_v1  ;;  %v3094_v43 = vpop.f32.mrf.mxu0 }
 0x2e1   : > { %v2781_v41 = vpop.f32.mrf.mxu1 }
 0x2e2   : > { %v3096_v61 = vpop.f32.mrf.mxu0  ;;  %v2820_v12 = vadd.f32 %v2781_v41, %v2487_v23  ;;  %v2503_v41 = vadd.f32 %v2502_v11, %v7399_v44  ;;  %v2511_v11 = vadd.f32 %v7419_v6, %v7405_v25 }
 0x2e3   : > { %v2783_v16 = vpop.f32.mrf.mxu1 }
 0x2e4   : > { %v3098_v47 = vpop.f32.mrf.mxu0  ;;  %v2821_v52 = vadd.f32 %v2783_v16, %v2489_v26  ;;  %v3131_v24 = vadd.f32 %v3092_v36, %v2820_v12 }
 0x2e5   : > { %v2785_v38 = vpop.f32.mrf.mxu1 }
 0x2e6   : > { %v3102_v5 = vpop.f32.mrf.mxu0  ;;  %v2822_v32 = vadd.f32 %v2785_v38, %v2491_v42  ;;  %v2517_v42 = vadd.f32 %v7423_v40, %v7409_v31 }
 0x2e7   : > { %v2787_v48 = vpop.f32.mrf.mxu1 }
 0x2e8   : > { %v3104_v51 = vpop.f32.mrf.mxu0  ;;  %v2823_v1 = vadd.f32 %v2787_v48, %v2493_v2  ;;  %v3133_v62 = vadd.f32 %v3096_v61, %v2822_v32 }
 0x2e9   : > { %v2791_v10 = vpop.f32.mrf.mxu1 }
 0x2ea   : > { %v3106_v35 = vpop.f32.mrf.mxu0  ;;  %v3134_v15 = vadd.f32 %v3098_v47, %v2823_v1  ;;  %v2824_v2 = vadd.f32 %v2791_v10, %v2497_v39 }
 0x2eb   : > { %v2793_v45 = vpop.f32.mrf.mxu1 }
 0x2ec   : > { %v3108_v33 = vpop.f32.mrf.mxu0  ;;  %v2825_v16 = vadd.f32 %v2793_v45, %v2499_v13 }
 0x2ed   : > { %v2795_v54 = vpop.f32.mrf.mxu1 }
 0x2ee   : > { %v7447_v20 = vpop.f32.mrf.mxu0  ;;  %v2826_v48 = vadd.f32 %v2795_v54, %v2501_v34  ;;  %v3136_v27 = vadd.f32 %v3104_v51, %v2825_v16 }
 0x2ef   : > { %v2797_v37 = vpop.f32.mrf.mxu1 }
 0x2f0   : > { %v7451_v53 = vpop.f32.mrf.mxu0  ;;  %v2827_v63 = vadd.f32 %v2797_v37, %v2503_v41  ;;  %v3137_v19 = vadd.f32 %v3106_v35, %v2826_v48  ;;  %v2513_v35 = vadd.f32 %v7421_v60, %v7407_v29  ;;  %v8003_v60 = vld [vmem:[#allocation24_spill] sm:$0xff]  ;;  %v8006_v48 = vld [vmem:[#allocation11_spill] sm:$0xff] }
 0x2f1   : > { %v7431_v9 = vpop.f32.mrf.mxu1  ;;  %v2519_v13 = vadd.f32 %v8003_v60, %v7411_v8 }
 0x2f2   : > { %v3116_v7 = vpop.f32.mrf.mxu0 }
 0x2f3   : > { %v7433_v22 = vpop.f32.mrf.mxu1 }
 0x2f5   : > { %v7435_v55 = vpop.f32.mrf.mxu1 }
 0x2f6   : > { %v2830_v51 = vadd.f32 %v7435_v55, %v2511_v11  ;;  %v5401_v11 = vld [vmem:[%s7920_s3 + $0x88] sm:$0xff]  }
 0x2f7   : > { %v7437_v50 = vpop.f32.mrf.mxu1  ;;  %3862 = vmatpush1.bf16.msra.mxu0 %v5401_v11  ;;  %v5415_v11 = vld [vmem:[%s7920_s3 + $0x50] sm:$0xff]  }
 0x2f8   : > { %v3141_v34 = vadd.f32 %v3116_v7, %v2830_v51 }
 0x2f9   : > { %v7439_v59 = vpop.f32.mrf.mxu1 }
 0x2fa   : > { %8001 = vst [vmem:[#allocation18_spill] sm:$0xff] %v7439_v59  ;;  %v3132_v59 = vadd.f32 %v3094_v43, %v2821_v52  ;;  %v2828_v43 = vadd.f32 %v7431_v9, %v2507_v30 }
 0x2fb   : > { %v7441_v21 = vpop.f32.mrf.mxu1 }
 0x2fc   : > { %8002 = vst [vmem:[#allocation19_spill] sm:$0xff] %v7441_v21  ;;  %v3139_v29 = vadd.f32 %v7447_v20, %v2828_v43 }
 0x2fd   : > { %v7443_v46 = vpop.f32.mrf.mxu1 }
 0x2ff   : > { %v7445_v56 = vpop.f32.mrf.mxu1 }
 0x31d   : > { %v3403_v3 = vpop.f32.mrf.mxu1 }
 0x31e   : > { %v3442_v21 = vadd.f32 %v3403_v3, %v3131_v24  ;;  %v3118_v3 = vpop.f32.mrf.mxu0 }
 0x31f   : > { %v3405_v14 = vpop.f32.mrf.mxu1 }
 0x320   : > { %v3443_v4 = vadd.f32 %v3405_v14, %v3132_v59  ;;  %v3474_v52 = vrot.slane %v3442_v21, 2  ;;  %v2829_v59 = vadd.f32 %v7433_v22, %v2509_v17  ;;  %v3122_v12 = vpop.f32.mrf.mxu0  ;;  %v2831_v22 = vadd.f32 %v7437_v50, %v2513_v35  ;;  %v8007_v17 = vld [vmem:[#allocation6_spill] sm:$0xff]  ;;  %v5403_v35 = vld [vmem:[%s7920_s3 + $0x80] sm:$0xff]  }
 0x321   : > { %v3407_v57 = vpop.f32.mrf.mxu1 }
 0x322   : > { %v3444_v49 = vadd.f32 %v3407_v57, %v3133_v62  ;;  %v3477_v58 = vrot.slane %v3443_v4, 2  ;;  %v3135_v62 = vadd.f32 %v3102_v5, %v2824_v2  ;;  %v3138_v5 = vadd.f32 %v3108_v33, %v2827_v63  ;;  %v3124_v41 = vpop.f32.mrf.mxu0  ;;  %v8004_v2 = vld [vmem:[#allocation18_spill] sm:$0xff]  ;;  %v8008_v63 = vld [vmem:[#allocation7_spill] sm:$0xff] }
 0x323   : > { %v3409_v38 = vpop.f32.mrf.mxu1  ;;  %v3140_v40 = vadd.f32 %v7451_v53, %v2829_v59  ;;  %v2832_v16 = vadd.f32 %v8004_v2, %v2517_v42  ;;  %v3142_v30 = vadd.f32 %v3118_v3, %v2831_v22  ;;  %v2523_v7 = vadd.f32 %v8008_v63, %v8007_v17  ;;  %v5409_v17 = vld [vmem:[%s7920_s3 + $0x68] sm:$0xff]   ;;  %v5410_v63 = vld [vmem:[%s7920_s3 + $0x18] sm:$0xff]  }
 0x324   : > { %v3475_v32 = vrot.slane %v3444_v49, 2  ;;  %v3445_v24 = vadd.f32 %v3409_v38, %v3134_v15  ;;  %v8005_v38 = vld [vmem:[#allocation10_spill] sm:$0xff] }
 0x325   : > { %v3413_v28 = vpop.f32.mrf.mxu1  ;;  %v2835_v3 = vadd.f32 %v7445_v56, %v2523_v7  ;;  %v5411_v7 = vld [vmem:[%s7920_s3 + $0x60] sm:$0xff]  }
 0x326   : > { %v3522_v14 = vsel %vm605_vm0, %v3475_v32, %v3474_v52  ;;  %v3478_v1 = vrot.slane %v3445_v24, 2  ;;  %v3476_v44 = vsel %vm605_vm0, %v3474_v52, %v3475_v32  ;;  %v3446_v36 = vadd.f32 %v3413_v28, %v3135_v62  ;;  %v8009_v28 = vld [vmem:[#allocation19_spill] sm:$0xff] }
 0x327   : > { %v7462_v10 = vmax.f32 %v3444_v49, %v3522_v14  ;;  %v3415_v45 = vpop.f32.mrf.mxu1  ;;  %v7464_v54 = vmax.f32 %v3442_v21, %v3476_v44  ;;  %v2521_v52 = vadd.f32 %v8006_v48, %v8005_v38  ;;  %v5402_v62 = vld [vmem:[%s7920_s3 + $0x38] sm:$0xff]   ;;  %v5407_v38 = vld [vmem:[%s7920_s3 + $0x70] sm:$0xff]   ;;  %v5408_v48 = vld [vmem:[%s7920_s3 + $0x20] sm:$0xff]  }
 0x328   : > { %v3523_v0 = vsel %vm605_vm0, %v3478_v1, %v3477_v58  ;;  %v3479_v18 = vsel %vm605_vm0, %v3477_v58, %v3478_v1  ;;  %v3447_v61 = vadd.f32 %v3415_v45, %v3136_v27  ;;  %v3480_v39 = vrot.slane %v3446_v36, 2  ;;  %3980 = vmatpush1.bf16.msra.mxu1 %v5402_v62  ;;  %v5416_v62 = vld [vmem:[%s7920_s3] sm:$0xff]  }
 0x329   : > { %v7468_v37 = vmax.f32 %v3445_v24, %v3523_v0  ;;  %3621 = vrot.lane.b32.xlu1 %v7462_v10, %s5514_s26  ;;  %3619 = vrot.lane.b32.xlu0 %v7464_v54, %s5514_s26  ;;  %v3417_v25 = vpop.f32.mrf.mxu1  ;;  %v7474_v6 = vmax.f32 %v3443_v4, %v3479_v18  ;;  %v2833_v58 = vadd.f32 %v8009_v28, %v2519_v13  ;;  %v3126_v18 = vpop.f32.mrf.mxu0  ;;  %v5412_v28 = vld [vmem:[%s7920_s3 + $0x10] sm:$0xff]  }
 0x32a   : > { %v3448_v47 = vadd.f32 %v3417_v25, %v3137_v19  ;;  %v3483_v55 = vrot.slane %v3447_v61, 2  ;;  %v2834_v45 = vadd.f32 %v7443_v46, %v2521_v52 }
 0x32b   : > { %v3419_v21 = vpop.f32.mrf.mxu1  ;;  %v3144_v59 = vadd.f32 %v3124_v41, %v2833_v58  ;;  %v5413_v58 = vld [vmem:[%s7920_s3 + $0x58] sm:$0xff]  }
 0x32c   : > { %v3481_v23 = vrot.slane %v3448_v47, 2  ;;  %v3449_v26 = vadd.f32 %v3419_v21, %v3138_v5  ;;  %v8010_v21 = vmov 0  }
 0x32d   : > { %3566 = vrot.lane.b32.xlu1 %v7462_v10, %s5515_s27  ;;  %3562 = vrot.lane.b32.xlu0 %v7464_v54, %s5515_s27  ;;  %v3423_v9 = vpop.f32.mrf.mxu1 }
 0x32e   : > { %v3484_v33 = vrot.slane %v3449_v26, 2  ;;  %v3524_v31 = vsel %vm605_vm0, %v3481_v23, %v3480_v39  ;;  %v3450_v49 = vadd.f32 %v3423_v9, %v3139_v29  ;;  %v3482_v15 = vsel %vm605_vm0, %v3480_v39, %v3481_v23  ;;  %3863 = vmatprep.subr.bf16.mxu0 %v8010_v21  ;;  %3981 = vmatprep.subr.bf16.mxu1 %v8010_v21  ;;  %v5404_v23 = vld [vmem:[%s7920_s3 + $0x30] sm:$0xff]   ;;  %v3128_v9 = vpop.f32.mrf.mxu0 }
 0x32f   : > { %v3425_v57 = vpop.f32.mrf.mxu1  ;;  %v7510_v14 = vmax.f32 %v3448_v47, %v3524_v31  ;;  %v7512_v44 = vmax.f32 %v3446_v36, %v3482_v15  ;;  %v3143_v36 = vadd.f32 %v3122_v12, %v2832_v16  ;;  %v3145_v12 = vadd.f32 %v3126_v18, %v2834_v45  ;;  %3864 = vmatpush1.bf16.msra.mxu0 %v5403_v35  ;;  %v5417_v45 = vld [vmem:[%s7920_s3 + $0x98] sm:$0xff]  }
 0x330   : > { %v3525_v4 = vsel %vm605_vm0, %v3484_v33, %v3483_v55  ;;  %v3485_v50 = vsel %vm605_vm0, %v3483_v55, %v3484_v33  ;;  %v3451_v32 = vadd.f32 %v3425_v57, %v3140_v40  ;;  %v3486_v0 = vrot.slane %v3450_v49, 2  ;;  %3982 = vmatpush1.bf16.msra.mxu1 %v5404_v23  ;;  %3865 = vmatprep.subr.bf16.mxu0 %v8010_v21  ;;  %v5405_v40 = vld [vmem:[%s7920_s3 + $0x78] sm:$0xff]   ;;  %v5406_v57 = vld [vmem:[%s7920_s3 + $0x28] sm:$0xff]  }
 0x331   : > { %v7497_v20 = vmax.f32 %v3449_v26, %v3525_v4  ;;  %3568 = vrot.lane.b32.xlu1 %v7468_v37, %s5515_s27  ;;  %3564 = vrot.lane.b32.xlu0 %v7474_v6, %s5515_s27  ;;  %v3427_v8 = vpop.f32.mrf.mxu1  ;;  %v7503_v53 = vmax.f32 %v3447_v61, %v3485_v50  ;;  %v3146_v13 = vadd.f32 %v3128_v9, %v2835_v3 }
 0x332   : > { %v3452_v24 = vadd.f32 %v3427_v8, %v3141_v34  ;;  %v3489_v43 = vrot.slane %v3451_v32, 2  ;;  %3983 = vmatprep.subr.bf16.mxu1 %v8010_v21 }
 0x333   : > { %v3429_v1 = vpop.f32.mrf.mxu1  ;;  %3866 = vmatpush1.bf16.msra.mxu0 %v5405_v40 }
 0x334   : > { %v3487_v27 = vrot.slane %v3452_v24, 2  ;;  %v3453_v19 = vadd.f32 %v3429_v1, %v3142_v30  ;;  %3984 = vmatpush1.bf16.msra.mxu1 %v5406_v57  ;;  %3867 = vmatprep.subr.bf16.mxu0 %v8010_v21  ;;  %v5414_v1 = vld [vmem:[%s7920_s3 + $0x8] sm:$0xff]  }
 0x335   : > { %3625 = vrot.lane.b32.xlu1 %v7510_v14, %s5514_s26  ;;  %3623 = vrot.lane.b32.xlu0 %v7512_v44, %s5514_s26  ;;  %v3433_v25 = vpop.f32.mrf.mxu1 }
 0x336   : > { %v3526_v61 = vsel %vm605_vm0, %v3487_v27, %v3486_v0  ;;  %v3490_v47 = vrot.slane %v3453_v19, 2  ;;  %v3488_v46 = vsel %vm605_vm0, %v3486_v0, %v3487_v27  ;;  %v3454_v42 = vadd.f32 %v3433_v25, %v3143_v36  ;;  %3985 = vmatprep.subr.bf16.mxu1 %v8010_v21  ;;  %v5418_v0 = vld [vmem:[%s7920_s3 + $0x48] sm:$0xff]   ;;  %v5419_v27 = vld [vmem:[%s7920_s3 + $0x90] sm:$0xff]  }
 0x337   : > { %v7528_v5 = vmax.f32 %v3452_v24, %v3526_v61  ;;  %v3435_v56 = vpop.f32.mrf.mxu1  ;;  %v7530_v51 = vmax.f32 %v3450_v49, %v3488_v46  ;;  %3868 = vmatpush1.bf16.msra.mxu0 %v5407_v38 }
 0x338   : > { %v3527_v26 = vsel %vm605_vm0, %v3490_v47, %v3489_v43  ;;  %v3491_v39 = vsel %vm605_vm0, %v3489_v43, %v3490_v47  ;;  %v3455_v29 = vadd.f32 %v3435_v56, %v3144_v59  ;;  %v3492_v34 = vrot.slane %v3454_v42, 2  ;;  %3986 = vmatpush1.bf16.msra.mxu1 %v5408_v48  ;;  %3869 = vmatprep.subr.bf16.mxu0 %v8010_v21 }
 0x339   : > { %v7542_v22 = vmax.f32 %v3453_v19, %v3527_v26  ;;  %3574 = vrot.lane.b32.xlu1 %v7510_v14, %s5515_s27  ;;  %3570 = vrot.lane.b32.xlu0 %v7512_v44, %s5515_s27  ;;  %v3437_v55 = vpop.f32.mrf.mxu1  ;;  %v7548_v33 = vmax.f32 %v3451_v32, %v3491_v39  ;;  %v5420_v19 = vld [vmem:[%s7920_s3 + $0x40] sm:$0xff]  }
 0x33a   : > { %v3456_v60 = vadd.f32 %v3437_v55, %v3145_v12  ;;  %v3495_v15 = vrot.slane %v3455_v29, 2  ;;  %3987 = vmatprep.subr.bf16.mxu1 %v8010_v21  ;;  %v3668_v26 = vld [vmem:[%s7923_s6] sm:$0x3] }
 0x33b   : > { %v3439_v31 = vpop.f32.mrf.mxu1  ;;  %3870 = vmatpush1.bf16.msra.mxu0 %v5409_v17 }
 0x33c   : > { %v3493_v4 = vrot.slane %v3456_v60, 2  ;;  %v3457_v49 = vadd.f32 %v3439_v31, %v3146_v13  ;;  %3988 = vmatpush1.bf16.msra.mxu1 %v5410_v63  ;;  %3871 = vmatprep.subr.bf16.mxu0 %v8010_v21 }
 0x33d   : > { %3576 = vrot.lane.b32.xlu1 %v7497_v20, %s5515_s27  ;;  %3572 = vrot.lane.b32.xlu0 %v7503_v53, %s5515_s27 }
 0x33e   : > { %v3528_v50 = vsel %vm605_vm0, %v3493_v4, %v3492_v34  ;;  %v3496_v41 = vrot.slane %v3457_v49, 2  ;;  %v3494_v2 = vsel %vm605_vm0, %v3492_v34, %v3493_v4  ;;  %3989 = vmatprep.subr.bf16.mxu1 %v8010_v21 }
 0x33f   : > { %v7564_v16 = vmax.f32 %v3456_v60, %v3528_v50  ;;  %v7566_v8 = vmax.f32 %v3454_v42, %v3494_v2  ;;  %3872 = vmatpush1.bf16.msra.mxu0 %v5411_v7  ;;  %v8011_v60 = vld [vmem:[#allocation5_spill] sm:$0xff] }
 0x340   : > { %v3529_v52 = vsel %vm605_vm0, %v3496_v41, %v3495_v15  ;;  %v3497_v32 = vsel %vm605_vm0, %v3495_v15, %v3496_v41  ;;  %3990 = vmatpush1.bf16.msra.mxu1 %v5412_v28  ;;  %3873 = vmatprep.subr.bf16.mxu0 %v8010_v21  ;;  %vm3594_vm0 = vcmask 883712   ;;  %v8012_v13 = vsub.s32 0, %v8011_v60 }
 0x341   : > { %v7578_v24 = vmax.f32 %v3457_v49, %v3529_v52  ;;  %3629 = vrot.lane.b32.xlu1 %v7528_v5, %s5514_s26  ;;  %3627 = vrot.lane.b32.xlu0 %v7530_v51, %s5514_s26  ;;  %v7584_v30 = vmax.f32 %v3455_v29, %v3497_v32  ;;  %v8013_v40 = vsub.s32 1, %v8011_v60 }
 0x342   : > { %3991 = vmatprep.subr.bf16.mxu1 %v8010_v21  ;;  %v7667_v31 = vrot.slane %v3668_v26, %v8012_v13 }
 0x343   : > { %3874 = vmatpush1.bf16.msra.mxu0 %v5413_v58  ;;  %v7671_v57 = vrot.slane %v3668_v26, %v8013_v40 }
 0x344   : > { %3992 = vmatpush1.bf16.msra.mxu1 %v5414_v1  ;;  %3875 = vmatprep.subr.bf16.mxu0 %v8010_v21 }
 0x345   : > { %3582 = vrot.lane.b32.xlu1 %v7528_v5, %s5515_s27  ;;  %3578 = vrot.lane.b32.xlu0 %v7530_v51, %s5515_s27 }
 0x346   : > { %3993 = vmatprep.subr.bf16.mxu1 %v8010_v21 }
 0x347   : > { %3876 = vmatpush1.bf16.msra.mxu0 %v5415_v11 }
 0x348   : > { %3994 = vmatpush1.bf16.msra.mxu1 %v5416_v62  ;;  %3889 = vmatprep.subr.bf16.mxu0 %v8010_v21 }
 0x349   : > { %3584 = vrot.lane.b32.xlu1 %v7542_v22, %s5515_s27  ;;  %3580 = vrot.lane.b32.xlu0 %v7548_v33, %s5515_s27 }
 0x34a   : > { %4007 = vmatprep.subr.bf16.mxu1 %v8010_v21 }
 0x34b   : > { %3890 = vmatpush2.bf16.msra.mxu0 %v5417_v45 }
 0x34c   : > { %4008 = vmatpush2.bf16.msra.mxu1 %v5418_v0  ;;  %3891 = vmatprep.subr.bf16.mxu0 %v8010_v21 }
 0x34d   : > { %3633 = vrot.lane.b32.xlu1 %v7564_v16, %s5514_s26  ;;  %3631 = vrot.lane.b32.xlu0 %v7566_v8, %s5514_s26  ;;  %s5453_s26 = sshll.u32 %s5519_s28, 4  ;;  %s5454_s26 = int_to_ptr.vmem [resolvable:$false] %s5453_s26 }
 0x34e   : > { %4009 = vmatprep.subr.bf16.mxu1 %v8010_v21  ;;  %s5455_s24 = scalar_lea.vmem %s5454_s26, 128  ;;  %p5456_p0 = scmp.lt.s32.totalorder %s7875_s22, %s5454_s26 }
 0x34f   : > { %3892 = vmatpush2.bf16.msra.mxu0 %v5419_v27  ;;  %p5457_p1 = scmp.lt.s32.totalorder %s5455_s24, %s5449_s25 }
 0x350   : > { %4010 = vmatpush2.bf16.msra.mxu1 %v5420_v19  ;;  %4126 = vmatprep.subr.bf16.mxu0 %v8010_v21 }
 0x351   : > { %3592 = vrot.lane.b32.xlu1 %v7578_v24, %s5515_s27  ;;  %3588 = vrot.lane.b32.xlu0 %v7584_v30, %s5515_s27  ;;  %p5458_p2 = por %p5457_p1, %p5456_p0 }
 0x352   : > { %4268 = vmatprep.subr.bf16.mxu1 %v8010_v21 }
 0x353   : > { %p5459_p3 = pnand %p5458_p2, %p5452_p13 }
 0x355   : > { %3590 = vrot.lane.b32.xlu1 %v7564_v16, %s5515_s27  ;;  %3586 = vrot.lane.b32.xlu0 %v7566_v8, %s5515_s27 }
 0x39b   : > { %v3622_v18 = vpop.permute.xlu1 %3621  ;;  %v3620_v3 = vpop.permute.xlu0 %3619 }
 0x39f   : > { %v3567_v36 = vpop.permute.xlu1 %3566  ;;  %v3563_v25 = vpop.permute.xlu0 %3562 }
 0x3a3   : > { %v3569_v43 = vpop.permute.xlu1 %3568  ;;  %v3565_v61 = vpop.permute.xlu0 %3564 }
 0x3a4   : > { %v3596_v42 = vsel %vm3594_vm0, %v3567_v36, %v3569_v43  ;;  %v3645_v12 = vsel %vm3643_vm5, %v3569_v43, %v3622_v18  ;;  %v3595_v39 = vsel %vm3594_vm0, %v3563_v25, %v3565_v61  ;;  %v3644_v9 = vsel %vm3643_vm5, %v3565_v61, %v3620_v3 }
 0x3a5   : > { %v3654_v34 = vmax.f32 %v7462_v10, %v3596_v42  ;;  %v3655_v4 = vmax.f32 %v7468_v37, %v3645_v12  ;;  %v3652_v50 = vmax.f32 %v7464_v54, %v3595_v39  ;;  %v3653_v41 = vmax.f32 %v7474_v6, %v3644_v9 }
 0x3a7   : > { %v3626_v47 = vpop.permute.xlu1 %3625  ;;  %v3624_v46 = vpop.permute.xlu0 %3623  ;;  %v3682_v63 = vadd.f32 %v7667_v31, %v3654_v34  ;;  %v3683_v54 = vadd.f32 %v7671_v57, %v3655_v4  ;;  %v3680_v6 = vadd.f32 %v7667_v31, %v3652_v50  ;;  %v3681_v7 = vadd.f32 %v7671_v57, %v3653_v41 }
 0x3a9   : > { %v3698_v1 = vmax.f32 %v3682_v63, 0.0  ;;  %v3699_v11 = vmax.f32 %v3683_v54, 0.0  ;;  %v3696_v62 = vmax.f32 %v3680_v6, 0.0  ;;  %v3697_v45 = vmax.f32 %v3681_v7, 0.0 }
 0x3ab   : > { %v3575_v59 = vpop.permute.xlu1 %3574  ;;  %v3571_v56 = vpop.permute.xlu0 %3570  ;;  %v7703_v42 = vpack.c.bf16 %v3698_v1, %v3696_v62  ;;  %v7705_v12 = vpack.c.bf16 %v3699_v11, %v3697_v45 }
 0x3ad   : > { %v3769_v50 = vunpack.c.l.b16 %v7703_v42  ;;  %v3770_v41 = vunpack.c.l.b16 %v7705_v12 }
 0x3af   : > { %v3577_v35 = vpop.permute.xlu1 %3576  ;;  %v3573_v23 = vpop.permute.xlu0 %3572  ;;  %v3777_v54 = vrot.slane %v3769_v50, 4  ;;  %v3787_v6 = vrot.slane %v3770_v41, 4 }
 0x3b0   : > { %v3598_v55 = vsel %vm3594_vm0, %v3575_v59, %v3577_v35  ;;  %v3647_v29 = vsel %vm3643_vm5, %v3577_v35, %v3626_v47  ;;  %v3597_v2 = vsel %vm3594_vm0, %v3571_v56, %v3573_v23  ;;  %v3646_v38 = vsel %vm3643_vm5, %v3573_v23, %v3624_v46 }
 0x3b1   : > { %v3658_v48 = vmax.f32 %v7510_v14, %v3598_v55  ;;  %v3659_v52 = vmax.f32 %v7497_v20, %v3647_v29  ;;  %v3656_v32 = vmax.f32 %v7512_v44, %v3597_v2  ;;  %v3657_v10 = vmax.f32 %v7503_v53, %v3646_v38 }
 0x3b2   : > { %v4041_v2 = vunpack.c.h.b16 %v7705_v12  ;;  %v5421_v12 = vld [vmem:[%s7920_s3 + $0xd8] sm:$0xff]  }
 0x3b3   : > { %v3630_v49 = vpop.permute.xlu1 %3629  ;;  %v3628_v15 = vpop.permute.xlu0 %3627  ;;  %v3686_v28 = vadd.f32 %v7667_v31, %v3658_v48  ;;  %v3687_v14 = vadd.f32 %v7671_v57, %v3659_v52  ;;  %v3684_v20 = vadd.f32 %v7667_v31, %v3656_v32  ;;  %v3685_v44 = vadd.f32 %v7671_v57, %v3657_v10 }
 0x3b4   : > { %v4195_v7 = vrot.slane %v4041_v2, 4 }
 0x3b5   : > { %v3702_v0 = vmax.f32 %v3686_v28, 0.0  ;;  %v3703_v27 = vmax.f32 %v3687_v14, 0.0  ;;  %v3700_v61 = vmax.f32 %v3684_v20, 0.0  ;;  %v3701_v47 = vmax.f32 %v3685_v44, 0.0 }
 0x3b7   : > { %v3583_v17 = vpop.permute.xlu1 %3582  ;;  %v3579_v37 = vpop.permute.xlu0 %3578  ;;  %v7707_v9 = vpack.c.bf16 %v3702_v0, %v3700_v61 }
 0x3b9   : > { %v3771_v48 = vunpack.c.l.b16 %v7707_v9 }
 0x3bb   : > { %v3585_v58 = vpop.permute.xlu1 %3584  ;;  %v3581_v53 = vpop.permute.xlu0 %3580 }
 0x3bc   : > { %v3600_v19 = vsel %vm3594_vm0, %v3583_v17, %v3585_v58  ;;  %v3649_v18 = vsel %vm3643_vm5, %v3585_v58, %v3630_v49  ;;  %v3599_v25 = vsel %vm3594_vm0, %v3579_v37, %v3581_v53  ;;  %v3648_v43 = vsel %vm3643_vm5, %v3581_v53, %v3628_v15 }
 0x3bd   : > { %v3662_v3 = vmax.f32 %v7528_v5, %v3600_v19  ;;  %v3663_v36 = vmax.f32 %v7542_v22, %v3649_v18  ;;  %v3660_v46 = vmax.f32 %v7530_v51, %v3599_v25  ;;  %v3661_v59 = vmax.f32 %v7548_v33, %v3648_v43 }
 0x3be   : > { %v3715_v51 = vpack.c.bf16 %v3703_v27, %v3701_v47  ;;  %v3778_v58 = vrot.slane %v3771_v48, 3  ;;  %v3901_v19 = vrot.slane %v3771_v48, 7 }
 0x3bf   : > { %v3634_v56 = vpop.permute.xlu1 %3633  ;;  %v3632_v35 = vpop.permute.xlu0 %3631  ;;  %v3691_v23 = vadd.f32 %v7671_v57, %v3663_v36  ;;  %v3690_v26 = vadd.f32 %v7667_v31, %v3662_v3  ;;  %v3688_v5 = vadd.f32 %v7667_v31, %v3660_v46  ;;  %v3689_v22 = vadd.f32 %v7671_v57, %v3661_v59 }
 0x3c0   : > { %v3772_v52 = vunpack.c.l.b16 %v3715_v51  ;;  %v4043_v11 = vunpack.c.h.b16 %v3715_v51 }
 0x3c1   : > { %v3707_v39 = vmax.f32 %v3691_v23, 0.0  ;;  %v3705_v55 = vmax.f32 %v3689_v22, 0.0  ;;  %v3706_v34 = vmax.f32 %v3690_v26, 0.0  ;;  %v3704_v4 = vmax.f32 %v3688_v5, 0.0 }
 0x3c2   : > { %v3788_v53 = vrot.slane %v3772_v52, 3  ;;  %v3907_v1 = vrot.slane %v3772_v52, 7  ;;  %v4054_v61 = vrot.slane %v4043_v11, 7  ;;  %v4196_v47 = vrot.slane %v4043_v11, 3  ;;  %v5429_v11 = vld [vmem:[%s7920_s3 + $0xb8] sm:$0xff]  }
 0x3c3   : > { %v3593_v33 = vpop.permute.xlu1 %3592  ;;  %v3589_v29 = vpop.permute.xlu0 %3588  ;;  %v3717_v38 = vpack.c.bf16 %v3707_v39, %v3705_v55  ;;  %v7721_v63 = vpack.c.bf16 %v3706_v34, %v3704_v4 }
 0x3c4   : > { %v3651_v13 = vsel %vm3643_vm5, %v3593_v33, %v3634_v56  ;;  %v3650_v40 = vsel %vm3643_vm5, %v3589_v29, %v3632_v35  ;;  %v3789_v46 = vsel %vm3779_vm6, %v3788_v53, %v3787_v6  ;;  %v3908_v59 = vsel %vm3779_vm6, %v3907_v1, %v3770_v41  ;;  %v5427_v53 = vld [vmem:[%s7920_s3 + $0xc0] sm:$0xff]   ;;  %v5428_v1 = vld [vmem:[%s7920_s3 + $0x110] sm:$0xff]  }
 0x3c5   : > { %v3667_v49 = vmax.f32 %v7578_v24, %v3651_v13  ;;  %v3665_v15 = vmax.f32 %v7584_v30, %v3650_v40  ;;  %v3774_v28 = vunpack.c.l.b16 %v3717_v38  ;;  %v3773_v62 = vunpack.c.l.b16 %v7721_v63 }
 0x3c6   : > { %v4045_v36 = vunpack.c.h.b16 %v3717_v38  ;;  %v4055_v48 = vsel %vm3779_vm6, %v4054_v61, %v4041_v2  ;;  %v4197_v52 = vsel %vm3779_vm6, %v4196_v47, %v4195_v7  ;;  %v5422_v2 = vld [vmem:[%s7920_s3 + $0x128] sm:$0xff]  }
 0x3c7   : > { %v3591_v32 = vpop.permute.xlu1 %3590  ;;  %v3587_v10 = vpop.permute.xlu0 %3586  ;;  %v3695_v17 = vadd.f32 %v7671_v57, %v3667_v49  ;;  %v3693_v37 = vadd.f32 %v7671_v57, %v3665_v15  ;;  %v3790_v18 = vrot.slane %v3774_v28, 2  ;;  %v3909_v3 = vrot.slane %v3774_v28, 6  ;;  %v5437_v61 = vld [vmem:[%s7920_s3 + $0xe8] sm:$0xff]  }
 0x3c8   : > { %v3602_v24 = vsel %vm3594_vm0, %v3591_v32, %v3593_v33  ;;  %v3601_v30 = vsel %vm3594_vm0, %v3587_v10, %v3589_v29  ;;  %v3781_v56 = vrot.slane %v3773_v62, 2  ;;  %v3903_v35 = vrot.slane %v3773_v62, 6  ;;  %v5430_v62 = vld [vmem:[%s7920_s3 + $0x108] sm:$0xff]  }
 0x3c9   : > { %v3711_v14 = vmax.f32 %v3695_v17, 0.0  ;;  %v3709_v20 = vmax.f32 %v3693_v37, 0.0  ;;  %v3666_v57 = vmax.f32 %v7564_v16, %v3602_v24  ;;  %v3664_v44 = vmax.f32 %v7566_v8, %v3601_v30 }
 0x3ca   : > { %v4056_v5 = vrot.slane %v4045_v36, 6  ;;  %v3791_v22 = vsel %vm3782_vm7, %v3790_v18, %v3789_v46  ;;  %v3910_v39 = vsel %vm3782_vm7, %v3909_v3, %v3908_v59  ;;  %v4198_v51 = vrot.slane %v4045_v36, 2  ;;  %v5435_v3 = vld [vmem:[%s7920_s3 + $0xa0] sm:$0xff]   ;;  %v5436_v36 = vld [vmem:[%s7920_s3 + $0xf0] sm:$0xff]  }
 0x3cb   : > { %v3719_v45 = vpack.c.bf16 %v3711_v14, %v3709_v20  ;;  %v3694_v0 = vadd.f32 %v7667_v31, %v3666_v57  ;;  %v3692_v27 = vadd.f32 %v7667_v31, %v3664_v44  ;;  %v3780_v49 = vsel %vm3779_vm6, %v3778_v58, %v3777_v54  ;;  %v5423_v20 = vld [vmem:[%s7920_s3 + $0xd0] sm:$0xff]   ;;  %v5424_v57 = vld [vmem:[%s7920_s3 + $0x120] sm:$0xff]   ;;  %v5425_v44 = vld [vmem:[%s7920_s3 + $0xc8] sm:$0xff]  }
 0x3cc   : > { %v3902_v15 = vsel %vm3779_vm6, %v3901_v19, %v3769_v50  ;;  %v3783_v32 = vsel %vm3782_vm7, %v3781_v56, %v3780_v49  ;;  %v4057_v17 = vsel %vm3782_vm7, %v4056_v5, %v4055_v48  ;;  %v4199_v50 = vsel %vm3782_vm7, %v4198_v51, %v4197_v52  ;;  %v5426_v58 = vld [vmem:[%s7920_s3 + $0x118] sm:$0xff]  }
 0x3cd   : > { %v3776_v25 = vunpack.c.l.b16 %v3719_v45  ;;  %v4047_v16 = vunpack.c.h.b16 %v3719_v45  ;;  %v3710_v43 = vmax.f32 %v3694_v0, 0.0  ;;  %v3708_v8 = vmax.f32 %v3692_v27, 0.0  ;;  %v5431_v45 = vld [vmem:[%s7920_s3 + $0xb0] sm:$0xff]   ;;  %v5432_v0 = vld [vmem:[%s7920_s3 + $0x100] sm:$0xff]   ;;  %v5433_v27 = vld [vmem:[%s7920_s3 + $0xa8] sm:$0xff]  }
 0x3ce   : > { %v3904_v10 = vsel %vm3782_vm7, %v3903_v35, %v3902_v15  ;;  %v5434_v19 = vld [vmem:[%s7920_s3 + $0xf8] sm:$0xff]   ;;  %v4042_v18 = vunpack.c.h.b16 %v7707_v9  ;;  %v5439_v35 = vld [vmem:[%s7920_s3 + $0xe0] sm:$0xff]  }
 0x3cf   : > { %v3792_v23 = vrot.slane %v3776_v25, 1  ;;  %v3911_v26 = vrot.slane %v3776_v25, 5  ;;  %v7734_v31 = vpack.c.bf16 %v3710_v43, %v3708_v8  ;;  %v4058_v55 = vrot.slane %v4047_v16, 5 }
 0x3d0   : > { %v4200_v13 = vrot.slane %v4047_v16, 1  ;;  %v4044_v25 = vunpack.c.h.b16 %v7721_v63  ;;  %v4040_v16 = vunpack.c.h.b16 %v7703_v42  ;;  %v4048_v43 = vrot.slane %v4042_v18, 7  ;;  %v5438_v63 = vld [vmem:[%s7920_s3 + $0x138] sm:$0xff]  }
 0x3d1   : > { %v3793_v33 = vsel %vm3785_vm8, %v3792_v23, %v3791_v22  ;;  %v3912_v29 = vsel %vm3785_vm8, %v3911_v26, %v3910_v39  ;;  %v3775_v40 = vunpack.c.l.b16 %v7734_v31  ;;  %v4059_v30 = vsel %vm3785_vm8, %v4058_v55, %v4057_v17  ;;  %v5440_v23 = vld [vmem:[%s7920_s3 + $0x130] sm:$0xff]  }
 0x3d2   : > { %v3795_v34 = vpack.c.b16 %v3793_v33, %v3793_v33  ;;  %v3914_v4 = vpack.c.b16 %v3912_v29, %v3912_v29  ;;  %v4201_v54 = vsel %vm3785_vm8, %v4200_v13, %v4199_v50  ;;  %v4061_v28 = vpack.c.b16 %v4059_v30, %v4059_v30  ;;  %v5441_v29 = vld [vmem:[%s7921_s4 + $0x18] ss:$0 sps:$4 sm:$0x11]  }
 0x3d3   : > { %v3784_v41 = vrot.slane %v3775_v40, 1  ;;  %v3905_v38 = vrot.slane %v3775_v40, 5  ;;  %v4203_v14 = vpack.c.b16 %v4201_v54, %v4201_v54  ;;  %v4046_v9 = vunpack.c.h.b16 %v7734_v31  ;;  %v5442_v40 = vld [vmem:[%s7921_s4 + $0x10] sm:$0xff]  }
 0x3d4   : > { %4974 = vmatprep.mubr.msk.bf16.mxu0 %vm3857_vm9, %v3795_v34  ;;  %4985 = vmatprep.mubr.msk.bf16.mxu1 %vm3857_vm9, %v3914_v4  ;;  %v4189_v8 = vrot.slane %v4042_v18, 3  ;;  %v4050_v47 = vrot.slane %v4044_v25, 6  ;;  %v4191_v46 = vrot.slane %v4044_v25, 2  ;;  %v4188_v42 = vrot.slane %v4040_v16, 4  ;;  %v5443_v34 = vld [vmem:[%s7921_s4 + $0x8] sm:$0xff]   ;;  %v5444_v4 = vld [vmem:[%s7921_s4] sm:$0xff]  }
 0x3d5   : > { %v3786_v37 = vsel %vm3785_vm8, %v3784_v41, %v3783_v32  ;;  %v3906_v24 = vsel %vm3785_vm8, %v3905_v38, %v3904_v10  ;;  %v4052_v59 = vrot.slane %v4046_v9, 5  ;;  %v4193_v56 = vrot.slane %v4046_v9, 1 }
 0x3d6   : > { %v3794_v6 = vpack.c.b16 %v3786_v37, %v3786_v37  ;;  %v3913_v7 = vpack.c.b16 %v3906_v24, %v3906_v24  ;;  %v4049_v26 = vsel %vm3779_vm6, %v4048_v43, %v4040_v16  ;;  %v4190_v5 = vsel %vm3779_vm6, %v4189_v8, %v4188_v42 }
 0x3d7   : > { %v4051_v31 = vsel %vm3782_vm7, %v4050_v47, %v4049_v26  ;;  %v4192_v22 = vsel %vm3782_vm7, %v4191_v46, %v4190_v5  ;;  %v4360_v13 = vsel %vm4358_vm10, %v5441_v29, 0  ;;  %v5518_v16 = vmov 1966171168  }
 0x3d8   : > { %3894 = vmatmul.mubr.bf16.vlgmr.msra.gmra.mxu0 %v3794_v6  ;;  %4012 = vmatmul.mubr.bf16.vlgmr.msra.gmra.mxu1 %v3913_v7  ;;  %v4053_v39 = vsel %vm3785_vm8, %v4052_v59, %v4051_v31  ;;  %v4194_v51 = vsel %vm3785_vm8, %v4193_v56, %v4192_v22  ;;  %v4417_v9 = vunpack.c.l.s4 %v5518_v16 }
 0x3d9   : > { %4127 = vmatpush1.bf16.msra.mxu0 %v5421_v12  ;;  %4269 = vmatpush1.bf16.msra.mxu1 %v5422_v2  ;;  %v4060_v55 = vpack.c.b16 %v4053_v39, %v4053_v39  ;;  %v4202_v33 = vpack.c.b16 %v4194_v51, %v4194_v51  ;;  %v5048_v12 = vld [vmem:[%s7924_s7] ss:$0 sm:$0xff] }
 0x3da   : > { %5016 = vmatprep.mubr.msk.bf16.mxu0 %vm3857_vm9, %v4061_v28  ;;  %5047 = vmatprep.mubr.msk.bf16.mxu1 %vm3857_vm9, %v4203_v14  ;;  %v4418_v43 = vunpack.c.0.s8 %v4417_v9 }
 0x3db   : > { %4128 = vmatprep.subr.bf16.mxu0 %v8010_v21  ;;  %4270 = vmatprep.subr.bf16.mxu1 %v8010_v21 }
 0x3dd   : > { %4129 = vmatpush1.bf16.msra.mxu0 %v5423_v20  ;;  %4271 = vmatpush1.bf16.msra.mxu1 %v5424_v57 }
 0x3de   : > { %4130 = vmatprep.subr.bf16.mxu0 %v8010_v21  ;;  %4272 = vmatprep.subr.bf16.mxu1 %v8010_v21 }
 0x3e1   : > { %4131 = vmatpush1.bf16.msra.mxu0 %v5425_v44  ;;  %4273 = vmatpush1.bf16.msra.mxu1 %v5426_v58  ;;  %v5049_v58 = vld [vmem:[%s7925_s8] ss:$0 sm:$0xff] }
 0x3e2   : > { %4132 = vmatprep.subr.bf16.mxu0 %v8010_v21  ;;  %4274 = vmatprep.subr.bf16.mxu1 %v8010_v21 }
 0x3e5   : > { %4133 = vmatpush1.bf16.msra.mxu0 %v5427_v53  ;;  %4275 = vmatpush1.bf16.msra.mxu1 %v5428_v1 }
 0x3e6   : > { %4134 = vmatprep.subr.bf16.mxu0 %v8010_v21  ;;  %4276 = vmatprep.subr.bf16.mxu1 %v8010_v21 }
 0x3e9   : > { %4135 = vmatpush1.bf16.msra.mxu0 %v5429_v11  ;;  %4277 = vmatpush1.bf16.msra.mxu1 %v5430_v62 }
 0x3ea   : > { %4136 = vmatprep.subr.bf16.mxu0 %v8010_v21  ;;  %4278 = vmatprep.subr.bf16.mxu1 %v8010_v21 }
 0x3ed   : > { %4137 = vmatpush1.bf16.msra.mxu0 %v5431_v45  ;;  %4279 = vmatpush1.bf16.msra.mxu1 %v5432_v0 }
 0x3ee   : > { %4138 = vmatprep.subr.bf16.mxu0 %v8010_v21  ;;  %4280 = vmatprep.subr.bf16.mxu1 %v8010_v21 }
 0x3f1   : > { %4139 = vmatpush1.bf16.msra.mxu0 %v5433_v27  ;;  %4281 = vmatpush1.bf16.msra.mxu1 %v5434_v19 }
 0x3f2   : > { %4140 = vmatprep.subr.bf16.mxu0 %v8010_v21  ;;  %4282 = vmatprep.subr.bf16.mxu1 %v8010_v21 }
 0x3f5   : > { %4141 = vmatpush1.bf16.msra.mxu0 %v5435_v3  ;;  %4283 = vmatpush1.bf16.msra.mxu1 %v5436_v36 }
 0x3f6   : > { %4154 = vmatprep.subr.bf16.mxu0 %v8010_v21  ;;  %4296 = vmatprep.subr.bf16.mxu1 %v8010_v21 }
 0x3f9   : > { %4155 = vmatpush2.bf16.msra.mxu0 %v5437_v61  ;;  %4297 = vmatpush2.bf16.msra.mxu1 %v5438_v63  ;;  %v4421_v61 = vsub.s32 %v4418_v43, %v8011_v60 }
 0x3fa   : > { %4156 = vmatprep.subr.bf16.mxu0 %v8010_v21  ;;  %4298 = vmatprep.subr.bf16.mxu1 %v8010_v21  ;;  %v5516_v21 = vmov 0.0  }
 0x3fd   : > { %4157 = vmatpush2.bf16.msra.mxu0 %v5439_v35  ;;  %4299 = vmatpush2.bf16.msra.mxu1 %v5440_v23 }
 0x3fe   : > { %5085 = vmatprep.subr.bf16.mxu0 %v5516_v21 }
 0x400   : > { %4159 = vmatmul.mubr.bf16.vlgmr.msra.gmra.mxu0 %v4060_v55  ;;  %4301 = vmatmul.mubr.bf16.vlgmr.msra.gmra.mxu1 %v4202_v33 }
 0x401   : > { %5086 = vmatpush3.bf16.msra.mxu0 %v4360_v13  ;;  %5093 = vmatprep.mubr.msk.bf16.mxu0 %vm5517_vm11, %v5516_v21 }
 0x402   : > { %5087 = vmatprep.subr.bf16.mxu0 %v5516_v21 }
 0x405   : > { %5088 = vmatpush3.bf16.msra.mxu0 %v5442_v40 }
 0x406   : > { %5089 = vmatprep.subr.bf16.mxu0 %v5516_v21 }
 0x409   : > { %5090 = vmatpush3.bf16.msra.mxu0 %v5443_v34 }
 0x40a   : > { %5091 = vmatprep.subr.bf16.mxu0 %v5516_v21 }
 0x40d   : > { %5092 = vmatpush3.bf16.msra.mxu0 %v5444_v4 }
 0x498   : > { %v3895_v49 = vpop.f32.mrf.mxu0  ;;  %v4013_v15 = vpop.f32.mrf.mxu1 }
 0x499   : > { %v4014_v17 = vadd.f32 %v4013_v15, %v3895_v49 }
 0x49a   : > { %v3897_v41 = vpop.f32.mrf.mxu0  ;;  %v4015_v38 = vpop.f32.mrf.mxu1 }
 0x49c   : > { %v3898_v48 = vpop.f32.mrf.mxu0  ;;  %v4016_v52 = vpop.f32.mrf.mxu1 }
 0x49e   : > { %v3899_v32 = vpop.f32.mrf.mxu0  ;;  %v4017_v10 = vpop.f32.mrf.mxu1 }
 0x4c0   : > { %v4160_v50 = vpop.f32.mrf.mxu0  ;;  %v4302_v37 = vpop.f32.mrf.mxu1 }
 0x4c1   : > { %v4166_v24 = vadd.f32 %v4160_v50, %v4014_v17 }
 0x4c2   : > { %v4162_v2 = vpop.f32.mrf.mxu0  ;;  %v4304_v30 = vpop.f32.mrf.mxu1 }
 0x4c3   : > { %v4308_v54 = vadd.f32 %v4302_v37, %v4166_v24 }
 0x4c4   : > { %v4163_v6 = vpop.f32.mrf.mxu0  ;;  %v4305_v7 = vpop.f32.mrf.mxu1 }
 0x4c5   : > { %v4316_v28 = vadd.f32 %v5048_v12, %v4308_v54 }
 0x4c6   : > { %v4164_v14 = vpop.f32.mrf.mxu0  ;;  %v4306_v20 = vpop.f32.mrf.mxu1 }
 0x4c7   : > { %v4317_v57 = vmax.f32 %v4316_v28, 0.0 }
 0x4c9   : > { %v4318_v44 = vpack.c.bf16 %v4317_v57, %v4317_v57 }
 0x4cb   : > { %5094 = vmatmul.mubr.msk.bf16.vlgmr.msra.gmra.mxu0 %vm4354_vm12, %v4318_v44 }
 0x58b   : > { %v4396_v53 = vpop.f32.mrf.mxu0 }
 0x58c   : > { %v4397_v1 = vadd.f32 %v5049_v58, %v4396_v53 }
 0x58d   : > { %v5095_v11 = vpop.f32.mrf.mxu0 }
 0x58e   : > { %v4403_v62 = vsel %vm4402_vm13, %v4397_v1, -inf }
 0x58f   : > { %4404 = vmax.xlane.f32.xlu0 %v4403_v62  ;;  %v4399_v45 = vpop.f32.mrf.mxu0 }
 0x591   : > { %v5096_v0 = vpop.f32.mrf.mxu0 }
 0x618   : > { %v4405_v27 = vpop.xlane.xlu0 %4404 }
 0x619   : > { %v4406_v19 = vsub.f32 %v4397_v1, %v4405_v27 }
 0x61b   : > { %v4407_v18 = vmul.f32 1.442695, %v4406_v19 }
 0x61d   : > { %5445 = vpow2.f32 %v4407_v18 }
 0x62a   : > { %v5446_v3 = vpop.eup %5445 }
 0x62b   : > { %v4409_v36 = vsel %vm4402_vm13, %v5446_v3, 0.0 }
 0x62c   : > { %4410 = vadd.xlane.f32.xlu1 %v4409_v36 }
 0x6b5   : > { %v4411_v25 = vpop.xlane.xlu1 %4410 }
 0x6b6   : > { %5447 = vlog2.f32 %v4411_v25 }
 0x6c3   : > { %v5448_v8 = vpop.eup %5447 }
 0x6c4   : > { %v4413_v63 = vmul.f32 0.6931472, %v5448_v8 }
 0x6c6   : > { %v4414_v47 = vsub.f32 %v4406_v19, %v4413_v63 }
 0x6c8   : > { %v4422_v46 = vrot.slane %v4414_v47, %v4421_v61 }
 0x6ca   : > { %v4423_v42 = vcombine.high %v4422_v46, %v4422_v46  ;;  %v4430_v59 = vrot.slane %v4422_v46, %v4421_v61 }
 0x6cc   : > { %v4437_v56 = vrot.slane %v4423_v42, %v4421_v61  ;;  %v4438_v35 = vcombine.high %v4430_v59, %v4430_v59  ;;  %4445 = vst.msk [vmem:[%s328_s16] sm:$0x1] %vm4444_vm14, %v4430_v59 }
 0x6ce   : > { %v4439_v60 = vcombine.high %v4437_v56, %v4437_v56  ;;  %4446 = vst.msk [vmem:[%s328_s16 + $0x1] sm:$0x1] %vm4444_vm14, %v4437_v56  ;;  %4447 = vst.msk [vmem:[%s328_s16 + $0x2] sm:$0x1] %vm4444_vm14, %v4438_v35 }
 0x6d0   : > { %4448 = vst.msk [vmem:[%s328_s16 + $0x3] sm:$0x1] %vm4444_vm14, %v4439_v60 }
 0x6d1   : > { %5462 = shalt.err (!%p5459_p3)
}
 0x6d2   : > { %s5463_s29 = scalar_lea.hbm %s7873_s23, 64  ;;  %s5467_s16 = scalar_lea.hbm %s7926_s9, 128 }
 0x6d3   : > { %p5464_p4 = scmp.ne.s32.totalorder %s7873_s23, %s5463_s29  ;;  %p5468_p9 = scmp.lt.s32.totalorder %s7873_s23, %s7926_s9 }
 0x6d4   : > { %p5469_p10 = scmp.lt.s32.totalorder %s5467_s16, %s5463_s29 }
 0x6d5   : > { %p5465_p7 = pnand %p5464_p4, %p5610_p5 }
 0x6d6   : > { %p5470_p11 = por %p5469_p10, %p5468_p9 }
 0x6d7   : > { %p5466_p8 = pneg %p5465_p7 }
 0x6d9   : > { %p5471_p12 = pnand %p5470_p11, %p5466_p8 }
 0x6db   : > { %5474 = shalt.err (!%p5471_p12)
}
 0x6dc   : > { %s5520_s25 = smov 16   ;;  %s5521_s28 = smov 1  }
 0x6dd   : > { %5097 = dma.vmem_to_hbm [thread:$0]  (%p5610_p5), %s7875_s22, 64, %s7873_s23, %s7877_s13, %s5520_s25, %s5520_s25, %s5521_s28  }
 0x6de PF: > { %p5103_p13 = scmp.ge.s32.totalorder %s5509_s12, 2  ;;  %s4478_s26 = sand.u32 1, %s5497_s30  }
 0x6df   : > { %s4479_s24 = scalar_lea.sflag [#allocation3], %s4478_s26 }
 0x6e0   : > { %p5100_p0 = pnand %p5103_p13, %p5614_p6 }
 0x6e2   : > { %p5101_p1 = pneg %p5100_p0 }
 0x6e4   : > { %5492 = dma.done.wait (%p5101_p1), %s4479_s24, 64  }
 0x6e5   : > { %5494 = vsyncadd (%p5101_p1), %s4479_s24, 4294967232  ;;  %p19_p2 = scmp.ge.s32.totalorder %s5597_s15, 4   ;;  %s8014_s30 = smov %s5501_s10 }
 0x6e6   : > { %s8015_s10 = smov %s5505_s11  ;;  %s8016_s11 = smov %s5608_s18 }
 0x6e7   : > { %s8017_s12 = smov %s5597_s15  ;;  %21 = sbr.rel (!%p19_p2) target bundleno = 3 (0x3), region = 102 }
 0x6ec   :  { %4484 = vsyncpa [#allocation3], 1 }
 0x6ed   :  { %4486 = vsyncpa [#allocation3 + $0x1], 1 }

</bundles_post_ra>
